<compile_context>
chip_gen: v5e
topology: v5e:2x2
jax: 0.10.0
libtpu: 0.0.40
codegen_flags: <defaults>
</compile_context>

<pallas_src>
import jax
import jax.numpy as jnp
from jax.experimental import pallas as pl
from jax.experimental.pallas import tpu as pltpu


# ----------------------------------------------------------------------------
# Fused kernel
# ----------------------------------------------------------------------------
def _up_double_conv_kernel(x1_ref, x2_ref, mh_ref, mwt_ref, ph_ref, pwt_ref,
                           w1_ref, b1_ref, w2_ref, b2_ref,
                           o_ref,
                           xpad1, col1, xpad2, col2):
    # x1_ref : (1, C1, H1, W1)  low-res input
    # x2_ref : (1, C2, H,  W)   skip connection
    # mh_ref : (H+2, H1)        bilinear-up + F.pad + conv-pad rows for x1
    # mwt_ref: (W1, W+2)        same for columns (already transposed)
    # ph_ref : (H+2, H)         conv zero-pad selection rows
    # pwt_ref: (W, W+2)         conv zero-pad selection cols (transposed)
    # w1_ref : (Cout, 9*Cin)    conv1 weights, tap-major / channel-minor
    # w2_ref : (Cout, 9*Cout)   conv2 weights
    # b*_ref : (Cout, 1)
    # o_ref  : (1, Cout, H*W)   lane-dense output
    c1 = x1_ref.shape[1]
    c2, h, w = x2_ref.shape[1], x2_ref.shape[2], x2_ref.shape[3]
    cin = c1 + c2
    cout = o_ref.shape[1]
    hw = h * w

    # ---- conv1 padded input, built fully in VMEM --------------------------
    # channels [0, c2): zero-padded skip connection (identity + pad matrices)
    for c in range(c2):
        tmp = jnp.dot(x2_ref[0, c], pwt_ref[...],
                      preferred_element_type=jnp.float32)
        xpad1[c] = jnp.dot(ph_ref[...], tmp,
                           preferred_element_type=jnp.float32)
    # channels [c2, cin): bilinear x2 upsample + F.pad + conv pad of x1
    for c in range(c1):
        tmp = jnp.dot(x1_ref[0, c], mwt_ref[...],
                      preferred_element_type=jnp.float32)
        xpad1[c2 + c] = jnp.dot(mh_ref[...], tmp,
                                preferred_element_type=jnp.float32)

    # ---- conv1: im2col + single weights-stationary matmul -----------------
    for dy in range(3):
        for dx in range(3):
            col1[dy * 3 + dx] = (
                xpad1[:, dy:dy + h, dx:dx + w].reshape(cin, hw))
    a1 = jnp.dot(w1_ref[...], col1[...].reshape(9 * cin, hw),
                 preferred_element_type=jnp.float32)
    a1 = jnp.maximum(a1 + b1_ref[...], 0.0)            # (cout, hw)

    # ---- conv2: re-pad conv1 activation in VMEM, im2col, matmul, ReLU -----
    a1_img = a1.reshape(cout, h, w)
    for c in range(cout):
        tmp = jnp.dot(a1_img[c], pwt_ref[...],
                      preferred_element_type=jnp.float32)
        xpad2[c] = jnp.dot(ph_ref[...], tmp,
                           preferred_element_type=jnp.float32)
    for dy in range(3):
        for dx in range(3):
            col2[dy * 3 + dx] = (
                xpad2[:, dy:dy + h, dx:dx + w].reshape(cout, hw))
    a2 = jnp.dot(w2_ref[...], col2[...].reshape(9 * cout, hw),
                 preferred_element_type=jnp.float32)
    a2 = jnp.maximum(a2 + b2_ref[...], 0.0)            # (cout, hw)

    o_ref[0] = a2.astype(o_ref.dtype)


# ----------------------------------------------------------------------------
# Interpolation / padding matrices (tiny, shape-only -> constant folded by XLA)
# ----------------------------------------------------------------------------
def _bilinear_matrix(out_size, in_size):
    """(out_size, in_size) row matrix for bilinear resize, align_corners=True."""
    scale = (in_size - 1) / (out_size - 1) if out_size > 1 else 0.0
    y = jnp.arange(out_size, dtype=jnp.float32) * scale
    y0 = jnp.clip(jnp.floor(y).astype(jnp.int32), 0, max(in_size - 1, 0))
    y1 = jnp.clip(y0 + 1, 0, in_size - 1)
    frac = y - y0.astype(jnp.float32)
    return (jax.nn.one_hot(y0, in_size, dtype=jnp.float32) * (1.0 - frac)[:, None]
            + jax.nn.one_hot(y1, in_size, dtype=jnp.float32) * frac[:, None])


def _upsample_pad_matrix(in_size, out_size, pad_before):
    """(out_size + 2, in_size): x2 bilinear upsample, then F.pad, then conv pad=1."""
    up = _bilinear_matrix(2 * in_size, in_size)
    m = jnp.zeros((out_size + 2, in_size), jnp.float32)
    return m.at[1 + pad_before:1 + pad_before + 2 * in_size, :].set(up)


def _pad_identity_matrix(size):
    """(size + 2, size): identity placed at rows [1, size+1) (conv zero-pad)."""
    m = jnp.zeros((size + 2, size), jnp.float32)
    return m.at[1:1 + size, :].set(jnp.eye(size, dtype=jnp.float32))


# ----------------------------------------------------------------------------
# Up module (forward pass)
# ----------------------------------------------------------------------------
def init_up_params(key, in_channels, out_channels):
    k1, k2, k3, k4 = jax.random.split(key, 4)
    return {
        # DoubleConv: conv1 (in->out), conv2 (out->out); weights in HWIO layout.
        "w1": 0.1 * jax.random.normal(k1, (3, 3, in_channels, out_channels),
                                      jnp.float32),
        "b1": 0.05 * jax.random.normal(k2, (out_channels,), jnp.float32),
        "w2": 0.1 * jax.random.normal(k3, (3, 3, out_channels, out_channels),
                                      jnp.float32),
        "b2": 0.05 * jax.random.normal(k4, (out_channels,), jnp.float32),
    }


@jax.jit
def up_forward(params, x1, x2):
    # x1, x2: NCHW float32
    n, c1, h1, w1s = x1.shape
    _, c2, h, w = x2.shape
    cin = c1 + c2
    cout = params["w1"].shape[-1]
    hw = h * w

    diff_y = h - 2 * h1
    diff_x = w - 2 * w1s
    mh = _upsample_pad_matrix(h1, h, diff_y // 2)            # (h+2, h1)
    mwt = _upsample_pad_matrix(w1s, w, diff_x // 2).T        # (w1, w+2)
    ph = _pad_identity_matrix(h)                             # (h+2, h)
    pwt = _pad_identity_matrix(w).T                          # (w,  w+2)

    # weights-stationary matmul layout: (cout, 9*cin), tap-major / channel-minor
    wm1 = jnp.transpose(params["w1"], (3, 0, 1, 2)).reshape(cout, 9 * cin)
    wm2 = jnp.transpose(params["w2"], (3, 0, 1, 2)).reshape(cout, 9 * cout)
    b1c = params["b1"].reshape(cout, 1)
    b2c = params["b2"].reshape(cout, 1)

    out = pl.pallas_call(
        _up_double_conv_kernel,
        out_shape=jax.ShapeDtypeStruct((n, cout, hw), x2.dtype),
        grid=(n,),
        in_specs=[
            pl.BlockSpec((1, c1, h1, w1s), lambda i: (i, 0, 0, 0)),
            pl.BlockSpec((1, c2, h, w), lambda i: (i, 0, 0, 0)),
            pl.BlockSpec((h + 2, h1), lambda i: (0, 0)),
            pl.BlockSpec((w1s, w + 2), lambda i: (0, 0)),
            pl.BlockSpec((h + 2, h), lambda i: (0, 0)),
            pl.BlockSpec((w, w + 2), lambda i: (0, 0)),
            pl.BlockSpec((cout, 9 * cin), lambda i: (0, 0)),
            pl.BlockSpec((cout, 1), lambda i: (0, 0)),
            pl.BlockSpec((cout, 9 * cout), lambda i: (0, 0)),
            pl.BlockSpec((cout, 1), lambda i: (0, 0)),
        ],
        out_specs=pl.BlockSpec((1, cout, hw), lambda i: (i, 0, 0)),
        scratch_shapes=[
            pltpu.VMEM((cin, h + 2, w + 2), jnp.float32),   # conv1 padded input
            pltpu.VMEM((9, cin, hw), jnp.float32),          # conv1 im2col
            pltpu.VMEM((cout, h + 2, w + 2), jnp.float32),  # conv2 padded input
            pltpu.VMEM((9, cout, hw), jnp.float32),         # conv2 im2col
        ],
        compiler_params=pltpu.CompilerParams(
            dimension_semantics=("parallel",)),
    )(x1, x2, mh, mwt, ph, pwt, wm1, b1c, wm2, b2c)

    # (n, cout, h*w) -> (n, cout, h, w) is a contiguous trailing-dim split
    # (bitcast-level reshape), so no extra HBM pass.
    return out.reshape(n, cout, h, w)


# ----------------------------------------------------------------------------
# Pure-JAX reference (for a correctness sanity check)
# ----------------------------------------------------------------------------
def up_forward_ref(params, x1, x2):
    n, c, h1, w1s = x1.shape
    mh = _bilinear_matrix(2 * h1, h1)
    mw = _bilinear_matrix(2 * w1s, w1s)
    x1 = jnp.einsum('ah,bw,nchw->ncab', mh, mw, x1)
    diff_y = x2.shape[2] - x1.shape[2]
    diff_x = x2.shape[3] - x1.shape[3]
    x1 = jnp.pad(x1, ((0, 0), (0, 0),
                      (diff_y // 2, diff_y - diff_y // 2),
                      (diff_x // 2, diff_x - diff_x // 2)))
    x = jnp.concatenate([x2, x1], axis=1)

    def conv(x_nchw, w_hwio, b):
        out = jax.lax.conv_general_dilated(
            x_nchw, w_hwio, window_strides=(1, 1), padding="SAME",
            dimension_numbers=("NCHW", "HWIO", "NCHW"))
        return jax.nn.relu(out + b[None, :, None, None])

    y = conv(x, params["w1"], params["b1"])
    y = conv(y, params["w2"], params["b2"])
    return y


if __name__ == "__main__":
    # Up(in_channels=4, out_channels=4, bilinear=True):
    #   x1: low-res feature map (2 channels), x2: skip connection (2 channels)
    in_channels, out_channels = 4, 4
    key = jax.random.PRNGKey(0)
    k_p, k_x1, k_x2 = jax.random.split(key, 3)

    params = init_up_params(k_p, in_channels, out_channels)
    x1 = jax.random.normal(k_x1, (2, 2, 8, 8), jnp.float32)     # NCHW
    x2 = jax.random.normal(k_x2, (2, 2, 16, 16), jnp.float32)   # NCHW

    out = jax.block_until_ready(up_forward(params, x1, x2))
    ref = jax.block_until_ready(up_forward_ref(params, x1, x2))

    assert out.shape == (2, out_channels, 16, 16), out.shape
    assert jnp.allclose(out, ref, atol=1e-3, rtol=1e-3), \
        float(jnp.max(jnp.abs(out - ref)))

    print("KERNEL_OK")
</pallas_src>

<mosaic_0001>
module attributes {stable_mosaic.version = 11 : i64} {
  func.func @_up_double_conv_kernel(%arg0: i32, %arg1: memref<1x2x8x8xf32, #tpu.memory_space<vmem>>, %arg2: memref<1x2x16x16xf32, #tpu.memory_space<vmem>>, %arg3: memref<18x8xf32, #tpu.memory_space<vmem>>, %arg4: memref<8x18xf32, #tpu.memory_space<vmem>>, %arg5: memref<18x16xf32, #tpu.memory_space<vmem>>, %arg6: memref<16x18xf32, #tpu.memory_space<vmem>>, %arg7: memref<4x36xf32, #tpu.memory_space<vmem>>, %arg8: memref<4x1xf32, #tpu.memory_space<vmem>>, %arg9: memref<4x36xf32, #tpu.memory_space<vmem>>, %arg10: memref<4x1xf32, #tpu.memory_space<vmem>>, %arg11: memref<1x4x256xf32, #tpu.memory_space<vmem>>, %arg12: memref<4x18x18xf32, #tpu.memory_space<vmem>>, %arg13: memref<9x4x256xf32, #tpu.memory_space<vmem>>, %arg14: memref<4x18x18xf32, #tpu.memory_space<vmem>>, %arg15: memref<9x4x256xf32, #tpu.memory_space<vmem>>) attributes {dimension_semantics = [#tpu.dimension_semantics<parallel>], iteration_bounds = array<i64: 2>, scalar_prefetch = 0 : i64, scratch_operands = 4 : i64, tpu.core_type = #tpu.core_type<tc>, window_params = [{transform_indices = @transform_0, window_bounds = array<i64: 1, 2, 8, 8>}, {transform_indices = @transform_1, window_bounds = array<i64: 1, 2, 16, 16>}, {pipeline_mode = #tpu.pipeline_mode<synchronous>, transform_indices = @transform_2, window_bounds = array<i64: 18, 8>}, {pipeline_mode = #tpu.pipeline_mode<synchronous>, transform_indices = @transform_3, window_bounds = array<i64: 8, 18>}, {pipeline_mode = #tpu.pipeline_mode<synchronous>, transform_indices = @transform_4, window_bounds = array<i64: 18, 16>}, {pipeline_mode = #tpu.pipeline_mode<synchronous>, transform_indices = @transform_5, window_bounds = array<i64: 16, 18>}, {pipeline_mode = #tpu.pipeline_mode<synchronous>, transform_indices = @transform_6, window_bounds = array<i64: 4, 36>}, {pipeline_mode = #tpu.pipeline_mode<synchronous>, transform_indices = @transform_7, window_bounds = array<i64: 4, 1>}, {pipeline_mode = #tpu.pipeline_mode<synchronous>, transform_indices = @transform_8, window_bounds = array<i64: 4, 36>}, {pipeline_mode = #tpu.pipeline_mode<synchronous>, transform_indices = @transform_9, window_bounds = array<i64: 4, 1>}, {transform_indices = @transform_10, window_bounds = array<i64: 1, 4, 256>}]} {
    %c0 = arith.constant 0 : index
    %c0_0 = arith.constant 0 : index
    %c0_1 = arith.constant 0 : index
    %c0_2 = arith.constant 0 : index
    %0 = vector.load %arg2[%c0, %c0_0, %c0_1, %c0_2] : memref<1x2x16x16xf32, #tpu.memory_space<vmem>>, vector<1x1x16x16xf32>
    %1 = vector.shape_cast %0 : vector<1x1x16x16xf32> to vector<16x16xf32>
    %c0_3 = arith.constant 0 : index
    %c0_4 = arith.constant 0 : index
    %2 = vector.load %arg6[%c0_3, %c0_4] : memref<16x18xf32, #tpu.memory_space<vmem>>, vector<16x18xf32>
    %cst = arith.constant dense<0.000000e+00> : vector<16x18xf32>
    %3 = tpu.matmul %1, %2, %cst {dimension_numbers = #tpu.dot_dimension_numbers<[1], [0], [0], [1], [0, 0, 1, 1], [], []>} : vector<16x16xf32>, vector<16x18xf32>, vector<16x18xf32> -> vector<16x18xf32>
    %c0_5 = arith.constant 0 : index
    %c0_6 = arith.constant 0 : index
    %4 = vector.load %arg5[%c0_5, %c0_6] : memref<18x16xf32, #tpu.memory_space<vmem>>, vector<18x16xf32>
    %cst_7 = arith.constant dense<0.000000e+00> : vector<18x18xf32>
    %5 = tpu.matmul %4, %3, %cst_7 {dimension_numbers = #tpu.dot_dimension_numbers<[1], [0], [0], [1], [0, 0, 1, 1], [], []>} : vector<18x16xf32>, vector<16x18xf32>, vector<18x18xf32> -> vector<18x18xf32>
    %c0_8 = arith.constant 0 : index
    %c0_9 = arith.constant 0 : index
    %c0_10 = arith.constant 0 : index
    %6 = vector.load %arg12[%c0_8, %c0_9, %c0_10] : memref<4x18x18xf32, #tpu.memory_space<vmem>>, vector<1x18x18xf32>
    %7 = vector.shape_cast %6 : vector<1x18x18xf32> to vector<18x18xf32>
    %8 = vector.shape_cast %5 : vector<18x18xf32> to vector<1x18x18xf32>
    tpu.vector_store %arg12[%c0_8, %c0_9, %c0_10], %8 {strides = array<i32>} : memref<4x18x18xf32, #tpu.memory_space<vmem>>, vector<1x18x18xf32>,
    %c0_11 = arith.constant 0 : index
    %c1 = arith.constant 1 : index
    %c0_12 = arith.constant 0 : index
    %c0_13 = arith.constant 0 : index
    %9 = vector.load %arg2[%c0_11, %c1, %c0_12, %c0_13] : memref<1x2x16x16xf32, #tpu.memory_space<vmem>>, vector<1x1x16x16xf32>
    %10 = vector.shape_cast %9 : vector<1x1x16x16xf32> to vector<16x16xf32>
    %c0_14 = arith.constant 0 : index
    %c0_15 = arith.constant 0 : index
    %11 = vector.load %arg6[%c0_14, %c0_15] : memref<16x18xf32, #tpu.memory_space<vmem>>, vector<16x18xf32>
    %cst_16 = arith.constant dense<0.000000e+00> : vector<16x18xf32>
    %12 = tpu.matmul %10, %11, %cst_16 {dimension_numbers = #tpu.dot_dimension_numbers<[1], [0], [0], [1], [0, 0, 1, 1], [], []>} : vector<16x16xf32>, vector<16x18xf32>, vector<16x18xf32> -> vector<16x18xf32>
    %c0_17 = arith.constant 0 : index
    %c0_18 = arith.constant 0 : index
    %13 = vector.load %arg5[%c0_17, %c0_18] : memref<18x16xf32, #tpu.memory_space<vmem>>, vector<18x16xf32>
    %cst_19 = arith.constant dense<0.000000e+00> : vector<18x18xf32>
    %14 = tpu.matmul %13, %12, %cst_19 {dimension_numbers = #tpu.dot_dimension_numbers<[1], [0], [0], [1], [0, 0, 1, 1], [], []>} : vector<18x16xf32>, vector<16x18xf32>, vector<18x18xf32> -> vector<18x18xf32>
    %c1_20 = arith.constant 1 : index
    %c0_21 = arith.constant 0 : index
    %c0_22 = arith.constant 0 : index
    %15 = vector.load %arg12[%c1_20, %c0_21, %c0_22] : memref<4x18x18xf32, #tpu.memory_space<vmem>>, vector<1x18x18xf32>
    %16 = vector.shape_cast %15 : vector<1x18x18xf32> to vector<18x18xf32>
    %17 = vector.shape_cast %14 : vector<18x18xf32> to vector<1x18x18xf32>
    tpu.vector_store %arg12[%c1_20, %c0_21, %c0_22], %17 {strides = array<i32>} : memref<4x18x18xf32, #tpu.memory_space<vmem>>, vector<1x18x18xf32>,
    %c0_23 = arith.constant 0 : index
    %c0_24 = arith.constant 0 : index
    %c0_25 = arith.constant 0 : index
    %c0_26 = arith.constant 0 : index
    %18 = vector.load %arg1[%c0_23, %c0_24, %c0_25, %c0_26] : memref<1x2x8x8xf32, #tpu.memory_space<vmem>>, vector<1x1x8x8xf32>
    %19 = vector.shape_cast %18 : vector<1x1x8x8xf32> to vector<8x8xf32>
    %c0_27 = arith.constant 0 : index
    %c0_28 = arith.constant 0 : index
    %20 = vector.load %arg4[%c0_27, %c0_28] : memref<8x18xf32, #tpu.memory_space<vmem>>, vector<8x18xf32>
    %cst_29 = arith.constant dense<0.000000e+00> : vector<8x18xf32>
    %21 = tpu.matmul %19, %20, %cst_29 {dimension_numbers = #tpu.dot_dimension_numbers<[1], [0], [0], [1], [0, 0, 1, 1], [], []>} : vector<8x8xf32>, vector<8x18xf32>, vector<8x18xf32> -> vector<8x18xf32>
    %c0_30 = arith.constant 0 : index
    %c0_31 = arith.constant 0 : index
    %22 = vector.load %arg3[%c0_30, %c0_31] : memref<18x8xf32, #tpu.memory_space<vmem>>, vector<18x8xf32>
    %cst_32 = arith.constant dense<0.000000e+00> : vector<18x18xf32>
    %23 = tpu.matmul %22, %21, %cst_32 {dimension_numbers = #tpu.dot_dimension_numbers<[1], [0], [0], [1], [0, 0, 1, 1], [], []>} : vector<18x8xf32>, vector<8x18xf32>, vector<18x18xf32> -> vector<18x18xf32>
    %c2 = arith.constant 2 : index
    %c0_33 = arith.constant 0 : index
    %c0_34 = arith.constant 0 : index
    %24 = vector.load %arg12[%c2, %c0_33, %c0_34] : memref<4x18x18xf32, #tpu.memory_space<vmem>>, vector<1x18x18xf32>
    %25 = vector.shape_cast %24 : vector<1x18x18xf32> to vector<18x18xf32>
    %26 = vector.shape_cast %23 : vector<18x18xf32> to vector<1x18x18xf32>
    tpu.vector_store %arg12[%c2, %c0_33, %c0_34], %26 {strides = array<i32>} : memref<4x18x18xf32, #tpu.memory_space<vmem>>, vector<1x18x18xf32>,
    %c0_35 = arith.constant 0 : index
    %c1_36 = arith.constant 1 : index
    %c0_37 = arith.constant 0 : index
    %c0_38 = arith.constant 0 : index
    %27 = vector.load %arg1[%c0_35, %c1_36, %c0_37, %c0_38] : memref<1x2x8x8xf32, #tpu.memory_space<vmem>>, vector<1x1x8x8xf32>
    %28 = vector.shape_cast %27 : vector<1x1x8x8xf32> to vector<8x8xf32>
    %c0_39 = arith.constant 0 : index
    %c0_40 = arith.constant 0 : index
    %29 = vector.load %arg4[%c0_39, %c0_40] : memref<8x18xf32, #tpu.memory_space<vmem>>, vector<8x18xf32>
    %cst_41 = arith.constant dense<0.000000e+00> : vector<8x18xf32>
    %30 = tpu.matmul %28, %29, %cst_41 {dimension_numbers = #tpu.dot_dimension_numbers<[1], [0], [0], [1], [0, 0, 1, 1], [], []>} : vector<8x8xf32>, vector<8x18xf32>, vector<8x18xf32> -> vector<8x18xf32>
    %c0_42 = arith.constant 0 : index
    %c0_43 = arith.constant 0 : index
    %31 = vector.load %arg3[%c0_42, %c0_43] : memref<18x8xf32, #tpu.memory_space<vmem>>, vector<18x8xf32>
    %cst_44 = arith.constant dense<0.000000e+00> : vector<18x18xf32>
    %32 = tpu.matmul %31, %30, %cst_44 {dimension_numbers = #tpu.dot_dimension_numbers<[1], [0], [0], [1], [0, 0, 1, 1], [], []>} : vector<18x8xf32>, vector<8x18xf32>, vector<18x18xf32> -> vector<18x18xf32>
    %c3 = arith.constant 3 : index
    %c0_45 = arith.constant 0 : index
    %c0_46 = arith.constant 0 : index
    %33 = vector.load %arg12[%c3, %c0_45, %c0_46] : memref<4x18x18xf32, #tpu.memory_space<vmem>>, vector<1x18x18xf32>
    %34 = vector.shape_cast %33 : vector<1x18x18xf32> to vector<18x18xf32>
    %35 = vector.shape_cast %32 : vector<18x18xf32> to vector<1x18x18xf32>
    tpu.vector_store %arg12[%c3, %c0_45, %c0_46], %35 {strides = array<i32>} : memref<4x18x18xf32, #tpu.memory_space<vmem>>, vector<1x18x18xf32>,
    %c0_47 = arith.constant 0 : index
    %c0_48 = arith.constant 0 : index
    %c0_49 = arith.constant 0 : index
    %36 = vector.load %arg12[%c0_47, %c0_48, %c0_49] : memref<4x18x18xf32, #tpu.memory_space<vmem>>, vector<4x16x16xf32>
    %37 = vector.shape_cast %36 : vector<4x16x16xf32> to vector<4x256xf32>
    %c0_50 = arith.constant 0 : index
    %c0_51 = arith.constant 0 : index
    %c0_52 = arith.constant 0 : index
    %38 = vector.load %arg13[%c0_50, %c0_51, %c0_52] : memref<9x4x256xf32, #tpu.memory_space<vmem>>, vector<1x4x256xf32>
    %39 = vector.shape_cast %38 : vector<1x4x256xf32> to vector<4x256xf32>
    %40 = vector.shape_cast %37 : vector<4x256xf32> to vector<1x4x256xf32>
    tpu.vector_store %arg13[%c0_50, %c0_51, %c0_52], %40 {strides = array<i32>} : memref<9x4x256xf32, #tpu.memory_space<vmem>>, vector<1x4x256xf32>,
    %c0_53 = arith.constant 0 : index
    %c0_54 = arith.constant 0 : index
    %c1_55 = arith.constant 1 : index
    %41 = vector.load %arg12[%c0_53, %c0_54, %c1_55] : memref<4x18x18xf32, #tpu.memory_space<vmem>>, vector<4x16x16xf32>
    %42 = vector.shape_cast %41 : vector<4x16x16xf32> to vector<4x256xf32>
    %c1_56 = arith.constant 1 : index
    %c0_57 = arith.constant 0 : index
    %c0_58 = arith.constant 0 : index
    %43 = vector.load %arg13[%c1_56, %c0_57, %c0_58] : memref<9x4x256xf32, #tpu.memory_space<vmem>>, vector<1x4x256xf32>
    %44 = vector.shape_cast %43 : vector<1x4x256xf32> to vector<4x256xf32>
    %45 = vector.shape_cast %42 : vector<4x256xf32> to vector<1x4x256xf32>
    tpu.vector_store %arg13[%c1_56, %c0_57, %c0_58], %45 {strides = array<i32>} : memref<9x4x256xf32, #tpu.memory_space<vmem>>, vector<1x4x256xf32>,
    %c0_59 = arith.constant 0 : index
    %c0_60 = arith.constant 0 : index
    %c2_61 = arith.constant 2 : index
    %46 = vector.load %arg12[%c0_59, %c0_60, %c2_61] : memref<4x18x18xf32, #tpu.memory_space<vmem>>, vector<4x16x16xf32>
    %47 = vector.shape_cast %46 : vector<4x16x16xf32> to vector<4x256xf32>
    %c2_62 = arith.constant 2 : index
    %c0_63 = arith.constant 0 : index
    %c0_64 = arith.constant 0 : index
    %48 = vector.load %arg13[%c2_62, %c0_63, %c0_64] : memref<9x4x256xf32, #tpu.memory_space<vmem>>, vector<1x4x256xf32>
    %49 = vector.shape_cast %48 : vector<1x4x256xf32> to vector<4x256xf32>
    %50 = vector.shape_cast %47 : vector<4x256xf32> to vector<1x4x256xf32>
    tpu.vector_store %arg13[%c2_62, %c0_63, %c0_64], %50 {strides = array<i32>} : memref<9x4x256xf32, #tpu.memory_space<vmem>>, vector<1x4x256xf32>,
    %c0_65 = arith.constant 0 : index
    %c1_66 = arith.constant 1 : index
    %c0_67 = arith.constant 0 : index
    %51 = vector.load %arg12[%c0_65, %c1_66, %c0_67] : memref<4x18x18xf32, #tpu.memory_space<vmem>>, vector<4x16x16xf32>
    %52 = vector.shape_cast %51 : vector<4x16x16xf32> to vector<4x256xf32>
    %c3_68 = arith.constant 3 : index
    %c0_69 = arith.constant 0 : index
    %c0_70 = arith.constant 0 : index
    %53 = vector.load %arg13[%c3_68, %c0_69, %c0_70] : memref<9x4x256xf32, #tpu.memory_space<vmem>>, vector<1x4x256xf32>
    %54 = vector.shape_cast %53 : vector<1x4x256xf32> to vector<4x256xf32>
    %55 = vector.shape_cast %52 : vector<4x256xf32> to vector<1x4x256xf32>
    tpu.vector_store %arg13[%c3_68, %c0_69, %c0_70], %55 {strides = array<i32>} : memref<9x4x256xf32, #tpu.memory_space<vmem>>, vector<1x4x256xf32>,
    %c0_71 = arith.constant 0 : index
    %c1_72 = arith.constant 1 : index
    %c1_73 = arith.constant 1 : index
    %56 = vector.load %arg12[%c0_71, %c1_72, %c1_73] : memref<4x18x18xf32, #tpu.memory_space<vmem>>, vector<4x16x16xf32>
    %57 = vector.shape_cast %56 : vector<4x16x16xf32> to vector<4x256xf32>
    %c4 = arith.constant 4 : index
    %c0_74 = arith.constant 0 : index
    %c0_75 = arith.constant 0 : index
    %58 = vector.load %arg13[%c4, %c0_74, %c0_75] : memref<9x4x256xf32, #tpu.memory_space<vmem>>, vector<1x4x256xf32>
    %59 = vector.shape_cast %58 : vector<1x4x256xf32> to vector<4x256xf32>
    %60 = vector.shape_cast %57 : vector<4x256xf32> to vector<1x4x256xf32>
    tpu.vector_store %arg13[%c4, %c0_74, %c0_75], %60 {strides = array<i32>} : memref<9x4x256xf32, #tpu.memory_space<vmem>>, vector<1x4x256xf32>,
    %c0_76 = arith.constant 0 : index
    %c1_77 = arith.constant 1 : index
    %c2_78 = arith.constant 2 : index
    %61 = vector.load %arg12[%c0_76, %c1_77, %c2_78] : memref<4x18x18xf32, #tpu.memory_space<vmem>>, vector<4x16x16xf32>
    %62 = vector.shape_cast %61 : vector<4x16x16xf32> to vector<4x256xf32>
    %c5 = arith.constant 5 : index
    %c0_79 = arith.constant 0 : index
    %c0_80 = arith.constant 0 : index
    %63 = vector.load %arg13[%c5, %c0_79, %c0_80] : memref<9x4x256xf32, #tpu.memory_space<vmem>>, vector<1x4x256xf32>
    %64 = vector.shape_cast %63 : vector<1x4x256xf32> to vector<4x256xf32>
    %65 = vector.shape_cast %62 : vector<4x256xf32> to vector<1x4x256xf32>
    tpu.vector_store %arg13[%c5, %c0_79, %c0_80], %65 {strides = array<i32>} : memref<9x4x256xf32, #tpu.memory_space<vmem>>, vector<1x4x256xf32>,
    %c0_81 = arith.constant 0 : index
    %c2_82 = arith.constant 2 : index
    %c0_83 = arith.constant 0 : index
    %66 = vector.load %arg12[%c0_81, %c2_82, %c0_83] : memref<4x18x18xf32, #tpu.memory_space<vmem>>, vector<4x16x16xf32>
    %67 = vector.shape_cast %66 : vector<4x16x16xf32> to vector<4x256xf32>
    %c6 = arith.constant 6 : index
    %c0_84 = arith.constant 0 : index
    %c0_85 = arith.constant 0 : index
    %68 = vector.load %arg13[%c6, %c0_84, %c0_85] : memref<9x4x256xf32, #tpu.memory_space<vmem>>, vector<1x4x256xf32>
    %69 = vector.shape_cast %68 : vector<1x4x256xf32> to vector<4x256xf32>
    %70 = vector.shape_cast %67 : vector<4x256xf32> to vector<1x4x256xf32>
    tpu.vector_store %arg13[%c6, %c0_84, %c0_85], %70 {strides = array<i32>} : memref<9x4x256xf32, #tpu.memory_space<vmem>>, vector<1x4x256xf32>,
    %c0_86 = arith.constant 0 : index
    %c2_87 = arith.constant 2 : index
    %c1_88 = arith.constant 1 : index
    %71 = vector.load %arg12[%c0_86, %c2_87, %c1_88] : memref<4x18x18xf32, #tpu.memory_space<vmem>>, vector<4x16x16xf32>
    %72 = vector.shape_cast %71 : vector<4x16x16xf32> to vector<4x256xf32>
    %c7 = arith.constant 7 : index
    %c0_89 = arith.constant 0 : index
    %c0_90 = arith.constant 0 : index
    %73 = vector.load %arg13[%c7, %c0_89, %c0_90] : memref<9x4x256xf32, #tpu.memory_space<vmem>>, vector<1x4x256xf32>
    %74 = vector.shape_cast %73 : vector<1x4x256xf32> to vector<4x256xf32>
    %75 = vector.shape_cast %72 : vector<4x256xf32> to vector<1x4x256xf32>
    tpu.vector_store %arg13[%c7, %c0_89, %c0_90], %75 {strides = array<i32>} : memref<9x4x256xf32, #tpu.memory_space<vmem>>, vector<1x4x256xf32>,
    %c0_91 = arith.constant 0 : index
    %c2_92 = arith.constant 2 : index
    %c2_93 = arith.constant 2 : index
    %76 = vector.load %arg12[%c0_91, %c2_92, %c2_93] : memref<4x18x18xf32, #tpu.memory_space<vmem>>, vector<4x16x16xf32>
    %77 = vector.shape_cast %76 : vector<4x16x16xf32> to vector<4x256xf32>
    %c8 = arith.constant 8 : index
    %c0_94 = arith.constant 0 : index
    %c0_95 = arith.constant 0 : index
    %78 = vector.load %arg13[%c8, %c0_94, %c0_95] : memref<9x4x256xf32, #tpu.memory_space<vmem>>, vector<1x4x256xf32>
    %79 = vector.shape_cast %78 : vector<1x4x256xf32> to vector<4x256xf32>
    %80 = vector.shape_cast %77 : vector<4x256xf32> to vector<1x4x256xf32>
    tpu.vector_store %arg13[%c8, %c0_94, %c0_95], %80 {strides = array<i32>} : memref<9x4x256xf32, #tpu.memory_space<vmem>>, vector<1x4x256xf32>,
    %c0_96 = arith.constant 0 : index
    %c0_97 = arith.constant 0 : index
    %81 = vector.load %arg7[%c0_96, %c0_97] : memref<4x36xf32, #tpu.memory_space<vmem>>, vector<4x36xf32>
    %c0_98 = arith.constant 0 : index
    %c0_99 = arith.constant 0 : index
    %c0_100 = arith.constant 0 : index
    %82 = vector.load %arg13[%c0_98, %c0_99, %c0_100] : memref<9x4x256xf32, #tpu.memory_space<vmem>>, vector<9x4x256xf32>
    %83 = vector.shape_cast %82 : vector<9x4x256xf32> to vector<36x256xf32>
    %cst_101 = arith.constant dense<0.000000e+00> : vector<4x256xf32>
    %84 = tpu.matmul %81, %83, %cst_101 {dimension_numbers = #tpu.dot_dimension_numbers<[1], [0], [0], [1], [0, 0, 1, 1], [], []>} : vector<4x36xf32>, vector<36x256xf32>, vector<4x256xf32> -> vector<4x256xf32>
    %c0_102 = arith.constant 0 : index
    %c0_103 = arith.constant 0 : index
    %85 = vector.load %arg8[%c0_102, %c0_103] : memref<4x1xf32, #tpu.memory_space<vmem>>, vector<4x1xf32>
    %86 = vector.broadcast %85 : vector<4x1xf32> to vector<4x256xf32>
    %87 = arith.addf %84, %86 : vector<4x256xf32>
    %cst_104 = arith.constant 0.000000e+00 : f32
    %88 = vector.broadcast %cst_104 : f32 to vector<4x256xf32>
    %89 = arith.maximumf %87, %88 : vector<4x256xf32>
    %90 = vector.shape_cast %89 : vector<4x256xf32> to vector<4x16x16xf32>
    %91 = vector.extract_strided_slice %90 {offsets = [0, 0, 0], sizes = [1, 16, 16], strides = [1, 1, 1]} : vector<4x16x16xf32> to vector<1x16x16xf32>
    %92 = vector.shape_cast %91 : vector<1x16x16xf32> to vector<16x16xf32>
    %c0_105 = arith.constant 0 : index
    %c0_106 = arith.constant 0 : index
    %93 = vector.load %arg6[%c0_105, %c0_106] : memref<16x18xf32, #tpu.memory_space<vmem>>, vector<16x18xf32>
    %cst_107 = arith.constant dense<0.000000e+00> : vector<16x18xf32>
    %94 = tpu.matmul %92, %93, %cst_107 {dimension_numbers = #tpu.dot_dimension_numbers<[1], [0], [0], [1], [0, 0, 1, 1], [], []>} : vector<16x16xf32>, vector<16x18xf32>, vector<16x18xf32> -> vector<16x18xf32>
    %c0_108 = arith.constant 0 : index
    %c0_109 = arith.constant 0 : index
    %95 = vector.load %arg5[%c0_108, %c0_109] : memref<18x16xf32, #tpu.memory_space<vmem>>, vector<18x16xf32>
    %cst_110 = arith.constant dense<0.000000e+00> : vector<18x18xf32>
    %96 = tpu.matmul %95, %94, %cst_110 {dimension_numbers = #tpu.dot_dimension_numbers<[1], [0], [0], [1], [0, 0, 1, 1], [], []>} : vector<18x16xf32>, vector<16x18xf32>, vector<18x18xf32> -> vector<18x18xf32>
    %c0_111 = arith.constant 0 : index
    %c0_112 = arith.constant 0 : index
    %c0_113 = arith.constant 0 : index
    %97 = vector.load %arg14[%c0_111, %c0_112, %c0_113] : memref<4x18x18xf32, #tpu.memory_space<vmem>>, vector<1x18x18xf32>
    %98 = vector.shape_cast %97 : vector<1x18x18xf32> to vector<18x18xf32>
    %99 = vector.shape_cast %96 : vector<18x18xf32> to vector<1x18x18xf32>
    tpu.vector_store %arg14[%c0_111, %c0_112, %c0_113], %99 {strides = array<i32>} : memref<4x18x18xf32, #tpu.memory_space<vmem>>, vector<1x18x18xf32>,
    %100 = vector.extract_strided_slice %90 {offsets = [1, 0, 0], sizes = [1, 16, 16], strides = [1, 1, 1]} : vector<4x16x16xf32> to vector<1x16x16xf32>
    %101 = vector.shape_cast %100 : vector<1x16x16xf32> to vector<16x16xf32>
    %c0_114 = arith.constant 0 : index
    %c0_115 = arith.constant 0 : index
    %102 = vector.load %arg6[%c0_114, %c0_115] : memref<16x18xf32, #tpu.memory_space<vmem>>, vector<16x18xf32>
    %cst_116 = arith.constant dense<0.000000e+00> : vector<16x18xf32>
    %103 = tpu.matmul %101, %102, %cst_116 {dimension_numbers = #tpu.dot_dimension_numbers<[1], [0], [0], [1], [0, 0, 1, 1], [], []>} : vector<16x16xf32>, vector<16x18xf32>, vector<16x18xf32> -> vector<16x18xf32>
    %c0_117 = arith.constant 0 : index
    %c0_118 = arith.constant 0 : index
    %104 = vector.load %arg5[%c0_117, %c0_118] : memref<18x16xf32, #tpu.memory_space<vmem>>, vector<18x16xf32>
    %cst_119 = arith.constant dense<0.000000e+00> : vector<18x18xf32>
    %105 = tpu.matmul %104, %103, %cst_119 {dimension_numbers = #tpu.dot_dimension_numbers<[1], [0], [0], [1], [0, 0, 1, 1], [], []>} : vector<18x16xf32>, vector<16x18xf32>, vector<18x18xf32> -> vector<18x18xf32>
    %c1_120 = arith.constant 1 : index
    %c0_121 = arith.constant 0 : index
    %c0_122 = arith.constant 0 : index
    %106 = vector.load %arg14[%c1_120, %c0_121, %c0_122] : memref<4x18x18xf32, #tpu.memory_space<vmem>>, vector<1x18x18xf32>
    %107 = vector.shape_cast %106 : vector<1x18x18xf32> to vector<18x18xf32>
    %108 = vector.shape_cast %105 : vector<18x18xf32> to vector<1x18x18xf32>
    tpu.vector_store %arg14[%c1_120, %c0_121, %c0_122], %108 {strides = array<i32>} : memref<4x18x18xf32, #tpu.memory_space<vmem>>, vector<1x18x18xf32>,
    %109 = vector.extract_strided_slice %90 {offsets = [2, 0, 0], sizes = [1, 16, 16], strides = [1, 1, 1]} : vector<4x16x16xf32> to vector<1x16x16xf32>
    %110 = vector.shape_cast %109 : vector<1x16x16xf32> to vector<16x16xf32>
    %c0_123 = arith.constant 0 : index
    %c0_124 = arith.constant 0 : index
    %111 = vector.load %arg6[%c0_123, %c0_124] : memref<16x18xf32, #tpu.memory_space<vmem>>, vector<16x18xf32>
    %cst_125 = arith.constant dense<0.000000e+00> : vector<16x18xf32>
    %112 = tpu.matmul %110, %111, %cst_125 {dimension_numbers = #tpu.dot_dimension_numbers<[1], [0], [0], [1], [0, 0, 1, 1], [], []>} : vector<16x16xf32>, vector<16x18xf32>, vector<16x18xf32> -> vector<16x18xf32>
    %c0_126 = arith.constant 0 : index
    %c0_127 = arith.constant 0 : index
    %113 = vector.load %arg5[%c0_126, %c0_127] : memref<18x16xf32, #tpu.memory_space<vmem>>, vector<18x16xf32>
    %cst_128 = arith.constant dense<0.000000e+00> : vector<18x18xf32>
    %114 = tpu.matmul %113, %112, %cst_128 {dimension_numbers = #tpu.dot_dimension_numbers<[1], [0], [0], [1], [0, 0, 1, 1], [], []>} : vector<18x16xf32>, vector<16x18xf32>, vector<18x18xf32> -> vector<18x18xf32>
    %c2_129 = arith.constant 2 : index
    %c0_130 = arith.constant 0 : index
    %c0_131 = arith.constant 0 : index
    %115 = vector.load %arg14[%c2_129, %c0_130, %c0_131] : memref<4x18x18xf32, #tpu.memory_space<vmem>>, vector<1x18x18xf32>
    %116 = vector.shape_cast %115 : vector<1x18x18xf32> to vector<18x18xf32>
    %117 = vector.shape_cast %114 : vector<18x18xf32> to vector<1x18x18xf32>
    tpu.vector_store %arg14[%c2_129, %c0_130, %c0_131], %117 {strides = array<i32>} : memref<4x18x18xf32, #tpu.memory_space<vmem>>, vector<1x18x18xf32>,
    %118 = vector.extract_strided_slice %90 {offsets = [3, 0, 0], sizes = [1, 16, 16], strides = [1, 1, 1]} : vector<4x16x16xf32> to vector<1x16x16xf32>
    %119 = vector.shape_cast %118 : vector<1x16x16xf32> to vector<16x16xf32>
    %c0_132 = arith.constant 0 : index
    %c0_133 = arith.constant 0 : index
    %120 = vector.load %arg6[%c0_132, %c0_133] : memref<16x18xf32, #tpu.memory_space<vmem>>, vector<16x18xf32>
    %cst_134 = arith.constant dense<0.000000e+00> : vector<16x18xf32>
    %121 = tpu.matmul %119, %120, %cst_134 {dimension_numbers = #tpu.dot_dimension_numbers<[1], [0], [0], [1], [0, 0, 1, 1], [], []>} : vector<16x16xf32>, vector<16x18xf32>, vector<16x18xf32> -> vector<16x18xf32>
    %c0_135 = arith.constant 0 : index
    %c0_136 = arith.constant 0 : index
    %122 = vector.load %arg5[%c0_135, %c0_136] : memref<18x16xf32, #tpu.memory_space<vmem>>, vector<18x16xf32>
    %cst_137 = arith.constant dense<0.000000e+00> : vector<18x18xf32>
    %123 = tpu.matmul %122, %121, %cst_137 {dimension_numbers = #tpu.dot_dimension_numbers<[1], [0], [0], [1], [0, 0, 1, 1], [], []>} : vector<18x16xf32>, vector<16x18xf32>, vector<18x18xf32> -> vector<18x18xf32>
    %c3_138 = arith.constant 3 : index
    %c0_139 = arith.constant 0 : index
    %c0_140 = arith.constant 0 : index
    %124 = vector.load %arg14[%c3_138, %c0_139, %c0_140] : memref<4x18x18xf32, #tpu.memory_space<vmem>>, vector<1x18x18xf32>
    %125 = vector.shape_cast %124 : vector<1x18x18xf32> to vector<18x18xf32>
    %126 = vector.shape_cast %123 : vector<18x18xf32> to vector<1x18x18xf32>
    tpu.vector_store %arg14[%c3_138, %c0_139, %c0_140], %126 {strides = array<i32>} : memref<4x18x18xf32, #tpu.memory_space<vmem>>, vector<1x18x18xf32>,
    %c0_141 = arith.constant 0 : index
    %c0_142 = arith.constant 0 : index
    %c0_143 = arith.constant 0 : index
    %127 = vector.load %arg14[%c0_141, %c0_142, %c0_143] : memref<4x18x18xf32, #tpu.memory_space<vmem>>, vector<4x16x16xf32>
    %128 = vector.shape_cast %127 : vector<4x16x16xf32> to vector<4x256xf32>
    %c0_144 = arith.constant 0 : index
    %c0_145 = arith.constant 0 : index
    %c0_146 = arith.constant 0 : index
    %129 = vector.load %arg15[%c0_144, %c0_145, %c0_146] : memref<9x4x256xf32, #tpu.memory_space<vmem>>, vector<1x4x256xf32>
    %130 = vector.shape_cast %129 : vector<1x4x256xf32> to vector<4x256xf32>
    %131 = vector.shape_cast %128 : vector<4x256xf32> to vector<1x4x256xf32>
    tpu.vector_store %arg15[%c0_144, %c0_145, %c0_146], %131 {strides = array<i32>} : memref<9x4x256xf32, #tpu.memory_space<vmem>>, vector<1x4x256xf32>,
    %c0_147 = arith.constant 0 : index
    %c0_148 = arith.constant 0 : index
    %c1_149 = arith.constant 1 : index
    %132 = vector.load %arg14[%c0_147, %c0_148, %c1_149] : memref<4x18x18xf32, #tpu.memory_space<vmem>>, vector<4x16x16xf32>
    %133 = vector.shape_cast %132 : vector<4x16x16xf32> to vector<4x256xf32>
    %c1_150 = arith.constant 1 : index
    %c0_151 = arith.constant 0 : index
    %c0_152 = arith.constant 0 : index
    %134 = vector.load %arg15[%c1_150, %c0_151, %c0_152] : memref<9x4x256xf32, #tpu.memory_space<vmem>>, vector<1x4x256xf32>
    %135 = vector.shape_cast %134 : vector<1x4x256xf32> to vector<4x256xf32>
    %136 = vector.shape_cast %133 : vector<4x256xf32> to vector<1x4x256xf32>
    tpu.vector_store %arg15[%c1_150, %c0_151, %c0_152], %136 {strides = array<i32>} : memref<9x4x256xf32, #tpu.memory_space<vmem>>, vector<1x4x256xf32>,
    %c0_153 = arith.constant 0 : index
    %c0_154 = arith.constant 0 : index
    %c2_155 = arith.constant 2 : index
    %137 = vector.load %arg14[%c0_153, %c0_154, %c2_155] : memref<4x18x18xf32, #tpu.memory_space<vmem>>, vector<4x16x16xf32>
    %138 = vector.shape_cast %137 : vector<4x16x16xf32> to vector<4x256xf32>
    %c2_156 = arith.constant 2 : index
    %c0_157 = arith.constant 0 : index
    %c0_158 = arith.constant 0 : index
    %139 = vector.load %arg15[%c2_156, %c0_157, %c0_158] : memref<9x4x256xf32, #tpu.memory_space<vmem>>, vector<1x4x256xf32>
    %140 = vector.shape_cast %139 : vector<1x4x256xf32> to vector<4x256xf32>
    %141 = vector.shape_cast %138 : vector<4x256xf32> to vector<1x4x256xf32>
    tpu.vector_store %arg15[%c2_156, %c0_157, %c0_158], %141 {strides = array<i32>} : memref<9x4x256xf32, #tpu.memory_space<vmem>>, vector<1x4x256xf32>,
    %c0_159 = arith.constant 0 : index
    %c1_160 = arith.constant 1 : index
    %c0_161 = arith.constant 0 : index
    %142 = vector.load %arg14[%c0_159, %c1_160, %c0_161] : memref<4x18x18xf32, #tpu.memory_space<vmem>>, vector<4x16x16xf32>
    %143 = vector.shape_cast %142 : vector<4x16x16xf32> to vector<4x256xf32>
    %c3_162 = arith.constant 3 : index
    %c0_163 = arith.constant 0 : index
    %c0_164 = arith.constant 0 : index
    %144 = vector.load %arg15[%c3_162, %c0_163, %c0_164] : memref<9x4x256xf32, #tpu.memory_space<vmem>>, vector<1x4x256xf32>
    %145 = vector.shape_cast %144 : vector<1x4x256xf32> to vector<4x256xf32>
    %146 = vector.shape_cast %143 : vector<4x256xf32> to vector<1x4x256xf32>
    tpu.vector_store %arg15[%c3_162, %c0_163, %c0_164], %146 {strides = array<i32>} : memref<9x4x256xf32, #tpu.memory_space<vmem>>, vector<1x4x256xf32>,
    %c0_165 = arith.constant 0 : index
    %c1_166 = arith.constant 1 : index
    %c1_167 = arith.constant 1 : index
    %147 = vector.load %arg14[%c0_165, %c1_166, %c1_167] : memref<4x18x18xf32, #tpu.memory_space<vmem>>, vector<4x16x16xf32>
    %148 = vector.shape_cast %147 : vector<4x16x16xf32> to vector<4x256xf32>
    %c4_168 = arith.constant 4 : index
    %c0_169 = arith.constant 0 : index
    %c0_170 = arith.constant 0 : index
    %149 = vector.load %arg15[%c4_168, %c0_169, %c0_170] : memref<9x4x256xf32, #tpu.memory_space<vmem>>, vector<1x4x256xf32>
    %150 = vector.shape_cast %149 : vector<1x4x256xf32> to vector<4x256xf32>
    %151 = vector.shape_cast %148 : vector<4x256xf32> to vector<1x4x256xf32>
    tpu.vector_store %arg15[%c4_168, %c0_169, %c0_170], %151 {strides = array<i32>} : memref<9x4x256xf32, #tpu.memory_space<vmem>>, vector<1x4x256xf32>,
    %c0_171 = arith.constant 0 : index
    %c1_172 = arith.constant 1 : index
    %c2_173 = arith.constant 2 : index
    %152 = vector.load %arg14[%c0_171, %c1_172, %c2_173] : memref<4x18x18xf32, #tpu.memory_space<vmem>>, vector<4x16x16xf32>
    %153 = vector.shape_cast %152 : vector<4x16x16xf32> to vector<4x256xf32>
    %c5_174 = arith.constant 5 : index
    %c0_175 = arith.constant 0 : index
    %c0_176 = arith.constant 0 : index
    %154 = vector.load %arg15[%c5_174, %c0_175, %c0_176] : memref<9x4x256xf32, #tpu.memory_space<vmem>>, vector<1x4x256xf32>
    %155 = vector.shape_cast %154 : vector<1x4x256xf32> to vector<4x256xf32>
    %156 = vector.shape_cast %153 : vector<4x256xf32> to vector<1x4x256xf32>
    tpu.vector_store %arg15[%c5_174, %c0_175, %c0_176], %156 {strides = array<i32>} : memref<9x4x256xf32, #tpu.memory_space<vmem>>, vector<1x4x256xf32>,
    %c0_177 = arith.constant 0 : index
    %c2_178 = arith.constant 2 : index
    %c0_179 = arith.constant 0 : index
    %157 = vector.load %arg14[%c0_177, %c2_178, %c0_179] : memref<4x18x18xf32, #tpu.memory_space<vmem>>, vector<4x16x16xf32>
    %158 = vector.shape_cast %157 : vector<4x16x16xf32> to vector<4x256xf32>
    %c6_180 = arith.constant 6 : index
    %c0_181 = arith.constant 0 : index
    %c0_182 = arith.constant 0 : index
    %159 = vector.load %arg15[%c6_180, %c0_181, %c0_182] : memref<9x4x256xf32, #tpu.memory_space<vmem>>, vector<1x4x256xf32>
    %160 = vector.shape_cast %159 : vector<1x4x256xf32> to vector<4x256xf32>
    %161 = vector.shape_cast %158 : vector<4x256xf32> to vector<1x4x256xf32>
    tpu.vector_store %arg15[%c6_180, %c0_181, %c0_182], %161 {strides = array<i32>} : memref<9x4x256xf32, #tpu.memory_space<vmem>>, vector<1x4x256xf32>,
    %c0_183 = arith.constant 0 : index
    %c2_184 = arith.constant 2 : index
    %c1_185 = arith.constant 1 : index
    %162 = vector.load %arg14[%c0_183, %c2_184, %c1_185] : memref<4x18x18xf32, #tpu.memory_space<vmem>>, vector<4x16x16xf32>
    %163 = vector.shape_cast %162 : vector<4x16x16xf32> to vector<4x256xf32>
    %c7_186 = arith.constant 7 : index
    %c0_187 = arith.constant 0 : index
    %c0_188 = arith.constant 0 : index
    %164 = vector.load %arg15[%c7_186, %c0_187, %c0_188] : memref<9x4x256xf32, #tpu.memory_space<vmem>>, vector<1x4x256xf32>
    %165 = vector.shape_cast %164 : vector<1x4x256xf32> to vector<4x256xf32>
    %166 = vector.shape_cast %163 : vector<4x256xf32> to vector<1x4x256xf32>
    tpu.vector_store %arg15[%c7_186, %c0_187, %c0_188], %166 {strides = array<i32>} : memref<9x4x256xf32, #tpu.memory_space<vmem>>, vector<1x4x256xf32>,
    %c0_189 = arith.constant 0 : index
    %c2_190 = arith.constant 2 : index
    %c2_191 = arith.constant 2 : index
    %167 = vector.load %arg14[%c0_189, %c2_190, %c2_191] : memref<4x18x18xf32, #tpu.memory_space<vmem>>, vector<4x16x16xf32>
    %168 = vector.shape_cast %167 : vector<4x16x16xf32> to vector<4x256xf32>
    %c8_192 = arith.constant 8 : index
    %c0_193 = arith.constant 0 : index
    %c0_194 = arith.constant 0 : index
    %169 = vector.load %arg15[%c8_192, %c0_193, %c0_194] : memref<9x4x256xf32, #tpu.memory_space<vmem>>, vector<1x4x256xf32>
    %170 = vector.shape_cast %169 : vector<1x4x256xf32> to vector<4x256xf32>
    %171 = vector.shape_cast %168 : vector<4x256xf32> to vector<1x4x256xf32>
    tpu.vector_store %arg15[%c8_192, %c0_193, %c0_194], %171 {strides = array<i32>} : memref<9x4x256xf32, #tpu.memory_space<vmem>>, vector<1x4x256xf32>,
    %c0_195 = arith.constant 0 : index
    %c0_196 = arith.constant 0 : index
    %172 = vector.load %arg9[%c0_195, %c0_196] : memref<4x36xf32, #tpu.memory_space<vmem>>, vector<4x36xf32>
    %c0_197 = arith.constant 0 : index
    %c0_198 = arith.constant 0 : index
    %c0_199 = arith.constant 0 : index
    %173 = vector.load %arg15[%c0_197, %c0_198, %c0_199] : memref<9x4x256xf32, #tpu.memory_space<vmem>>, vector<9x4x256xf32>
    %174 = vector.shape_cast %173 : vector<9x4x256xf32> to vector<36x256xf32>
    %cst_200 = arith.constant dense<0.000000e+00> : vector<4x256xf32>
    %175 = tpu.matmul %172, %174, %cst_200 {dimension_numbers = #tpu.dot_dimension_numbers<[1], [0], [0], [1], [0, 0, 1, 1], [], []>} : vector<4x36xf32>, vector<36x256xf32>, vector<4x256xf32> -> vector<4x256xf32>
    %c0_201 = arith.constant 0 : index
    %c0_202 = arith.constant 0 : index
    %176 = vector.load %arg10[%c0_201, %c0_202] : memref<4x1xf32, #tpu.memory_space<vmem>>, vector<4x1xf32>
    %177 = vector.broadcast %176 : vector<4x1xf32> to vector<4x256xf32>
    %178 = arith.addf %175, %177 : vector<4x256xf32>
    %cst_203 = arith.constant 0.000000e+00 : f32
    %179 = vector.broadcast %cst_203 : f32 to vector<4x256xf32>
    %180 = arith.maximumf %178, %179 : vector<4x256xf32>
    %c0_204 = arith.constant 0 : index
    %c0_205 = arith.constant 0 : index
    %c0_206 = arith.constant 0 : index
    %181 = vector.load %arg11[%c0_204, %c0_205, %c0_206] : memref<1x4x256xf32, #tpu.memory_space<vmem>>, vector<1x4x256xf32>
    %182 = vector.shape_cast %181 : vector<1x4x256xf32> to vector<4x256xf32>
    %183 = vector.shape_cast %180 : vector<4x256xf32> to vector<1x4x256xf32>
    tpu.vector_store %arg11[%c0_204, %c0_205, %c0_206], %183 {strides = array<i32>} : memref<1x4x256xf32, #tpu.memory_space<vmem>>, vector<1x4x256xf32>,
    return
  }
  func.func @transform_0(%arg0: i32) -> (i32, i32, i32, i32) {
    %c0_i32 = arith.constant 0 : i32
    %c0_i32_0 = arith.constant 0 : i32
    %c0_i32_1 = arith.constant 0 : i32
    %c0_i32_2 = arith.constant 0 : i32
    return %arg0, %c0_i32, %c0_i32_0, %c0_i32_1 : i32, i32, i32, i32
  }
  func.func @transform_1(%arg0: i32) -> (i32, i32, i32, i32) {
    %c0_i32 = arith.constant 0 : i32
    %c0_i32_0 = arith.constant 0 : i32
    %c0_i32_1 = arith.constant 0 : i32
    %c0_i32_2 = arith.constant 0 : i32
    return %arg0, %c0_i32, %c0_i32_0, %c0_i32_1 : i32, i32, i32, i32
  }
  func.func @transform_2(%arg0: i32) -> (i32, i32) {
    %c0_i32 = arith.constant 0 : i32
    %c0_i32_0 = arith.constant 0 : i32
    %c0_i32_1 = arith.constant 0 : i32
    return %c0_i32, %c0_i32_0 : i32, i32
  }
  func.func @transform_3(%arg0: i32) -> (i32, i32) {
    %c0_i32 = arith.constant 0 : i32
    %c0_i32_0 = arith.constant 0 : i32
    %c0_i32_1 = arith.constant 0 : i32
    return %c0_i32, %c0_i32_0 : i32, i32
  }
  func.func @transform_4(%arg0: i32) -> (i32, i32) {
    %c0_i32 = arith.constant 0 : i32
    %c0_i32_0 = arith.constant 0 : i32
    %c0_i32_1 = arith.constant 0 : i32
    return %c0_i32, %c0_i32_0 : i32, i32
  }
  func.func @transform_5(%arg0: i32) -> (i32, i32) {
    %c0_i32 = arith.constant 0 : i32
    %c0_i32_0 = arith.constant 0 : i32
    %c0_i32_1 = arith.constant 0 : i32
    return %c0_i32, %c0_i32_0 : i32, i32
  }
  func.func @transform_6(%arg0: i32) -> (i32, i32) {
    %c0_i32 = arith.constant 0 : i32
    %c0_i32_0 = arith.constant 0 : i32
    %c0_i32_1 = arith.constant 0 : i32
    return %c0_i32, %c0_i32_0 : i32, i32
  }
  func.func @transform_7(%arg0: i32) -> (i32, i32) {
    %c0_i32 = arith.constant 0 : i32
    %c0_i32_0 = arith.constant 0 : i32
    %c0_i32_1 = arith.constant 0 : i32
    return %c0_i32, %c0_i32_0 : i32, i32
  }
  func.func @transform_8(%arg0: i32) -> (i32, i32) {
    %c0_i32 = arith.constant 0 : i32
    %c0_i32_0 = arith.constant 0 : i32
    %c0_i32_1 = arith.constant 0 : i32
    return %c0_i32, %c0_i32_0 : i32, i32
  }
  func.func @transform_9(%arg0: i32) -> (i32, i32) {
    %c0_i32 = arith.constant 0 : i32
    %c0_i32_0 = arith.constant 0 : i32
    %c0_i32_1 = arith.constant 0 : i32
    return %c0_i32, %c0_i32_0 : i32, i32
  }
  func.func @transform_10(%arg0: i32) -> (i32, i32, i32) {
    %c0_i32 = arith.constant 0 : i32
    %c0_i32_0 = arith.constant 0 : i32
    %c0_i32_1 = arith.constant 0 : i32
    return %arg0, %c0_i32, %c0_i32_0 : i32, i32, i32
  }
}

</mosaic_0001>

<bundles_post_ra>
// kernel: up_forward.1
= control target key start
LH: loop header
LB: loop body
LE: loop exit
PB: predicated region body
PF: predicated region fallthrough
CT: control target
= control target key end

     0   :  { %s5504_s13 = smov 0   ;;  %s9026_s0 = inlined_call_operand.vmem [shape: f32[2,2,8,8], index: 0, kind: input, shape index: {}]   ;;  %s9027_s1 = inlined_call_operand.vmem [shape: f32[2,2,16,16], index: 1, kind: input, shape index: {}]   ;;  %s9028_s2 = inlined_call_operand.vmem [shape: f32[18,8], index: 2, kind: input, shape index: {}]   ;;  %s9029_s3 = inlined_call_operand.vmem [shape: f32[8,18], index: 3, kind: input, shape index: {}]   ;;  %s9030_s4 = inlined_call_operand.vmem [shape: f32[18,16], index: 4, kind: input, shape index: {}]   ;;  %s9031_s5 = inlined_call_operand.vmem [shape: f32[16,18], index: 5, kind: input, shape index: {}]   ;;  %s9032_s6 = inlined_call_operand.vmem [shape: f32[4,36], index: 6, kind: input, shape index: {}]   ;;  %s9033_s7 = inlined_call_operand.vmem [shape: f32[4,1], index: 7, kind: input, shape index: {}]   ;;  %s9034_s8 = inlined_call_operand.vmem [shape: f32[4,36], index: 8, kind: input, shape index: {}]   ;;  %s9035_s9 = inlined_call_operand.vmem [shape: f32[4,1], index: 9, kind: input, shape index: {}]   ;;  %s9036_s10 = inlined_call_operand.vmem [shape: f32[2,4,256], index: 10, kind: output, shape index: {}]  }
   0x1 LB: > { %s5342_s14 = sadd.s32 4294967295, %s5435_s13   ;;  %p5346_p0 = scmp.ge.s32.totalorder %s5435_s13, 1  ;;  %s5435_s13 = sphi %s5504_s13, %s20_s13  }
   0x2   : > { %p322_p1 = scmp.lt.s32.totalorder %s5435_s13, 3 }
   0x4   : > { %p323_p2 = pnand %p5346_p0, %p322_p1 }
   0x6   : > { %326 = sbr.rel (%p323_p2) target bundleno = 2251 (0x8cb), region = 60 }
   0xb   : > { %v383_v0 = vld [vmem:[%s9031_s5 + $0x8] sm:$0xff]  ;;  %v382_v1 = vld [vmem:[%s9031_s5] sm:$0xff]  ;;  %p365_p3 = scmp.lt.s32.totalorder %s5342_s14, 1  ;;  %vm384_vm0 = vcmask 130048   ;;  %vm535_vm1 = vcmask 64512   ;;  %vm452_vm2 = vcmask 146432  }
   0xc   : > { %405 = vmatpush.msra.mxu0 %v383_v0  ;;  %482 = vmatpush.msra.mxu2 %v383_v0  ;;  %v534_v2 = vld [vmem:[%s9029_s3] sm:$0xff]  ;;  %v415_v16 = vld [vmem:[%s9030_s4 + $0x8] sm:$0xff]  ;;  %v416_v19 = vld [vmem:[%s9030_s4 + $0x10] sm:$0x3]  ;;  %s5437_s27 = smov 127   ;;  %vm455_vm3 = vcmask 140288  }
   0xd   : > { %s9243_s14 = smov (!%p365_p3, %s5342_s14), 1  ;;  %v414_v12 = vld [vmem:[%s9030_s4] sm:$0xff]  ;;  %v560_v17 = vld [vmem:[%s9028_s2 + $0x8] sm:$0xff]  ;;  %v561_v20 = vld [vmem:[%s9028_s2 + $0x10] sm:$0x3]  ;;  %vm678_vm4 = vcmask 1047556  }
   0xe   : > { %406 = vmatpush.msra.mxu0 %v382_v1  ;;  %483 = vmatpush.msra.mxu2 %v382_v1  ;;  %s5405_s21 = sshll.u32 %s9243_s14, 5  ;;  %s5404_s25 = sshll.u32 %s9243_s14, 4  ;;  %v559_v14 = vld [vmem:[%s9028_s2] sm:$0xff]  ;;  %v493_v21 = vld [vmem:[%s9030_s4 + $0x10] sm:$0x3]  ;;  %vm847_vm5 = vcmask 261120  }
   0xf   : > { %s374_s24 = scalar_lea.vmem %s9027_s1, %s5405_s21  ;;  %s369_s28 = scalar_lea.vmem %s9026_s0, %s5404_s25  ;;  %v629_v22 = vld [vmem:[%s9028_s2 + $0x10] sm:$0x3]  ;;  %v5439_v36 = vmov 1983009808   ;;  %vm849_vm6 = vcmask 392192   ;;  %vm851_vm7 = vcmask 523264  }
  0x10   : > { %554 = vmatpush.msrb.mxu0 %v534_v2  ;;  %v380_v3 = vld [vmem:[%s374_s24] sm:$0xff]  ;;  %v5358_v4 = vld [vmem:[%s374_s24 + $0x10] sm:$0xff]  ;;  %v381_v5 = vld [vmem:[%s374_s24 + $0x8] sm:$0xff]  ;;  %v683_v37 = vunpack.c.l.s4 %v5439_v36  ;;  %s5441_s29 = smov 32   ;;  %s5442_s30 = smov 96   ;;  %vm853_vm8 = vcmask 654336  }
  0x11   : > { %5353 = vmatmul.msk.f32.vlgmr.msra.gmra.mxu0 %vm384_vm0, %v380_v3  ;;  %5360 = vmatmul.msk.f32.vlgmr.msra.gmra.mxu2 %vm384_vm0, %v5358_v4  ;;  %v5359_v6 = vld [vmem:[%s374_s24 + $0x18] sm:$0xff]  ;;  %v533_v7 = vld [vmem:[%s369_s28] sm:$0xff]  ;;  %v5369_v8 = vld [vmem:[%s369_s28 + $0x8] sm:$0xff]  ;;  %s5438_s28 = smov 126   ;;  %s5443_s11 = smov 64   ;;  %vm855_vm9 = vcmask 785408  }
  0x12   : > { %622 = vmatpush.msra.mxu0 %v534_v2  ;;  %v5599_v41 = vunpack.c.0.s8 %v683_v37  ;;  %s5444_s12 = smov 48   ;;  %s5445_s15 = smov 80   ;;  %vm857_vm10 = vcmask 916480   ;;  %vm869_vm11 = vcmask 1043456   ;;  %vm2700_vm12 = vcmask 293888  }
  0x13   : > { %s5446_s16 = smov 112   ;;  %s5447_s17 = smov 16  }
  0x14   : > { %9082 = vst [vmem:[#allocation6_spill] sm:$0xff] %v5599_v41 }
  0x19   : > { %5354 = vmatmul.msk.f32.gmra.mxu0 %vm384_vm0, %v381_v5  ;;  %5361 = vmatmul.msk.f32.gmra.mxu2 %vm384_vm0, %v5359_v6 }
  0x21   : > { %5365 = vmatmul.msk.f32.vlgmr.msrb.gmra.mxu0 %vm535_vm1, %v533_v7 }
  0x29   : > { %5370 = vmatmul.msk.f32.vlgmr.msra.gmra.mxu0 %vm535_vm1, %v5369_v8 }
  0x8e   : > { %v408_v9 = vpop.f32.mrf.mxu0 }
  0x94   : > { %v485_v10 = vpop.f32.mrf.mxu2 }
  0x96   : > { %v411_v11 = vpop.f32.mrf.mxu0 }
  0x97   : > { %440 = vmatpush.msra.mxu1 %v411_v11 }
  0x99   : > { %441 = vmatpush.msra.mxu1 %v408_v9 }
  0x9a   : > { %5355 = vmatmul.msk.f32.vlgmr.msra.gmra.mxu1 %vm384_vm0, %v414_v12 }
  0x9c   : > { %v488_v13 = vpop.f32.mrf.mxu2 }
  0x9d   : > { %517 = vmatpush.msra.mxu3 %v488_v13 }
  0x9e   : > { %v556_v15 = vpop.f32.mrf.mxu0 }
  0x9f   : > { %586 = vmatpush.msrb.mxu2 %v556_v15  ;;  %518 = vmatpush.msra.mxu3 %v485_v10 }
  0xa0   : > { %5366 = vmatmul.msk.f32.vlgmr.msrb.gmra.mxu2 %vm535_vm1, %v559_v14  ;;  %5362 = vmatmul.msk.f32.vlgmr.msra.gmra.mxu3 %vm384_vm0, %v414_v12 }
  0xa2   : > { %5356 = vmatmul.msk.f32.gmra.mxu1 %vm384_vm0, %v415_v16 }
  0xa6   : > { %v624_v18 = vpop.f32.mrf.mxu0 }
  0xa7   : > { %654 = vmatpush.msrb.mxu1 %v624_v18 }
  0xa8   : > { %5367 = vmatmul.msk.f32.gmra.mxu2 %vm535_vm1, %v560_v17  ;;  %5363 = vmatmul.msk.f32.gmra.mxu3 %vm384_vm0, %v415_v16 }
  0xaa   : > { %5357 = vmatmul.msk.f32.gmra.mxu1 %vm384_vm0, %v416_v19 }
  0xb0   : > { %5368 = vmatmul.msk.f32.gmra.mxu2 %vm535_vm1, %v561_v20  ;;  %5364 = vmatmul.msk.f32.gmra.mxu3 %vm384_vm0, %v493_v21 }
  0xb2   : > { %5371 = vmatmul.msk.f32.vlgmr.msrb.gmra.mxu1 %vm535_vm1, %v559_v14 }
  0xba   : > { %5372 = vmatmul.msk.f32.gmra.mxu1 %vm535_vm1, %v560_v17 }
  0xc2   : > { %5373 = vmatmul.msk.f32.gmra.mxu1 %vm535_vm1, %v629_v22 }
 0x117   : > { %v443_v23 = vpop.f32.mrf.mxu1 }
 0x118   : > { %453 = vst.msk [vmem:[#allocation2] sm:$0xff] %vm452_vm2, %v443_v23 }
 0x11f   : > { %v446_v24 = vpop.f32.mrf.mxu1  ;;  %v5574_v25 = vld [vmem:[#allocation2] sm:$0xff] }
 0x120   : > { %454 = vst.msk [vmem:[#allocation2 + $0x8] sm:$0xff] %vm452_vm2, %v446_v24  ;;  %889 = vrot.lane.b32.xlu2 %v5574_v25, %s5437_s27  ;;  %v680_v31 = vrot.slane %v5574_v25, 4 }
 0x123   : > { %v588_v26 = vpop.f32.mrf.mxu2  ;;  %v520_v27 = vpop.f32.mrf.mxu3 }
 0x124   : > { %598 = vst.msk [vmem:[#allocation2 + $0x30] sm:$0xff] %vm452_vm2, %v588_v26 }
 0x125   : > { %530 = vst.msk [vmem:[#allocation2 + $0x18] sm:$0xff] %vm452_vm2, %v520_v27 }
 0x127   : > { %v449_v28 = vpop.f32.mrf.mxu1  ;;  %v2412_v29 = vld [vmem:[#allocation2 + $0x2] sm:$0xff] }
 0x128   : > { %v874_v30 = vld [vmem:[#allocation2 + $0x8] sm:$0xff]  ;;  %456 = vst.msk [vmem:[#allocation2 + $0x10] sm:$0x3] %vm455_vm3, %v449_v28  ;;  %1118 = vrot.lane.b32.xlu2 %v5574_v25, %s5438_s28  ;;  %2428 = vrot.lane.b32.xlu1 %v2412_v29, %s5438_s28  ;;  %v1996_v43 = vrot.slane %v2412_v29, 4 }
 0x129   : > { %891 = vrot.lane.b32.xlu0 %v874_v30, %s5437_s27  ;;  %v1757_v39 = vld [vmem:[#allocation2 + $0x1] sm:$0xff]  ;;  %v736_v42 = vrot.slane %v874_v30, 4 }
 0x12a   : > { %v1341_v44 = vrot.slane %v1757_v39, 4 }
 0x12b   : > { %v591_v32 = vpop.f32.mrf.mxu2  ;;  %v523_v33 = vpop.f32.mrf.mxu3  ;;  %v5587_v34 = vld [vmem:[#allocation2 + $0x30] sm:$0xff] }
 0x12c   : > { %599 = vst.msk [vmem:[#allocation2 + $0x38] sm:$0xff] %vm452_vm2, %v591_v32  ;;  %v681_v35 = vsel %vm678_vm4, %v5587_v34, %v680_v31  ;;  %v5596_v40 = vld [vmem:[#allocation2 + $0x18] sm:$0xff] }
 0x12d   : > { %531 = vst.msk [vmem:[#allocation2 + $0x20] sm:$0xff] %vm452_vm2, %v523_v33  ;;  %v692_v50 = vrot.slane %v5596_v40, 4  ;;  %v689_v55 = vperm.slane %v681_v35, %v5599_v41 }
 0x12f   : > { %v656_v38 = vpop.f32.mrf.mxu1  ;;  %v716_v1 = vrot.slane %v689_v55, 4  ;;  %v5649_v12 = vld [vmem:[#allocation2 + $0x9] sm:$0xff] }
 0x130   : > { %666 = vst.msk [vmem:[#allocation2 + $0x48] sm:$0xff] %vm452_vm2, %v656_v38  ;;  %2199 = vrot.lane.b32.xlu2 %v2412_v29, %s5437_s27  ;;  %1773 = vrot.lane.b32.xlu1 %v1757_v39, %s5438_s28 }
 0x131   : > { %1120 = vrot.lane.b32.xlu0 %v874_v30, %s5438_s28 }
 0x133   : > { %v594_v45 = vpop.f32.mrf.mxu2  ;;  %v526_v46 = vpop.f32.mrf.mxu3  ;;  %v5601_v47 = vld [vmem:[#allocation2 + $0x32] sm:$0xff] }
 0x134   : > { %v5603_v48 = vld [vmem:[#allocation2 + $0x38] sm:$0xff]  ;;  %600 = vst.msk [vmem:[#allocation2 + $0x40] sm:$0x3] %vm455_vm3, %v594_v45  ;;  %v1997_v53 = vsel %vm678_vm4, %v5601_v47, %v1996_v43  ;;  %v1994_v56 = vrot.slane %v5601_v47, 4  ;;  %v5632_v63 = vld [vmem:[#allocation2 + $0x20] sm:$0xff] }
 0x135   : > { %v5605_v49 = vld [vmem:[#allocation2 + $0x31] sm:$0xff]  ;;  %v734_v51 = vrot.slane %v5603_v48, 4  ;;  %v737_v52 = vsel %vm678_vm4, %v5603_v48, %v736_v42  ;;  %532 = vst.msk [vmem:[#allocation2 + $0x28] sm:$0x3] %vm455_vm3, %v526_v46  ;;  %v5639_v5 = vld [vmem:[#allocation2 + $0x1a] sm:$0xff]  ;;  %v748_v6 = vrot.slane %v5632_v63, 4  ;;  %v2005_v7 = vperm.slane %v1997_v53, %v5599_v41 }
 0x136   : > { %v1342_v54 = vsel %vm678_vm4, %v5605_v49, %v1341_v44  ;;  %v1339_v58 = vrot.slane %v5605_v49, 4  ;;  %v1995_v62 = vsel %vm678_vm4, %v1994_v56, %v2412_v29  ;;  %v745_v9 = vperm.slane %v737_v52, %v5599_v41  ;;  %v5647_v10 = vld [vmem:[#allocation2 + $0x19] sm:$0xff]  ;;  %v2184_v46 = vld [vmem:[#allocation2 + $0xa] sm:$0xff] }
 0x137   : > { %v735_v57 = vsel %vm678_vm4, %v734_v51, %v874_v30  ;;  %v659_v59 = vpop.f32.mrf.mxu1  ;;  %v5621_v60 = vld [vmem:[#allocation2 + $0x48] sm:$0xff]  ;;  %v2008_v15 = vrot.slane %v5639_v5, 4  ;;  %v2032_v18 = vrot.slane %v2005_v7, 4  ;;  %v1353_v23 = vrot.slane %v5647_v10, 4 }
 0x138   : > { %667 = vst.msk [vmem:[#allocation2 + $0x50] sm:$0xff] %vm452_vm2, %v659_v59  ;;  %893 = vrot.lane.b32.xlu1 %v5596_v40, %s5437_s27  ;;  %1126 = vrot.lane.b32.xlu2 %v5587_v34, %s5438_s28  ;;  %v693_v61 = vsel %vm678_vm4, %v5621_v60, %v692_v50  ;;  %v1340_v2 = vsel %vm678_vm4, %v1339_v58, %v1757_v39  ;;  %v772_v22 = vrot.slane %v745_v9, 4 }
 0x139   : > { %1544 = vrot.lane.b32.xlu0 %v1757_v39, %s5437_s27  ;;  %v701_v0 = vperm.slane %v693_v61, %v5599_v41  ;;  %v741_v19 = vperm.slane %v735_v57, %v5599_v41  ;;  %v2001_v28 = vperm.slane %v1995_v62, %v5599_v41  ;;  %v1350_v39 = vperm.slane %v1342_v54, %v5599_v41 }
 0x13a   : > { %v1346_v45 = vperm.slane %v1340_v2, %v5599_v41  ;;  %v2052_v62 = vrot.slane %v2184_v46, 4 }
 0x13b   : > { %v5637_v3 = vsel %vm678_vm4, %v701_v0, %v716_v1  ;;  %v714_v4 = vrot.slane %v701_v0, 4  ;;  %v760_v38 = vrot.slane %v741_v19, 4  ;;  %v2020_v44 = vrot.slane %v2001_v28, 4 }
 0x13c   : > { %v1365_v61 = vrot.slane %v1346_v45, 4  ;;  %v2186_v1 = vld [vmem:[#allocation2 + $0x22] sm:$0xff] }
 0x13d   : > { %v5644_v8 = vsel %vm678_vm4, %v714_v4, %v689_v55  ;;  %v5707_v55 = vld [vmem:[#allocation2 + $0x3a] sm:$0xff] }
 0x13e   : > { %v2053_v4 = vsel %vm678_vm4, %v5707_v55, %v2052_v62 }
 0x13f   : > { %v662_v11 = vpop.f32.mrf.mxu1  ;;  %v5651_v13 = vld [vmem:[#allocation2 + $0x50] sm:$0xff] }
 0x140   : > { %v5653_v14 = vld [vmem:[#allocation2 + $0x4a] sm:$0xff]  ;;  %668 = vst.msk [vmem:[#allocation2 + $0x58] sm:$0x3] %vm455_vm3, %v662_v11  ;;  %1122 = vrot.lane.b32.xlu1 %v5596_v40, %s5438_s28  ;;  %1546 = vrot.lane.b32.xlu2 %v5649_v12, %s5437_s27  ;;  %v749_v17 = vsel %vm678_vm4, %v5651_v13, %v748_v6  ;;  %v746_v27 = vrot.slane %v5651_v13, 4  ;;  %v2050_v11 = vrot.slane %v5707_v55, 4 }
 0x141   : > { %v5661_v16 = vld [vmem:[#allocation2 + $0x49] sm:$0xff]  ;;  %897 = vrot.lane.b32.xlu0 %v5587_v34, %s5437_s27  ;;  %v757_v20 = vperm.slane %v749_v17, %v5599_v41  ;;  %v2009_v21 = vsel %vm678_vm4, %v5653_v14, %v2008_v15  ;;  %v2006_v24 = vrot.slane %v5653_v14, 4  ;;  %v2061_v15 = vperm.slane %v2053_v4, %v5599_v41 }
 0x142   : > { %v2017_v26 = vperm.slane %v2009_v21, %v5599_v41  ;;  %v1354_v31 = vsel %vm678_vm4, %v5661_v16, %v1353_v23  ;;  %v747_v33 = vsel %vm678_vm4, %v746_v27, %v5632_v63  ;;  %v1351_v53 = vrot.slane %v5661_v16, 4 }
 0x143   : > { %v770_v29 = vrot.slane %v757_v20, 4  ;;  %v5677_v30 = vsel %vm678_vm4, %v757_v20, %v772_v22  ;;  %v1362_v35 = vperm.slane %v1354_v31, %v5599_v41  ;;  %v753_v37 = vperm.slane %v747_v33, %v5599_v41 }
 0x144   : > { %v5682_v32 = vsel %vm678_vm4, %v2017_v26, %v2032_v18  ;;  %v2007_v43 = vsel %vm678_vm4, %v2006_v24, %v5639_v5  ;;  %v2030_v52 = vrot.slane %v2017_v26, 4  ;;  %v1352_v58 = vsel %vm678_vm4, %v1351_v53, %v5647_v10 }
 0x145   : > { %v5688_v36 = vsel %vm678_vm4, %v770_v29, %v745_v9  ;;  %v1375_v42 = vrot.slane %v1362_v35, 4  ;;  %v5696_v50 = vsel %vm678_vm4, %v753_v37, %v760_v38  ;;  %v2013_v51 = vperm.slane %v2007_v43, %v5599_v41 }
 0x146   : > { %v5713_v57 = vsel %vm678_vm4, %v2030_v52, %v2005_v7  ;;  %v1358_v59 = vperm.slane %v1352_v58, %v5599_v41  ;;  %v758_v0 = vrot.slane %v753_v37, 4  ;;  %v2064_v17 = vrot.slane %v2186_v1, 4  ;;  %v5806_v52 = vld [vmem:[#allocation2 + $0x39] sm:$0xff]  ;;  %v5816_v58 = vld [vmem:[#allocation2 + $0x21] sm:$0xff] }
 0x147   : > { %v5704_v54 = vsel %vm678_vm4, %v1375_v42, %v1350_v39  ;;  %v5710_v56 = vsel %vm678_vm4, %v2013_v51, %v2020_v44  ;;  %v5726_v7 = vld [vmem:[#allocation2 + $0x52] sm:$0xff]  ;;  %v2018_v9 = vrot.slane %v2013_v51, 4  ;;  %v2088_v23 = vrot.slane %v2061_v15, 4 }
 0x148   : > { %2201 = vrot.lane.b32.xlu1 %v2184_v46, %s5437_s27  ;;  %1775 = vrot.lane.b32.xlu2 %v5649_v12, %s5438_s28  ;;  %v5719_v2 = vsel %vm678_vm4, %v1358_v59, %v1365_v61  ;;  %v5724_v6 = vsel %vm678_vm4, %v758_v0, %v741_v19  ;;  %v1363_v18 = vrot.slane %v1358_v59, 4  ;;  %v2062_v20 = vrot.slane %v5726_v7, 4 }
 0x149   : > { %2430 = vrot.lane.b32.xlu0 %v2184_v46, %s5438_s28  ;;  %v5737_v19 = vsel %vm678_vm4, %v2018_v9, %v2001_v28  ;;  %v2065_v21 = vsel %vm678_vm4, %v5726_v7, %v2064_v17  ;;  %v2051_v26 = vsel %vm678_vm4, %v2050_v11, %v2184_v46  ;;  %v1377_v38 = vrot.slane %v1350_v39, 4 }
 0x14a   : > { %v2073_v22 = vperm.slane %v2065_v21, %v5599_v41  ;;  %v5744_v24 = vsel %vm678_vm4, %v1363_v18, %v1346_v45  ;;  %v2057_v29 = vperm.slane %v2051_v26, %v5599_v41  ;;  %v2063_v28 = vsel %vm678_vm4, %v2062_v20, %v2186_v1 }
 0x14b   : > { %v2069_v31 = vperm.slane %v2063_v28, %v5599_v41  ;;  %v5766_v45 = vsel %vm678_vm4, %v1362_v35, %v1377_v38  ;;  %v690_v35 = vrot.slane %v5621_v60, 4 }
 0x14c   : > { %v5748_v27 = vsel %vm678_vm4, %v2073_v22, %v2088_v23  ;;  %v2076_v33 = vrot.slane %v2057_v29, 4  ;;  %v2086_v42 = vrot.slane %v2073_v22, 4  ;;  %9083 = vst [vmem:[#allocation7_spill] sm:$0xff] %v5766_v45 }
 0x14d   : > { %v2074_v43 = vrot.slane %v2069_v31, 4  ;;  %v691_v39 = vsel %vm678_vm4, %v690_v35, %v5596_v40 }
 0x14e   : > { %v5758_v37 = vsel %vm678_vm4, %v2069_v31, %v2076_v33  ;;  %v5763_v44 = vsel %vm678_vm4, %v2086_v42, %v2061_v15  ;;  %v5886_v31 = vld [vmem:[#allocation2 + $0x51] sm:$0xff] }
 0x150   : > { %895 = vrot.lane.b32.xlu2 %v5632_v63, %s5437_s27  ;;  %899 = vrot.lane.b32.xlu1 %v5603_v48, %s5437_s27 }
 0x151   : > { %2207 = vrot.lane.b32.xlu0 %v5601_v47, %s5437_s27 }
 0x158   : > { %2436 = vrot.lane.b32.xlu2 %v5601_v47, %s5438_s28  ;;  %2432 = vrot.lane.b32.xlu1 %v5639_v5, %s5438_s28  ;;  %v5769_v47 = vsel %vm678_vm4, %v2074_v43, %v2057_v29 }
 0x159   : > { %1128 = vrot.lane.b32.xlu0 %v5603_v48, %s5438_s28  ;;  %v677_v48 = vrot.slane %v5587_v34, 4  ;;  %v697_v34 = vperm.slane %v691_v39, %v5599_v41 }
 0x160   : > { %2203 = vrot.lane.b32.xlu2 %v5639_v5, %s5437_s27  ;;  %1552 = vrot.lane.b32.xlu1 %v5605_v49, %s5437_s27  ;;  %v679_v5 = vsel %vm678_vm4, %v677_v48, %v5574_v25 }
 0x161   : > { %1548 = vrot.lane.b32.xlu0 %v5647_v10, %s5437_s27  ;;  %v685_v46 = vperm.slane %v679_v5, %v5599_v41 }
 0x168   : > { %1124 = vrot.lane.b32.xlu2 %v5632_v63, %s5438_s28  ;;  %1781 = vrot.lane.b32.xlu1 %v5605_v49, %s5438_s28  ;;  %v5440_v49 = vmov 1934713408  }
 0x169   : > { %1777 = vrot.lane.b32.xlu0 %v5647_v10, %s5438_s28  ;;  %v707_v63 = vunpack.c.l.s4 %v5440_v49  ;;  %v704_v10 = vrot.slane %v685_v46, 4 }
 0x16b   : > { %v705_v25 = vsel %vm678_vm4, %v697_v34, %v704_v10  ;;  %v5797_v51 = vunpack.c.0.s8 %v707_v63 }
 0x16d   : > { %9084 = vst [vmem:[#allocation8_spill] sm:$0xff] %v5797_v51  ;;  %v713_v40 = vperm.slane %v705_v25, %v5797_v51  ;;  %v725_v59 = vperm.slane %v5637_v3, %v5797_v51  ;;  %v721_v62 = vperm.slane %v5644_v8, %v5797_v51  ;;  %v777_v21 = vperm.slane %v5688_v36, %v5797_v51 }
 0x16e   : > { %v5865_v22 = vperm.slane %v5682_v32, %v5797_v51  ;;  %v5884_v28 = vperm.slane %v5696_v50, %v5797_v51  ;;  %v1382_v50 = vperm.slane %v5704_v54, %v5797_v51  ;;  %v781_v48 = vperm.slane %v5677_v30, %v5797_v51 }
 0x16f   : > { %v730_v4 = vrot.slane %v721_v62, 4  ;;  %v732_v18 = vrot.slane %v725_v59, 4  ;;  %v2037_v54 = vperm.slane %v5713_v57, %v5797_v51  ;;  %v5930_v25 = vperm.slane %v5719_v2, %v5797_v51 }
 0x170   : > { %901 = vrot.lane.b32.xlu2 %v5621_v60, %s5437_s27  ;;  %1130 = vrot.lane.b32.xlu1 %v5621_v60, %s5438_s28  ;;  %v5934_v57 = vperm.slane %v5710_v56, %v5797_v51 }
 0x171   : > { %2205 = vrot.lane.b32.xlu0 %v2186_v1, %s5437_s27  ;;  %v731_v8 = vsel %vm678_vm4, 0.0, %v730_v4  ;;  %v733_v23 = vsel %vm678_vm4, 0.0, %v732_v18  ;;  %v2046_v10 = vrot.slane %v2037_v54, 4  ;;  %v1391_v4 = vrot.slane %v1382_v50, 4 }
 0x173   : > { %v1392_v18 = vsel %vm678_vm4, 0.0, %v1391_v4 }
 0x178   : > { %2434 = vrot.lane.b32.xlu1 %v2186_v1, %s5438_s28  ;;  %2438 = vrot.lane.b32.xlu2 %v5707_v55, %s5438_s28 }
 0x179   : > { %795 = vrot.lane.b32.xlu0 %v713_v40, %s5441_s29 }
 0x17a   : > { %v5804_v60 = vpop.permute.xlu2 %889 }
 0x180   : > { %2209 = vrot.lane.b32.xlu1 %v5707_v55, %s5437_s27  ;;  %1554 = vrot.lane.b32.xlu2 %v5806_v52, %s5437_s27 }
 0x181   : > { %903 = vrot.lane.b32.xlu0 %v5651_v13, %s5437_s27 }
 0x182   : > { %v5814_v53 = vpop.permute.xlu2 %1118 }
 0x183   : > { %v1144_v45 = vrot.slane %v5814_v53, 4 }
 0x188   : > { %1550 = vrot.lane.b32.xlu1 %v5816_v58, %s5437_s27  ;;  %1783 = vrot.lane.b32.xlu2 %v5806_v52, %s5438_s28 }
 0x189   : > { %2440 = vrot.lane.b32.xlu0 %v5653_v14, %s5438_s28 }
 0x18a   : > { %v5824_v55 = vpop.permute.xlu2 %2199 }
 0x190   : > { %1779 = vrot.lane.b32.xlu1 %v5816_v58, %s5438_s28  ;;  %811 = vrot.lane.b32.xlu2 %v725_v59, %s5442_s30  ;;  %v1409_v59 = vrot.slane %v5816_v58, 4 }
 0x191   : > { %1132 = vrot.lane.b32.xlu0 %v5651_v13, %s5438_s28  ;;  %v728_v13 = vrot.slane %v713_v40, 4  ;;  %v2047_v40 = vsel %vm678_vm4, 0.0, %v2046_v10 }
 0x192   : > { %v5833_v61 = vpop.permute.xlu2 %1126 }
 0x193   : > { %v729_v9 = vsel %vm678_vm4, 0.0, %v728_v13 }
 0x198   : > { %803 = vrot.lane.b32.xlu1 %v721_v62, %s5443_s11  ;;  %2211 = vrot.lane.b32.xlu2 %v5653_v14, %s5437_s27  ;;  %v702_v14 = vrot.slane %v697_v34, 4 }
 0x199   : > { %1556 = vrot.lane.b32.xlu0 %v5661_v16, %s5437_s27 }
 0x19a   : > { %v5842_v3 = vpop.permute.xlu1 %2428  ;;  %v5844_v0 = vpop.permute.xlu2 %1546  ;;  %v703_v20 = vsel %vm678_vm4, %v702_v14, %v685_v46  ;;  %v788_v46 = vrot.slane %v781_v48, 4 }
 0x19b   : > { %9085 = vst [vmem:[#allocation9_spill] sm:$0xff] %v5844_v0  ;;  %v5846_v1 = vpop.permute.xlu0 %891 }
 0x19c   : > { %v789_v34 = vsel %vm678_vm4, 0.0, %v788_v46 }
 0x1a0   : > { %799 = vrot.lane.b32.xlu1 %v729_v9, %s5444_s12  ;;  %807 = vrot.lane.b32.xlu2 %v731_v8, %s5445_s15  ;;  %v786_v9 = vrot.slane %v777_v21, 4  ;;  %v1410_v8 = vsel %vm678_vm4, %v5886_v31, %v1409_v59 }
 0x1a1   : > { %1785 = vrot.lane.b32.xlu0 %v5661_v16, %s5438_s28  ;;  %v5872_v16 = vperm.slane %v703_v20, %v5797_v51 }
 0x1a2   : > { %v5854_v11 = vpop.permute.xlu1 %1773  ;;  %v5856_v15 = vpop.permute.xlu2 %1775  ;;  %v787_v20 = vsel %vm678_vm4, 0.0, %v786_v9 }
 0x1a3   : > { %9086 = vst [vmem:[#allocation10_spill] sm:$0xff] %v5856_v15  ;;  %v5858_v17 = vpop.permute.xlu0 %1120  ;;  %v726_v32 = vrot.slane %v5872_v16, 4  ;;  %v1142_v15 = vrot.slane %v5833_v61, 4 }
 0x1a5   : > { %v727_v33 = vsel %vm678_vm4, 0.0, %v726_v32  ;;  %v5964_v32 = vperm.slane %v1410_v8, %v5599_v41  ;;  %v784_v8 = vrot.slane %v5884_v28, 4 }
 0x1a8   : > { %831 = vrot.lane.b32.xlu1 %v777_v21, %s5443_s11  ;;  %2127 = vrot.lane.b32.xlu2 %v5865_v22, %s5442_s30 }
 0x1a9   : > { %815 = vrot.lane.b32.xlu0 %v733_v23, %s5446_s16  ;;  %v5961_v23 = vperm.slane %v5724_v6, %v5797_v51 }
 0x1aa   : > { %v5875_v26 = vpop.permute.xlu1 %893  ;;  %v5877_v36 = vpop.permute.xlu2 %895 }
 0x1ab   : > { %v5879_v29 = vpop.permute.xlu0 %1544  ;;  %v782_v6 = vrot.slane %v5961_v23, 4 }
 0x1b0   : > { %1558 = vrot.lane.b32.xlu1 %v5886_v31, %s5437_s27  ;;  %823 = vrot.lane.b32.xlu2 %v5884_v28, %s5441_s29 }
 0x1b1   : > { %791 = vrot.lane.b32.xlu0 %v727_v33, %s5447_s17 }
 0x1b2   : > { %v5894_v38 = vpop.permute.xlu1 %1122  ;;  %v5896_v42 = vpop.permute.xlu2 %2436 }
 0x1b3   : > { %v5898_v43 = vpop.permute.xlu0 %897 }
 0x1b8   : > { %1464 = vrot.lane.b32.xlu1 %v1382_v50, %s5443_s11  ;;  %2442 = vrot.lane.b32.xlu2 %v5726_v7, %s5438_s28 }
 0x1b9   : > { %839 = vrot.lane.b32.xlu0 %v781_v48, %s5442_s30 }
 0x1ba   : > { %v5908_v35 = vpop.permute.xlu1 %2201  ;;  %v5910_v5 = vpop.permute.xlu2 %2203 }
 0x1bb   : > { %9087 = vst [vmem:[#allocation11_spill] sm:$0xff] %v5908_v35  ;;  %v5912_v39 = vpop.permute.xlu0 %2430 }
 0x1bc   : > { %9088 = vst [vmem:[#allocation12_spill] sm:$0xff] %v5912_v39 }
 0x1c0   : > { %843 = vrot.lane.b32.xlu1 %v789_v34, %s5446_s16  ;;  %1787 = vrot.lane.b32.xlu2 %v5886_v31, %s5438_s28  ;;  %v2048_v34 = vrot.slane %v5865_v22, 4 }
 0x1c1   : > { %2213 = vrot.lane.b32.xlu0 %v5726_v7, %s5437_s27  ;;  %v1397_v7 = vrot.slane %v5649_v12, 4 }
 0x1c2   : > { %v5922_v30 = vpop.permute.xlu2 %1124  ;;  %v5924_v49 = vpop.permute.xlu1 %899  ;;  %v2049_v59 = vsel %vm678_vm4, 0.0, %v2048_v34 }
 0x1c3   : > { %v5926_v63 = vpop.permute.xlu0 %2207  ;;  %v1398_v56 = vsel %vm678_vm4, %v5806_v52, %v1397_v7  ;;  %v2097_v7 = vperm.slane %v5748_v27, %v5797_v51  ;;  %v1395_v27 = vrot.slane %v5806_v52, 4 }
 0x1c4   : > { %v5955_v14 = vperm.slane %v1398_v56, %v5599_v41 }
 0x1c5   : > { %v2104_v9 = vrot.slane %v2097_v7, 4 }
 0x1c6   : > { %v1433_v21 = vrot.slane %v5955_v14, 4 }
 0x1c8   : > { %2123 = vrot.lane.b32.xlu1 %v2047_v40, %s5445_s15  ;;  %1456 = vrot.lane.b32.xlu2 %v5930_v25, %s5441_s29  ;;  %v1434_v46 = vsel %vm678_vm4, %v5964_v32, %v1433_v21  ;;  %v783_v40 = vsel %vm678_vm4, 0.0, %v782_v6  ;;  %v6005_v21 = vperm.slane %v5744_v24, %v5797_v51  ;;  %v785_v6 = vsel %vm678_vm4, 0.0, %v784_v8 }
 0x1c9   : > { %2111 = vrot.lane.b32.xlu0 %v5934_v57, %s5441_s29  ;;  %v1442_v10 = vperm.slane %v1434_v46, %v5797_v51  ;;  %v1407_v46 = vrot.slane %v5886_v31, 4 }
 0x1ca   : > { %v5944_v2 = vpop.permute.xlu2 %901  ;;  %v5946_v62 = vpop.permute.xlu1 %2432  ;;  %9091 = vst [vmem:[#allocation15_spill] sm:$0xff] %v6005_v21 }
 0x1cb   : > { %v5950_v13 = vpop.permute.xlu0 %1128  ;;  %v1449_v24 = vrot.slane %v1442_v10, 4 }
 0x1d0   : > { %1468 = vrot.lane.b32.xlu1 %v1392_v18, %s5445_s15  ;;  %835 = vrot.lane.b32.xlu2 %v787_v20, %s5445_s15  ;;  %v2105_v20 = vsel %vm678_vm4, 0.0, %v2104_v9  ;;  %v1408_v9 = vsel %vm678_vm4, %v1407_v46, %v5816_v58  ;;  %v1389_v46 = vrot.slane %v5930_v25, 4  ;;  %v927_v25 = vrot.slane %v5875_v26, 4 }
 0x1d1   : > { %2119 = vrot.lane.b32.xlu0 %v2037_v54, %s5443_s11  ;;  %v5984_v54 = vperm.slane %v5737_v19, %v5797_v51 }
 0x1d2   : > { %v5970_v33 = vpop.permute.xlu1 %1552  ;;  %v5972_v50 = vpop.permute.xlu2 %2438 }
 0x1d3   : > { %9089 = vst [vmem:[#allocation13_spill] sm:$0xff] %v5972_v50  ;;  %v5974_v48 = vpop.permute.xlu0 %1548  ;;  %v2042_v19 = vrot.slane %v5984_v54, 4 }
 0x1d5   : > { %v2043_v18 = vsel %vm678_vm4, 0.0, %v2042_v19  ;;  %v2044_v19 = vrot.slane %v5934_v57, 4 }
 0x1d8   : > { %819 = vrot.lane.b32.xlu1 %v783_v40, %s5447_s17  ;;  %1500 = vrot.lane.b32.xlu2 %v1442_v10, %s5442_s30  ;;  %v1387_v40 = vrot.slane %v6005_v21, 4  ;;  %v2045_v10 = vsel %vm678_vm4, 0.0, %v2044_v19 }
 0x1d9   : > { %2131 = vrot.lane.b32.xlu0 %v2049_v59, %s5446_s16  ;;  %v1396_v59 = vsel %vm678_vm4, %v1395_v27, %v5649_v12  ;;  %v6035_v12 = vperm.slane %v1408_v9, %v5599_v41  ;;  %v915_v9 = vrot.slane %v5804_v60, 4 }
 0x1da   : > { %v5992_v22 = vpop.permute.xlu1 %1781  ;;  %v5994_v56 = vpop.permute.xlu2 %1554  ;;  %v6025_v31 = vperm.slane %v1396_v59, %v5599_v41  ;;  %v1388_v8 = vsel %vm678_vm4, 0.0, %v1387_v40  ;;  %v1431_v59 = vrot.slane %v5964_v32, 4 }
 0x1db   : > { %9090 = vst [vmem:[#allocation14_spill] sm:$0xff] %v5994_v56  ;;  %v5996_v4 = vpop.permute.xlu0 %1777 }
 0x1dc   : > { %v1421_v27 = vrot.slane %v6025_v31, 4 }
 0x1de   : > { %v1422_v40 = vsel %vm678_vm4, %v6035_v12, %v1421_v27 }
 0x1df   : > { %v6051_v19 = vperm.slane %v1422_v40, %v5797_v51 }
 0x1e0   : > { %2107 = vrot.lane.b32.xlu1 %v2043_v18, %s5447_s17  ;;  %2159 = vrot.lane.b32.xlu2 %v2105_v20, %s5446_s16  ;;  %v1450_v18 = vsel %vm678_vm4, 0.0, %v1449_v24  ;;  %v2085_v20 = vperm.slane %v5758_v37, %v5797_v51 }
 0x1e1   : > { %827 = vrot.lane.b32.xlu0 %v785_v6, %s5444_s12 }
 0x1e2   : > { %v6012_v28 = vpop.permute.xlu1 %1130  ;;  %v6014_v52 = vpop.permute.xlu2 %1783  ;;  %v2100_v37 = vrot.slane %v2085_v20, 4 }
 0x1e3   : > { %9092 = vst [vmem:[#allocation16_spill] sm:$0xff] %v6014_v52  ;;  %v6016_v34 = vpop.permute.xlu0 %2205 }
 0x1e4   : > { %9093 = vst [vmem:[#allocation17_spill] sm:$0xff] %v6016_v34  ;;  %v2101_v24 = vsel %vm678_vm4, 0.0, %v2100_v37  ;;  %v1432_v37 = vsel %vm678_vm4, %v1431_v59, %v5955_v14 }
 0x1e8   : > { %1452 = vrot.lane.b32.xlu1 %v1388_v8, %s5447_s17  ;;  %1504 = vrot.lane.b32.xlu2 %v1450_v18, %s5446_s16  ;;  %v1390_v8 = vsel %vm678_vm4, 0.0, %v1389_v46  ;;  %v916_v18 = vsel %vm678_vm4, %v5898_v43, %v915_v9  ;;  %v928_v46 = vsel %vm678_vm4, %v5944_v2, %v927_v25  ;;  %v6077_v9 = vperm.slane %v1432_v37, %v5797_v51 }
 0x1e9   : > { %2115 = vrot.lane.b32.xlu0 %v2045_v10, %s5444_s12  ;;  %v6073_v40 = vperm.slane %v916_v18, %v5599_v41  ;;  %v6081_v21 = vperm.slane %v928_v46, %v5599_v41  ;;  %v6091_v18 = vperm.slane %v5769_v47, %v5797_v51  ;;  %v925_v37 = vrot.slane %v5944_v2, 4 }
 0x1ea   : > { %v6038_v58 = vpop.permute.xlu1 %2434  ;;  %v6040_v57 = vpop.permute.xlu2 %811 }
 0x1eb   : > { %9094 = vst [vmem:[#allocation18_spill] sm:$0xff] %v6038_v58  ;;  %v6043_v6 = vpop.permute.xlu0 %795  ;;  %v2098_v52 = vrot.slane %v6091_v18, 4 }
 0x1f0   : > { %2155 = vrot.lane.b32.xlu1 %v2097_v7, %s5442_s30  ;;  %2143 = vrot.lane.b32.xlu2 %v2101_v24, %s5444_s12  ;;  %v1445_v7 = vrot.slane %v6051_v19, 4  ;;  %v1156_v24 = vrot.slane %v5894_v38, 4 }
 0x1f1   : > { %1460 = vrot.lane.b32.xlu0 %v1390_v8, %s5444_s12  ;;  %v913_v8 = vrot.slane %v5898_v43, 4  ;;  %v951_v43 = vrot.slane %v6073_v40, 4 }
 0x1f2   : > { %v6061_v10 = vpop.permute.xlu1 %2209  ;;  %v6063_v32 = vpop.permute.xlu2 %2211  ;;  %v1446_v59 = vsel %vm678_vm4, 0.0, %v1445_v7  ;;  %v1157_v25 = vsel %vm678_vm4, %v6012_v28, %v1156_v24 }
 0x1f3   : > { %9095 = vst [vmem:[#allocation19_spill] sm:$0xff] %v6061_v10  ;;  %v6065_v27 = vpop.permute.xlu0 %903  ;;  %v2235_v14 = vrot.slane %v6063_v32, 4  ;;  %v6104_v24 = vperm.slane %v1157_v25, %v5599_v41  ;;  %v952_v2 = vsel %vm678_vm4, %v6081_v21, %v951_v43  ;;  %v2223_v10 = vrot.slane %v5926_v63, 4 }
 0x1f4   : > { %v6129_v34 = vperm.slane %v952_v2, %v5797_v51 }
 0x1f5   : > { %9097 = vst [vmem:[#allocation21_spill] sm:$0xff] %v6104_v24  ;;  %v2236_v47 = vsel %vm678_vm4, %v2235_v14, %v5910_v5  ;;  %v1145_v14 = vsel %vm678_vm4, %v5833_v61, %v1144_v45  ;;  %v2224_v61 = vsel %vm678_vm4, %v2223_v10, %v5824_v55 }
 0x1f6   : > { %v6126_v43 = vperm.slane %v2236_v47, %v5599_v41  ;;  %v6140_v45 = vperm.slane %v1145_v14, %v5599_v41  ;;  %v6160_v10 = vperm.slane %v2224_v61, %v5599_v41 }
 0x1f8   : > { %2139 = vrot.lane.b32.xlu1 %v2085_v20, %s5441_s29  ;;  %1488 = vrot.lane.b32.xlu2 %v1446_v59, %s5444_s12  ;;  %v914_v20 = vsel %vm678_vm4, %v913_v8, %v5804_v60  ;;  %v926_v60 = vsel %vm678_vm4, %v925_v37, %v5875_v26  ;;  %v2093_v8 = vperm.slane %v5763_v44, %v5797_v51  ;;  %v2099_v44 = vsel %vm678_vm4, 0.0, %v2098_v52 }
 0x1f9   : > { %1492 = vrot.lane.b32.xlu0 %v6077_v9, %s5443_s11  ;;  %v6123_v25 = vperm.slane %v914_v20, %v5599_v41  ;;  %v6133_v56 = vperm.slane %v926_v60, %v5599_v41  ;;  %9098 = vst [vmem:[#allocation22_spill] sm:$0xff] %v6140_v45  ;;  %v1154_v26 = vrot.slane %v6012_v28, 4  ;;  %v1143_v37 = vsel %vm678_vm4, %v1142_v15, %v5814_v53 }
 0x1fa   : > { %v6097_v46 = vpop.permute.xlu1 %1550  ;;  %v6099_v7 = vpop.permute.xlu2 %807  ;;  %v1198_v20 = vrot.slane %v5950_v13, 4  ;;  %v2247_v52 = vrot.slane %v6126_v43, 4 }
 0x1fb   : > { %9096 = vst [vmem:[#allocation20_spill] sm:$0xff] %v6097_v46  ;;  %v6108_v59 = vpop.permute.xlu0 %2440  ;;  %v1178_v46 = vrot.slane %v6104_v24, 4  ;;  %v939_v60 = vrot.slane %v6123_v25, 4  ;;  %v1155_v24 = vsel %vm678_vm4, %v1154_v26, %v5894_v38 }
 0x1fc   : > { %v6175_v61 = vsel %vm678_vm4, %v2247_v52, %v6160_v10 }
 0x1fd   : > { %v1179_v28 = vsel %vm678_vm4, %v1178_v46, %v6140_v45  ;;  %v940_v15 = vsel %vm678_vm4, %v6133_v56, %v939_v60  ;;  %9101 = vst [vmem:[#allocation25_spill] sm:$0xff] %v6175_v61  ;;  %v1161_v60 = vperm.slane %v1155_v24, %v5599_v41 }
 0x1fe   : > { %v1185_v46 = vperm.slane %v1179_v28, %v5797_v51 }
 0x200   : > { %2147 = vrot.lane.b32.xlu1 %v2093_v8, %s5443_s11  ;;  %1046 = vrot.lane.b32.xlu2 %v6129_v34, %s5442_s30 }
 0x201   : > { %2135 = vrot.lane.b32.xlu0 %v2099_v44, %s5447_s17  ;;  %v1149_v44 = vperm.slane %v1143_v37, %v5599_v41  ;;  %v948_v37 = vperm.slane %v940_v15, %v5797_v51 }
 0x202   : > { %v6150_v47 = vpop.permute.xlu1 %1779  ;;  %v6152_v2 = vpop.permute.xlu2 %2127 }
 0x203   : > { %9099 = vst [vmem:[#allocation23_spill] sm:$0xff] %v6150_v47  ;;  %v6155_v14 = vpop.permute.xlu0 %1132  ;;  %v1199_v47 = vsel %vm678_vm4, %v1198_v20, %v5858_v17  ;;  %v1568_v20 = vrot.slane %v5970_v33, 4  ;;  %v1168_v28 = vrot.slane %v1149_v44, 4 }
 0x204   : > { %9100 = vst [vmem:[#allocation24_spill] sm:$0xff] %v6152_v2  ;;  %v1210_v53 = vrot.slane %v6155_v14, 4  ;;  %v6186_v38 = vperm.slane %v1199_v47, %v5599_v41 }
 0x205   : > { %v1169_v0 = vsel %vm678_vm4, %v1161_v60, %v1168_v28  ;;  %v1569_v2 = vsel %vm678_vm4, %v1568_v20, %v5879_v29  ;;  %v1419_v20 = vrot.slane %v6035_v12, 4  ;;  %v949_v28 = vrot.slane %v6081_v21, 4 }
 0x206   : > { %v1211_v35 = vsel %vm678_vm4, %v1210_v53, %v5922_v30  ;;  %v2102_v53 = vrot.slane %v2093_v8, 4  ;;  %v6211_v8 = vperm.slane %v1169_v0, %v5797_v51  ;;  %v967_v12 = vrot.slane %v6129_v34, 4 }
 0x207   : > { %v6178_v45 = vperm.slane %v1211_v35, %v5599_v41  ;;  %v950_v61 = vsel %vm678_vm4, %v949_v28, %v6073_v40  ;;  %v971_v34 = vrot.slane %v5846_v1, 4  ;;  %v2225_v40 = vrot.slane %v5824_v55, 4 }
 0x208   : > { %1484 = vrot.lane.b32.xlu1 %v6051_v19, %s5441_s29  ;;  %1267 = vrot.lane.b32.xlu2 %v1185_v46, %s5443_s11  ;;  %v963_v19 = vrot.slane %v948_v37, 4 }
 0x209   : > { %v1222_v26 = vrot.slane %v6178_v45, 4  ;;  %1030 = vrot.lane.b32.xlu0 %v948_v37, %s5441_s29  ;;  %v2103_v37 = vsel %vm678_vm4, 0.0, %v2102_v53 }
 0x20a   : > { %v6191_v35 = vpop.permute.xlu1 %803  ;;  %v6193_v52 = vpop.permute.xlu2 %823 }
 0x20b   : > { %v6195_v24 = vpop.permute.xlu0 %1556  ;;  %v6199_v15 = vsel %vm678_vm4, %v1222_v26, %v6186_v38  ;;  %v964_v26 = vsel %vm678_vm4, 0.0, %v963_v19  ;;  %v1447_v19 = vrot.slane %v6077_v9, 4 }
 0x20c   : > { %9102 = vst [vmem:[#allocation26_spill] sm:$0xff] %v6199_v15  ;;  %v1580_v47 = vrot.slane %v6195_v24, 4  ;;  %v1166_v15 = vrot.slane %v1161_v60, 4 }
 0x20e   : > { %v1581_v58 = vsel %vm678_vm4, %v1580_v47, %v5974_v48  ;;  %v6220_v47 = vperm.slane %v1569_v2, %v5599_v41  ;;  %v1167_v2 = vsel %vm678_vm4, %v1166_v15, %v1149_v44  ;;  %v968_v44 = vsel %vm678_vm4, 0.0, %v967_v12 }
 0x20f   : > { %v6208_v50 = vperm.slane %v1581_v58, %v5599_v41  ;;  %v6245_v9 = vperm.slane %v1167_v2, %v5797_v51  ;;  %v983_v15 = vrot.slane %v5877_v36, 4 }
 0x210   : > { %2151 = vrot.lane.b32.xlu1 %v2103_v37, %s5445_s15  ;;  %1034 = vrot.lane.b32.xlu2 %v964_v26, %s5444_s12  ;;  %v1194_v37 = vrot.slane %v1185_v46, 4  ;;  %v1420_v26 = vsel %vm678_vm4, %v1419_v20, %v6025_v31  ;;  %v956_v31 = vperm.slane %v950_v61, %v5797_v51  ;;  %v972_v20 = vsel %vm678_vm4, %v5924_v49, %v971_v34 }
 0x211   : > { %v1592_v58 = vrot.slane %v6208_v50, 4  ;;  %1259 = vrot.lane.b32.xlu0 %v6211_v8, %s5441_s29  ;;  %9104 = vst [vmem:[#allocation28_spill] sm:$0xff] %v6245_v9  ;;  %v6248_v46 = vperm.slane %v1420_v26, %v5797_v51  ;;  %v1190_v55 = vrot.slane %v6245_v9, 4  ;;  %v6274_v2 = vperm.slane %v972_v20, %v5599_v41 }
 0x212   : > { %v6225_v0 = vpop.permute.xlu1 %799  ;;  %v6227_v53 = vpop.permute.xlu2 %2442  ;;  %v1195_v39 = vsel %vm678_vm4, 0.0, %v1194_v37  ;;  %v984_v37 = vsel %vm678_vm4, %v6065_v27, %v983_v15  ;;  %v965_v12 = vrot.slane %v956_v31, 4 }
 0x213   : > { %9103 = vst [vmem:[#allocation27_spill] sm:$0xff] %v6227_v53  ;;  %v6229_v60 = vpop.permute.xlu0 %1785  ;;  %v6234_v21 = vsel %vm678_vm4, %v1592_v58, %v6220_v47  ;;  %v1448_v53 = vsel %vm678_vm4, 0.0, %v1447_v19  ;;  %v2237_v19 = vrot.slane %v5910_v5, 4  ;;  %v1443_v61 = vrot.slane %v6248_v46, 4 }
 0x214   : > { %9105 = vst [vmem:[#allocation29_spill] sm:$0xff] %v6248_v46  ;;  %v1191_v34 = vsel %vm678_vm4, 0.0, %v1190_v55  ;;  %v966_v15 = vsel %vm678_vm4, 0.0, %v965_v12  ;;  %v1007_v20 = vrot.slane %v6274_v2, 4 }
 0x215   : > { %v2238_v26 = vsel %vm678_vm4, %v6063_v32, %v2237_v19  ;;  %v1200_v32 = vrot.slane %v5858_v17, 4 }
 0x218   : > { %1496 = vrot.lane.b32.xlu1 %v1448_v53, %s5445_s15  ;;  %1271 = vrot.lane.b32.xlu2 %v1195_v39, %s5445_s15  ;;  %v2226_v39 = vsel %vm678_vm4, %v5926_v63, %v2225_v40  ;;  %v6282_v63 = vperm.slane %v984_v37, %v5599_v41  ;;  %v6287_v40 = vperm.slane %v2238_v26, %v5599_v41 }
 0x219   : > { %1050 = vrot.lane.b32.xlu0 %v968_v44, %s5446_s16  ;;  %v6279_v5 = vperm.slane %v2226_v39, %v5599_v41  ;;  %v1444_v44 = vsel %vm678_vm4, 0.0, %v1443_v61  ;;  %v1212_v61 = vrot.slane %v5922_v30, 4  ;;  %v1201_v37 = vsel %vm678_vm4, %v5950_v13, %v1200_v32 }
 0x21a   : > { %v6260_v28 = vpop.permute.xlu1 %831  ;;  %v6262_v58 = vpop.permute.xlu2 %1787  ;;  %v1008_v17 = vsel %vm678_vm4, %v6282_v63, %v1007_v20  ;;  %v937_v13 = vrot.slane %v6133_v56, 4  ;;  %v2249_v20 = vrot.slane %v6160_v10, 4 }
 0x21b   : > { %9106 = vst [vmem:[#allocation30_spill] sm:$0xff] %v6262_v58  ;;  %v6267_v53 = vpop.permute.xlu0 %815  ;;  %v2261_v19 = vrot.slane %v6279_v5, 4 }
 0x21d   : > { %v2262_v26 = vsel %vm678_vm4, %v6287_v40, %v2261_v19 }
 0x21e   : > { %v6318_v30 = vperm.slane %v2262_v26, %v5797_v51 }
 0x220   : > { %1255 = vrot.lane.b32.xlu2 %v1191_v34, %s5447_s17  ;;  %1480 = vrot.lane.b32.xlu1 %v1444_v44, %s5447_s17  ;;  %v1213_v34 = vsel %vm678_vm4, %v6155_v14, %v1212_v61  ;;  %v6312_v44 = vperm.slane %v1201_v37, %v5599_v41  ;;  %v1570_v14 = vrot.slane %v5879_v29, 4  ;;  %v1582_v37 = vrot.slane %v5974_v48, 4 }
 0x221   : > { %1042 = vrot.lane.b32.xlu0 %v966_v15, %s5445_s15  ;;  %v6315_v15 = vperm.slane %v1008_v17, %v5797_v51  ;;  %v6322_v32 = vperm.slane %v1213_v34, %v5599_v41  ;;  %v2250_v29 = vsel %vm678_vm4, %v6126_v43, %v2249_v20  ;;  %v938_v34 = vsel %vm678_vm4, %v937_v13, %v6123_v25 }
 0x222   : > { %v6296_v39 = vpop.permute.xlu1 %1558  ;;  %v6298_v55 = vpop.permute.xlu2 %1456  ;;  %v1236_v19 = vrot.slane %v6312_v44, 4  ;;  %v1571_v17 = vsel %vm678_vm4, %v5970_v33, %v1570_v14  ;;  %v6354_v33 = vperm.slane %v2250_v29, %v5797_v51  ;;  %v2452_v14 = vrot.slane %v5896_v42, 4 }
 0x223   : > { %9107 = vst [vmem:[#allocation31_spill] sm:$0xff] %v6298_v55  ;;  %v6303_v12 = vpop.permute.xlu0 %791  ;;  %v6351_v48 = vperm.slane %v1571_v17, %v5599_v41  ;;  %v6362_v20 = vperm.slane %v938_v34, %v5797_v51  ;;  %v2454_v25 = vrot.slane %v5842_v3, 4  ;;  %v2464_v13 = vrot.slane %v6108_v59, 4 }
 0x224   : > { %v1237_v10 = vsel %vm678_vm4, %v6322_v32, %v1236_v19  ;;  %v1594_v19 = vrot.slane %v6220_v47, 4  ;;  %v2466_v17 = vrot.slane %v5946_v62, 4 }
 0x225   : > { %v6358_v43 = vperm.slane %v1237_v10, %v5797_v51  ;;  %9109 = vst [vmem:[#allocation33_spill] sm:$0xff] %v6362_v20  ;;  %v2453_v10 = vsel %vm678_vm4, %v2452_v14, %v5842_v3  ;;  %v961_v47 = vrot.slane %v6362_v20, 4  ;;  %v969_v14 = vrot.slane %v5924_v49, 4 }
 0x226   : > { %v6400_v3 = vperm.slane %v2453_v10, %v5599_v41 }
 0x228   : > { %1074 = vrot.lane.b32.xlu2 %v6315_v15, %s5442_s30  ;;  %1038 = vrot.lane.b32.xlu1 %v956_v31, %s5443_s11  ;;  %v1192_v31 = vrot.slane %v6211_v8, 4 }
 0x229   : > { %2356 = vrot.lane.b32.xlu0 %v6318_v30, %s5442_s30 }
 0x22a   : > { %v6332_v61 = vpop.permute.xlu1 %1464  ;;  %v6334_v56 = vpop.permute.xlu2 %835  ;;  %v1193_v8 = vsel %vm678_vm4, 0.0, %v1192_v31 }
 0x22b   : > { %9108 = vst [vmem:[#allocation32_spill] sm:$0xff] %v6332_v61  ;;  %v6339_v26 = vpop.permute.xlu0 %839  ;;  %v1583_v61 = vsel %vm678_vm4, %v6195_v24, %v1582_v37  ;;  %v2455_v37 = vsel %vm678_vm4, %v5896_v42, %v2454_v25  ;;  %v2467_v42 = vsel %vm678_vm4, %v6108_v59, %v2466_v17 }
 0x22c   : > { %v6366_v24 = vperm.slane %v1583_v61, %v5599_v41  ;;  %v1606_v61 = vrot.slane %v6351_v48, 4  ;;  %v6395_v9 = vperm.slane %v2455_v37, %v5599_v41  ;;  %v6408_v59 = vperm.slane %v2467_v42, %v5599_v41 }
 0x22d   : > { %v962_v37 = vsel %vm678_vm4, 0.0, %v961_v47  ;;  %v2478_v47 = vrot.slane %v6400_v3, 4  ;;  %v970_v42 = vsel %vm678_vm4, %v969_v14, %v5846_v1 }
 0x22e   : > { %v1607_v25 = vsel %vm678_vm4, %v6366_v24, %v1606_v61  ;;  %v2490_v49 = vrot.slane %v6395_v9, 4  ;;  %v1811_v61 = vrot.slane %v5996_v4, 4  ;;  %v6449_v1 = vperm.slane %v970_v42, %v5599_v41 }
 0x22f   : > { %v6411_v17 = vperm.slane %v1607_v25, %v5797_v51 }
 0x230   : > { %2340 = vrot.lane.b32.xlu2 %v6354_v33, %s5441_s29  ;;  %1263 = vrot.lane.b32.xlu1 %v1193_v8, %s5444_s12  ;;  %v1595_v8 = vsel %vm678_vm4, %v6208_v50, %v1594_v19  ;;  %v2259_v19 = vrot.slane %v6287_v40, 4  ;;  %v981_v40 = vrot.slane %v6065_v27, 4 }
 0x231   : > { %1303 = vrot.lane.b32.xlu0 %v6358_v43, %s5442_s30  ;;  %v6404_v50 = vperm.slane %v1595_v8, %v5797_v51  ;;  %9111 = vst [vmem:[#allocation35_spill] sm:$0xff] %v6411_v17 }
 0x232   : > { %v6379_v29 = vpop.permute.xlu1 %843  ;;  %v6381_v31 = vpop.permute.xlu2 %1500  ;;  %v2260_v27 = vsel %vm678_vm4, %v2259_v19, %v6279_v5  ;;  %v982_v20 = vsel %vm678_vm4, %v981_v40, %v5877_v36  ;;  %v995_v40 = vrot.slane %v6449_v1, 4 }
 0x233   : > { %9110 = vst [vmem:[#allocation34_spill] sm:$0xff] %v6381_v31  ;;  %v6385_v34 = vpop.permute.xlu0 %2213  ;;  %v2465_v31 = vsel %vm678_vm4, %v2464_v13, %v5946_v62  ;;  %v1799_v62 = vrot.slane %v5854_v11, 4  ;;  %v6452_v14 = vperm.slane %v2260_v27, %v5797_v51 }
 0x234   : > { %v6416_v13 = vperm.slane %v2465_v31, %v5599_v41 }
 0x235   : > { %v1800_v10 = vsel %vm678_vm4, %v5992_v22, %v1799_v62  ;;  %v1812_v62 = vsel %vm678_vm4, %v6229_v60, %v1811_v61  ;;  %v6460_v61 = vperm.slane %v982_v20, %v5599_v41 }
 0x236   : > { %v2479_v55 = vsel %vm678_vm4, %v6416_v13, %v2478_v47  ;;  %v1808_v46 = vperm.slane %v1800_v10, %v5599_v41  ;;  %v1820_v19 = vperm.slane %v1812_v62, %v5599_v41 }
 0x237   : > { %v996_v62 = vsel %vm678_vm4, %v6460_v61, %v995_v40 }
 0x238   : > { %1685 = vrot.lane.b32.xlu2 %v6404_v50, %s5441_s29  ;;  %1026 = vrot.lane.b32.xlu1 %v962_v37, %s5447_s17  ;;  %v2491_v37 = vsel %vm678_vm4, %v6408_v59, %v2490_v49  ;;  %v6457_v49 = vperm.slane %v2479_v55, %v5797_v51  ;;  %v1835_v36 = vrot.slane %v1808_v46, 4  ;;  %v1224_v55 = vrot.slane %v6186_v38, 4 }
 0x239   : > { %1701 = vrot.lane.b32.xlu0 %v6411_v17, %s5442_s30  ;;  %v2499_v5 = vperm.slane %v2491_v37, %v5797_v51  ;;  %v1004_v38 = vperm.slane %v996_v62, %v5797_v51  ;;  %v1833_v58 = vrot.slane %v1820_v19, 4 }
 0x23a   : > { %v6428_v8 = vpop.permute.xlu1 %2123  ;;  %v6430_v31 = vpop.permute.xlu2 %2159  ;;  %v1836_v27 = vsel %vm678_vm4, %v1820_v19, %v1835_v36  ;;  %v1225_v37 = vsel %vm678_vm4, %v6178_v45, %v1224_v55 }
 0x23b   : > { %v6435_v25 = vpop.permute.xlu0 %2111  ;;  %v2506_v20 = vrot.slane %v2499_v5, 4  ;;  %v6481_v17 = vperm.slane %v1836_v27, %v5797_v51  ;;  %v1019_v55 = vrot.slane %v1004_v38, 4 }
 0x240   : > { %2348 = vrot.lane.b32.xlu2 %v6452_v14, %s5443_s11  ;;  %2585 = vrot.lane.b32.xlu1 %v2499_v5, %s5442_s30  ;;  %v846_v5 = vsel %vm384_vm0, %v5872_v16, %v6303_v12  ;;  %v1834_v16 = vsel %vm678_vm4, %v1833_v58, %v1808_v46  ;;  %v1809_v46 = vrot.slane %v6229_v60, 4  ;;  %v2502_v60 = vrot.slane %v6457_v49, 4 }
 0x241   : > { %2569 = vrot.lane.b32.xlu0 %v6457_v49, %s5441_s29  ;;  %v848_v19 = vsel %vm847_vm5, %v846_v5, %v6043_v6  ;;  %v6508_v27 = vperm.slane %v1834_v16, %v5797_v51  ;;  %v2488_v49 = vrot.slane %v6408_v59, 4 }
 0x242   : > { %v6468_v10 = vpop.permute.xlu1 %1468  ;;  %v6470_v47 = vpop.permute.xlu2 %1504  ;;  %v850_v12 = vsel %vm849_vm6, %v848_v19, %v6225_v0 }
 0x243   : > { %9112 = vst [vmem:[#allocation36_spill] sm:$0xff] %v6468_v10  ;;  %v6473_v42 = vpop.permute.xlu0 %2119  ;;  %v6484_v10 = vperm.slane %v1225_v37, %v5797_v51  ;;  %v1020_v37 = vsel %vm678_vm4, 0.0, %v1019_v55  ;;  %v2503_v55 = vsel %vm678_vm4, 0.0, %v2502_v60 }
 0x244   : > { %9113 = vst [vmem:[#allocation37_spill] sm:$0xff] %v6470_v47  ;;  %v2507_v47 = vsel %vm678_vm4, 0.0, %v2506_v20  ;;  %v1005_v20 = vrot.slane %v6282_v63, 4 }
 0x248   : > { %2589 = vrot.lane.b32.xlu2 %v2507_v47, %s5446_s16  ;;  %1930 = vrot.lane.b32.xlu1 %v6481_v17, %s5442_s30  ;;  %v1797_v47 = vrot.slane %v5992_v22, 4  ;;  %v852_v22 = vsel %vm851_vm7, %v850_v12, %v6191_v35 }
 0x249   : > { %1287 = vrot.lane.b32.xlu0 %v6484_v10, %s5441_s29  ;;  %v854_v35 = vsel %vm853_vm8, %v852_v22, %v6099_v7 }
 0x24a   : > { %v820_v45 = vpop.permute.xlu1 %819  ;;  %v6496_v36 = vpop.permute.xlu2 %2143 }
 0x24b   : > { %v6500_v40 = vpop.permute.xlu0 %2131  ;;  %v859_v6 = vsel %vm384_vm0, %v5961_v23, %v820_v45  ;;  %v1798_v23 = vsel %vm678_vm4, %v1797_v47, %v5854_v11  ;;  %v1252_v45 = vrot.slane %v6358_v43, 4  ;;  %v1810_v11 = vsel %vm678_vm4, %v1809_v46, %v5996_v4 }
 0x24c   : > { %v860_v62 = vsel %vm847_vm5, %v859_v6, %v6193_v52  ;;  %v6540_v52 = vperm.slane %v1798_v23, %v5599_v41  ;;  %v856_v43 = vsel %vm855_vm9, %v854_v35, %v6040_v57  ;;  %v2489_v6 = vsel %vm678_vm4, %v2488_v49, %v6395_v9 }
 0x24d   : > { %v6574_v23 = vperm.slane %v2489_v6, %v5797_v51 }
 0x24e   : > { %v1823_v57 = vrot.slane %v6540_v52, 4 }
 0x250   : > { %1062 = vrot.lane.b32.xlu2 %v1020_v37, %s5444_s12  ;;  %1058 = vrot.lane.b32.xlu1 %v1004_v38, %s5441_s29  ;;  %v1006_v38 = vsel %vm678_vm4, %v1005_v20, %v6274_v2  ;;  %v2273_v37 = vrot.slane %v6354_v33, 4 }
 0x251   : > { %1922 = vrot.lane.b32.xlu0 %v6508_v27, %s5443_s11  ;;  %v1012_v7 = vperm.slane %v1006_v38, %v5797_v51 }
 0x252   : > { %v6520_v0 = vpop.permute.xlu1 %2107  ;;  %v6522_v58 = vpop.permute.xlu2 %1488 }
 0x253   : > { %v828_v63 = vpop.permute.xlu0 %827  ;;  %v1021_v46 = vrot.slane %v1012_v7, 4  ;;  %v2162_v6 = vsel %vm384_vm0, %v5984_v54, %v6520_v0 }
 0x254   : > { %v861_v5 = vsel %vm849_vm6, %v860_v62, %v828_v63  ;;  %v1234_v62 = vrot.slane %v6322_v32, 4  ;;  %v2163_v54 = vsel %vm847_vm5, %v2162_v6, %v6435_v25 }
 0x255   : > { %v862_v19 = vsel %vm851_vm7, %v861_v5, %v6260_v28  ;;  %v6552_v28 = vperm.slane %v1810_v11, %v5599_v41  ;;  %v1022_v60 = vsel %vm678_vm4, 0.0, %v1021_v46  ;;  %v1248_v5 = vrot.slane %v6484_v10, 4 }
 0x256   : > { %v863_v2 = vsel %vm853_vm8, %v862_v19, %v6334_v56  ;;  %v1253_v56 = vsel %vm678_vm4, 0.0, %v1252_v45  ;;  %v1235_v32 = vsel %vm678_vm4, %v1234_v62, %v6312_v44  ;;  %v1604_v19 = vrot.slane %v6366_v24, 4 }
 0x257   : > { %v864_v4 = vsel %vm855_vm9, %v863_v2, %v6339_v26  ;;  %v858_v26 = vsel %vm857_vm10, %v856_v43, %v6267_v53  ;;  %v1824_v22 = vsel %vm678_vm4, %v6552_v28, %v1823_v57  ;;  %v2274_v53 = vsel %vm678_vm4, 0.0, %v2273_v37 }
 0x258   : > { %v865_v59 = vsel %vm857_vm10, %v864_v4, %v6379_v29  ;;  %2573 = vrot.lane.b32.xlu2 %v2503_v55, %s5444_s12  ;;  %1066 = vrot.lane.b32.xlu1 %v1012_v7, %s5443_s11  ;;  %v1832_v63 = vperm.slane %v1824_v22, %v5797_v51  ;;  %v1241_v11 = vperm.slane %v1235_v32, %v5797_v51  ;;  %v1249_v49 = vsel %vm678_vm4, 0.0, %v1248_v5 }
 0x259   : > { %v868_v16 = vrot.slane %v865_v59, 4  ;;  %1307 = vrot.lane.b32.xlu0 %v1253_v56, %s5446_s16  ;;  %v1618_v43 = vrot.slane %v6404_v50, 4  ;;  %v1605_v4 = vsel %vm678_vm4, %v1604_v19, %v6351_v48  ;;  %v2476_v59 = vrot.slane %v6416_v13, 4 }
 0x25a   : > { %v6563_v12 = vpop.permute.xlu1 %1452  ;;  %v6565_v47 = vpop.permute.xlu2 %1046  ;;  %v1847_v35 = vrot.slane %v1832_v63, 4  ;;  %v1250_v44 = vrot.slane %v1241_v11, 4  ;;  %v1611_v55 = vperm.slane %v1605_v4, %v5797_v51 }
 0x25b   : > { %v870_v29 = vsel %vm869_vm11, %v858_v26, %v868_v16  ;;  %v2116_v20 = vpop.permute.xlu0 %2115  ;;  %v1619_v56 = vsel %vm678_vm4, 0.0, %v1618_v43  ;;  %v993_v16 = vrot.slane %v6460_v61, 4  ;;  %v2477_v13 = vsel %vm678_vm4, %v2476_v59, %v6400_v3 }
 0x25c   : > { %2666 = vst [vmem:[#allocation1] ss:$2 sm:$0xff] %v870_v29  ;;  %v1848_v45 = vsel %vm678_vm4, 0.0, %v1847_v35  ;;  %v1251_v24 = vsel %vm678_vm4, 0.0, %v1250_v44  ;;  %v1620_v26 = vrot.slane %v1611_v55, 4  ;;  %v2275_v29 = vrot.slane %v6452_v14, 4 }
 0x25d   : > { %v994_v37 = vsel %vm678_vm4, %v993_v16, %v6449_v1  ;;  %v6627_v46 = vperm.slane %v2477_v13, %v5797_v51  ;;  %v9120_v44 = vld [vmem:[#allocation18_spill] sm:$0xff] }
 0x25e   : > { %v1621_v61 = vsel %vm678_vm4, 0.0, %v1620_v26  ;;  %v2276_v22 = vsel %vm678_vm4, 0.0, %v2275_v29  ;;  %v6633_v3 = vperm.slane %v994_v37, %v5797_v51  ;;  %v2522_v43 = vrot.slane %v9120_v44, 4  ;;  %v9122_v29 = vld [vmem:[#allocation24_spill] sm:$0xff] }
 0x25f   : > { %v2500_v62 = vrot.slane %v6627_v46, 4 }
 0x260   : > { %2344 = vrot.lane.b32.xlu2 %v2274_v53, %s5444_s12  ;;  %2577 = vrot.lane.b32.xlu1 %v6574_v23, %s5443_s11  ;;  %v2164_v53 = vsel %vm849_vm6, %v2163_v54, %v2116_v20 }
 0x261   : > { %1070 = vrot.lane.b32.xlu0 %v1022_v60, %s5445_s15  ;;  %v1023_v60 = vrot.slane %v6315_v15, 4  ;;  %v2165_v5 = vsel %vm851_vm7, %v2164_v53, %v6473_v42  ;;  %v2501_v25 = vsel %vm678_vm4, 0.0, %v2500_v62  ;;  %v9118_v42 = vld [vmem:[#allocation25_spill] sm:$0xff] }
 0x262   : > { %v6584_v9 = vpop.permute.xlu1 %2155  ;;  %v6586_v33 = vpop.permute.xlu2 %1267 }
 0x263   : > { %9114 = vst [vmem:[#allocation38_spill] sm:$0xff] %v6586_v33  ;;  %v6588_v38 = vpop.permute.xlu0 %1460  ;;  %v1024_v32 = vsel %vm678_vm4, 0.0, %v1023_v60 }
 0x264   : > { %9115 = vst [vmem:[#allocation39_spill] sm:$0xff] %v6588_v38 }
 0x268   : > { %1918 = vrot.lane.b32.xlu2 %v1848_v45, %s5444_s12  ;;  %1914 = vrot.lane.b32.xlu1 %v1832_v63, %s5441_s29  ;;  %v6659_v45 = vperm.slane %v6234_v21, %v5797_v51 }
 0x269   : > { %1291 = vrot.lane.b32.xlu0 %v1249_v49, %s5444_s12  ;;  %v6667_v49 = vperm.slane %v9118_v42, %v5797_v51 }
 0x26a   : > { %v2140_v2 = vpop.permute.xlu1 %2139  ;;  %v6600_v7 = vpop.permute.xlu2 %1034  ;;  %v1616_v16 = vrot.slane %v6659_v45, 4 }
 0x26b   : > { %v6602_v10 = vpop.permute.xlu0 %1492  ;;  %v2271_v37 = vrot.slane %v6667_v49, 4 }
 0x26c   : > { %v1617_v54 = vsel %vm678_vm4, 0.0, %v1616_v16 }
 0x270   : > { %1299 = vrot.lane.b32.xlu2 %v1251_v24, %s5445_s15  ;;  %1295 = vrot.lane.b32.xlu1 %v1241_v11, %s5443_s11  ;;  %v9117_v11 = vld [vmem:[#allocation12_spill] sm:$0xff] }
 0x271   : > { %1689 = vrot.lane.b32.xlu0 %v1619_v56, %s5444_s12  ;;  %v2510_v15 = vrot.slane %v9117_v11, 4 }
 0x272   : > { %v2148_v50 = vpop.permute.xlu1 %2147  ;;  %v6615_v57 = vpop.permute.xlu2 %1271 }
 0x273   : > { %9116 = vst [vmem:[#allocation40_spill] sm:$0xff] %v6615_v57  ;;  %v2136_v48 = vpop.permute.xlu0 %2135 }
 0x274   : > { %v2169_v1 = vsel %vm384_vm0, %v6091_v18, %v2136_v48  ;;  %v1017_v18 = vrot.slane %v6633_v3, 4  ;;  %v9121_v48 = vld [vmem:[#allocation27_spill] sm:$0xff] }
 0x275   : > { %v2170_v35 = vsel %vm847_vm5, %v2169_v1, %v2140_v2  ;;  %v2166_v2 = vsel %vm853_vm8, %v2165_v5, %v6428_v8  ;;  %v2277_v8 = vrot.slane %v6318_v30, 4  ;;  %v2523_v26 = vsel %vm678_vm4, %v9121_v48, %v2522_v43  ;;  %v9125_v5 = vld [vmem:[#allocation11_spill] sm:$0xff] }
 0x276   : > { %v2171_v20 = vsel %vm849_vm6, %v2170_v35, %v6496_v36  ;;  %v1018_v19 = vsel %vm678_vm4, 0.0, %v1017_v18  ;;  %v9119_v36 = vld [vmem:[#allocation13_spill] sm:$0xff]  ;;  %v2167_v13 = vsel %vm855_vm9, %v2166_v2, %v9122_v29  ;;  %v6696_v30 = vperm.slane %v2523_v26, %v5599_v41 }
 0x277   : > { %v2511_v21 = vsel %vm678_vm4, %v9119_v36, %v2510_v15  ;;  %v2172_v4 = vsel %vm851_vm7, %v2171_v20, %v2148_v50  ;;  %v2168_v1 = vsel %vm857_vm10, %v2167_v13, %v6500_v40  ;;  %v2278_v53 = vsel %vm678_vm4, 0.0, %v2277_v8  ;;  %v9127_v15 = vld [vmem:[#allocation20_spill] sm:$0xff] }
 0x278   : > { %1697 = vrot.lane.b32.xlu2 %v1621_v61, %s5445_s15  ;;  %1693 = vrot.lane.b32.xlu1 %v1611_v55, %s5443_s11  ;;  %v6691_v6 = vperm.slane %v2511_v21, %v5599_v41  ;;  %v2272_v35 = vsel %vm678_vm4, 0.0, %v2271_v37  ;;  %v2281_v40 = vrot.slane %v9125_v5, 4  ;;  %v9128_v21 = vld [vmem:[#allocation17_spill] sm:$0xff]  ;;  %v2504_v8 = vrot.slane %v6574_v23, 4 }
 0x279   : > { %2352 = vrot.lane.b32.xlu0 %v2276_v22, %s5445_s15  ;;  %v2293_v43 = vrot.slane %v9128_v21, 4  ;;  %v2508_v37 = vrot.slane %v9119_v36, 4 }
 0x27a   : > { %v6640_v14 = vpop.permute.xlu1 %1484  ;;  %v6642_v0 = vpop.permute.xlu2 %1255 }
 0x27b   : > { %v6645_v63 = vpop.permute.xlu0 %1030 }
 0x280   : > { %2565 = vrot.lane.b32.xlu2 %v2501_v25, %s5447_s17  ;;  %1078 = vrot.lane.b32.xlu1 %v1024_v32, %s5446_s16  ;;  %v2546_v25 = vrot.slane %v6691_v6, 4  ;;  %v9126_v32 = vld [vmem:[#allocation14_spill] sm:$0xff] }
 0x281   : > { %1054 = vrot.lane.b32.xlu0 %v1018_v19, %s5447_s17  ;;  %v1638_v19 = vrot.slane %v9127_v15, 4 }
 0x282   : > { %v2152_v24 = vpop.permute.xlu1 %2151  ;;  %v6676_v55 = vpop.permute.xlu2 %1074  ;;  %v2547_v16 = vsel %vm678_vm4, %v6696_v30, %v2546_v25 }
 0x283   : > { %v6678_v59 = vpop.permute.xlu0 %1259  ;;  %v2173_v56 = vsel %vm853_vm8, %v2172_v4, %v2152_v24  ;;  %v9129_v4 = vld [vmem:[#allocation19_spill] sm:$0xff]  ;;  %v1639_v26 = vsel %vm678_vm4, %v6296_v39, %v1638_v19 }
 0x284   : > { %v2174_v50 = vsel %vm855_vm9, %v2173_v56, %v6584_v9  ;;  %v9123_v9 = vld [vmem:[#allocation9_spill] sm:$0xff]  ;;  %v2282_v24 = vsel %vm678_vm4, %v9129_v4, %v2281_v40  ;;  %v6743_v23 = vperm.slane %v1639_v26, %v5599_v41 }
 0x285   : > { %v2175_v61 = vsel %vm857_vm10, %v2174_v50, %v6430_v31  ;;  %v1626_v62 = vrot.slane %v9123_v9, 4  ;;  %v9124_v31 = vld [vmem:[#allocation26_spill] sm:$0xff]  ;;  %v2294_v50 = vsel %vm678_vm4, %v6385_v34, %v2293_v43 }
 0x286   : > { %v2178_v22 = vrot.slane %v2175_v61, 4  ;;  %v6709_v18 = vperm.slane %v9124_v31, %v5797_v51  ;;  %v2290_v61 = vperm.slane %v2282_v24, %v5599_v41 }
 0x287   : > { %v1627_v20 = vsel %vm678_vm4, %v9126_v32, %v1626_v62  ;;  %v2302_v62 = vperm.slane %v2294_v50, %v5599_v41 }
 0x288   : > { %v2179_v60 = vsel %vm869_vm11, %v2168_v1, %v2178_v22  ;;  %1681 = vrot.lane.b32.xlu2 %v1617_v54, %s5447_s17  ;;  %2360 = vrot.lane.b32.xlu1 %v2278_v53, %s5446_s16  ;;  %v1246_v29 = vrot.slane %v6709_v18, 4  ;;  %v6733_v13 = vperm.slane %v1627_v20, %v5599_v41  ;;  %v6740_v22 = vperm.slane %v2547_v16, %v5797_v51 }
 0x289   : > { %2678 = vst [vmem:[#allocation1 + $0x30] ss:$2 sm:$0xff] %v2179_v60  ;;  %2336 = vrot.lane.b32.xlu0 %v2272_v35, %s5447_s17  ;;  %v2505_v1 = vsel %vm678_vm4, 0.0, %v2504_v8  ;;  %v1821_v54 = vrot.slane %v6552_v28, 4  ;;  %v2520_v53 = vrot.slane %v9121_v48, 4  ;;  %v2509_v35 = vsel %vm678_vm4, %v2508_v37, %v9117_v11 }
 0x28a   : > { %v6717_v42 = vpop.permute.xlu1 %1496  ;;  %v6719_v2 = vpop.permute.xlu2 %2340  ;;  %v1247_v60 = vsel %vm678_vm4, 0.0, %v1246_v29  ;;  %v1662_v36 = vrot.slane %v6733_v13, 4  ;;  %v2317_v31 = vrot.slane %v2290_v61, 4  ;;  %v1849_v20 = vrot.slane %v6508_v27, 4 }
 0x28b   : > { %v6724_v56 = vpop.permute.xlu0 %1050  ;;  %v2521_v19 = vsel %vm678_vm4, %v2520_v53, %v9120_v44  ;;  %v1822_v11 = vsel %vm678_vm4, %v1821_v54, %v6540_v52  ;;  %v6772_v24 = vperm.slane %v2509_v35, %v5599_v41  ;;  %v2279_v16 = vrot.slane %v9129_v4, 4  ;;  %v9130_v52 = vld [vmem:[#allocation10_spill] sm:$0xff]  ;;  %v9131_v54 = vld [vmem:[#allocation16_spill] sm:$0xff] }
 0x28c   : > { %v1663_v25 = vsel %vm678_vm4, %v6743_v23, %v1662_v36  ;;  %v2318_v43 = vsel %vm678_vm4, %v2302_v62, %v2317_v31  ;;  %v6779_v26 = vperm.slane %v2521_v19, %v5599_v41  ;;  %v1850_v44 = vsel %vm678_vm4, 0.0, %v1849_v20  ;;  %v9132_v36 = vld [vmem:[#allocation23_spill] sm:$0xff]  ;;  %v9134_v19 = vld [vmem:[#allocation30_spill] sm:$0xff] }
 0x28d   : > { %v6776_v8 = vperm.slane %v1663_v25, %v5797_v51  ;;  %v6782_v27 = vperm.slane %v2318_v43, %v5797_v51  ;;  %v6786_v29 = vperm.slane %v1822_v11, %v5797_v51  ;;  %v1855_v50 = vrot.slane %v9130_v52, 4 }
 0x28e   : > { %v2291_v37 = vrot.slane %v6385_v34, 4  ;;  %v2534_v4 = vrot.slane %v6772_v24, 4  ;;  %v1867_v35 = vrot.slane %v9132_v36, 4 }
 0x28f   : > { %v1856_v53 = vsel %vm678_vm4, %v9131_v54, %v1855_v50  ;;  %v1845_v20 = vrot.slane %v6786_v29, 4  ;;  %v1853_v50 = vrot.slane %v9131_v54, 4 }
 0x290   : > { %2613 = vrot.lane.b32.xlu2 %v6740_v22, %s5442_s30  ;;  %2581 = vrot.lane.b32.xlu1 %v2505_v1, %s5445_s15  ;;  %v2315_v1 = vrot.slane %v2302_v62, 4  ;;  %v2535_v25 = vsel %vm678_vm4, %v6779_v26, %v2534_v4  ;;  %v1868_v43 = vsel %vm678_vm4, %v9134_v19, %v1867_v35  ;;  %v2292_v11 = vsel %vm678_vm4, %v2291_v37, %v9128_v21 }
 0x291   : > { %1283 = vrot.lane.b32.xlu0 %v1247_v60, %s5447_s17  ;;  %v2280_v60 = vsel %vm678_vm4, %v2279_v16, %v9125_v5  ;;  %v1864_v16 = vperm.slane %v1856_v53, %v5599_v41  ;;  %v2543_v57 = vperm.slane %v2535_v25, %v5797_v51  ;;  %v1876_v4 = vperm.slane %v1868_v43, %v5599_v41 }
 0x292   : > { %v6757_v28 = vpop.permute.xlu2 %1685  ;;  %v6759_v48 = vpop.permute.xlu1 %1480  ;;  %v2316_v5 = vsel %vm678_vm4, %v2315_v1, %v2290_v61  ;;  %v6823_v33 = vperm.slane %v2292_v11, %v5599_v41  ;;  %v1846_v21 = vsel %vm678_vm4, 0.0, %v1845_v20  ;;  %v1865_v61 = vrot.slane %v9134_v19, 4 }
 0x293   : > { %v6761_v40 = vpop.permute.xlu0 %1042  ;;  %v6826_v35 = vperm.slane %v2316_v5, %v5797_v51  ;;  %v1660_v37 = vrot.slane %v6743_v23, 4  ;;  %v1891_v1 = vrot.slane %v1864_v16, 4  ;;  %v1854_v53 = vsel %vm678_vm4, %v1853_v50, %v9130_v52 }
 0x294   : > { %v1866_v43 = vsel %vm678_vm4, %v1865_v61, %v9132_v36  ;;  %v6852_v5 = vperm.slane %v1854_v53, %v5599_v41  ;;  %v1624_v52 = vrot.slane %v9126_v32, 4  ;;  %v1636_v36 = vrot.slane %v6296_v39, 4 }
 0x295   : > { %v1892_v19 = vsel %vm678_vm4, %v1876_v4, %v1891_v1  ;;  %v1661_v11 = vsel %vm678_vm4, %v1660_v37, %v6733_v13 }
 0x296   : > { %v6862_v1 = vperm.slane %v1661_v11, %v5797_v51  ;;  %v1879_v32 = vrot.slane %v6852_v5, 4 }
 0x298   : > { %1729 = vrot.lane.b32.xlu2 %v6776_v8, %s5442_s30  ;;  %1926 = vrot.lane.b32.xlu1 %v1850_v44, %s5445_s15  ;;  %v6817_v44 = vperm.slane %v2280_v60, %v5599_v41 }
 0x299   : > { %2384 = vrot.lane.b32.xlu0 %v6782_v27, %s5442_s30 }
 0x29a   : > { %v6801_v34 = vpop.permute.xlu2 %2348  ;;  %v6803_v62 = vpop.permute.xlu1 %1038  ;;  %v2305_v54 = vrot.slane %v6817_v44, 4 }
 0x29b   : > { %v6805_v31 = vpop.permute.xlu0 %2356 }
 0x29c   : > { %9133 = vst [vmem:[#allocation12_spill] sm:$0xff] %v6805_v31  ;;  %v2306_v23 = vsel %vm678_vm4, %v6823_v33, %v2305_v54  ;;  %v6859_v54 = vperm.slane %v1866_v43, %v5599_v41 }
 0x29d   : > { %v2314_v50 = vperm.slane %v2306_v23, %v5797_v51  ;;  %v1637_v23 = vsel %vm678_vm4, %v1636_v36, %v9127_v15 }
 0x29e   : > { %v1880_v39 = vsel %vm678_vm4, %v6859_v54, %v1879_v32  ;;  %v1643_v38 = vperm.slane %v1637_v23, %v5599_v41  ;;  %v2558_v32 = vrot.slane %v2543_v57, 4 }
 0x2a0   : > { %2597 = vrot.lane.b32.xlu2 %v2543_v57, %s5441_s29  ;;  %1910 = vrot.lane.b32.xlu1 %v1846_v21, %s5447_s17  ;;  %v1900_v21 = vperm.slane %v1892_v19, %v5797_v51  ;;  %v1678_v19 = vrot.slane %v6776_v8, 4  ;;  %v2562_v57 = vrot.slane %v6740_v22, 4 }
 0x2a1   : > { %2376 = vrot.lane.b32.xlu0 %v6826_v35, %s5443_s11 }
 0x2a2   : > { %v6838_v60 = vpop.permute.xlu2 %2589  ;;  %v6840_v25 = vpop.permute.xlu1 %1263 }
 0x2a3   : > { %9135 = vst [vmem:[#allocation25_spill] sm:$0xff] %v6840_v25  ;;  %v6842_v20 = vpop.permute.xlu0 %1303 }
 0x2a4   : > { %9136 = vst [vmem:[#allocation13_spill] sm:$0xff] %v6842_v20  ;;  %v2544_v20 = vrot.slane %v6696_v30, 4  ;;  %v1625_v30 = vsel %vm678_vm4, %v1624_v52, %v9123_v9  ;;  %v1888_v9 = vperm.slane %v1880_v39, %v5797_v51  ;;  %v1889_v52 = vrot.slane %v1876_v4, 4 }
 0x2a5   : > { %v1631_v43 = vperm.slane %v1625_v30, %v5599_v41 }
 0x2a6   : > { %v2545_v53 = vsel %vm678_vm4, %v2544_v20, %v6691_v6  ;;  %v1890_v36 = vsel %vm678_vm4, %v1889_v52, %v1864_v16 }
 0x2a7   : > { %v2551_v11 = vperm.slane %v2545_v53, %v5797_v51  ;;  %v1650_v6 = vrot.slane %v1631_v43, 4  ;;  %v1896_v30 = vperm.slane %v1890_v36, %v5797_v51  ;;  %v2559_v53 = vsel %vm678_vm4, 0.0, %v2558_v32 }
 0x2a8   : > { %2368 = vrot.lane.b32.xlu2 %v2314_v50, %s5441_s29  ;;  %1958 = vrot.lane.b32.xlu1 %v1900_v21, %s5442_s30 }
 0x2a9   : > { %1721 = vrot.lane.b32.xlu0 %v6862_v1, %s5443_s11  ;;  %v1651_v4 = vsel %vm678_vm4, %v1643_v38, %v1650_v6  ;;  %v2560_v52 = vrot.slane %v2551_v11, 4  ;;  %v2563_v6 = vsel %vm678_vm4, 0.0, %v2562_v57 }
 0x2aa   : > { %v6872_v13 = vpop.permute.xlu2 %1062  ;;  %v6874_v61 = vpop.permute.xlu1 %1026  ;;  %v1659_v39 = vperm.slane %v1651_v4, %v5797_v51 }
 0x2ab   : > { %v6876_v37 = vpop.permute.xlu0 %1701  ;;  %v2561_v4 = vsel %vm678_vm4, 0.0, %v2560_v52  ;;  %v2532_v52 = vrot.slane %v6779_v26, 4  ;;  %v2331_v26 = vrot.slane %v6826_v35, 4 }
 0x2ac   : > { %9137 = vst [vmem:[#allocation18_spill] sm:$0xff] %v6876_v37  ;;  %v1679_v37 = vsel %vm678_vm4, 0.0, %v1678_v19  ;;  %v2333_v19 = vrot.slane %v6782_v27, 4  ;;  %v1907_v27 = vrot.slane %v1900_v21, 4  ;;  %v1674_v41 = vrot.slane %v1659_v39, 4 }
 0x2ae   : > { %v2334_v36 = vsel %vm678_vm4, 0.0, %v2333_v19  ;;  %v1908_v57 = vsel %vm678_vm4, 0.0, %v1907_v27  ;;  %v1676_v27 = vrot.slane %v6862_v1, 4  ;;  %v2332_v1 = vsel %vm678_vm4, 0.0, %v2331_v26 }
 0x2b0   : > { %1942 = vrot.lane.b32.xlu2 %v1888_v9, %s5441_s29  ;;  %2605 = vrot.lane.b32.xlu1 %v2551_v11, %s5443_s11  ;;  %v2329_v11 = vrot.slane %v2314_v50, 4 }
 0x2b1   : > { %1733 = vrot.lane.b32.xlu0 %v1679_v37, %s5446_s16 }
 0x2b2   : > { %v6893_v15 = vpop.permute.xlu2 %2573  ;;  %v6895_v8 = vpop.permute.xlu1 %2585  ;;  %v2330_v19 = vsel %vm678_vm4, 0.0, %v2329_v11 }
 0x2b3   : > { %v6897_v20 = vpop.permute.xlu0 %2569 }
 0x2b8   : > { %1950 = vrot.lane.b32.xlu2 %v1896_v30, %s5443_s11  ;;  %1713 = vrot.lane.b32.xlu1 %v1659_v39, %s5441_s29  ;;  %v1903_v39 = vrot.slane %v1888_v9, 4  ;;  %v2303_v9 = vrot.slane %v6823_v33, 4  ;;  %v1905_v33 = vrot.slane %v1896_v30, 4 }
 0x2b9   : > { %2601 = vrot.lane.b32.xlu0 %v2559_v53, %s5444_s12 }
 0x2ba   : > { %v6907_v37 = vpop.permute.xlu2 %2344  ;;  %v6909_v23 = vpop.permute.xlu1 %1930  ;;  %v1904_v11 = vsel %vm678_vm4, 0.0, %v1903_v39 }
 0x2bb   : > { %9138 = vst [vmem:[#allocation27_spill] sm:$0xff] %v6909_v23  ;;  %v6911_v16 = vpop.permute.xlu0 %1287 }
 0x2c0   : > { %2617 = vrot.lane.b32.xlu2 %v2563_v6, %s5446_s16  ;;  %2388 = vrot.lane.b32.xlu1 %v2334_v36, %s5446_s16  ;;  %v1648_v6 = vrot.slane %v1643_v38, 4  ;;  %v1675_v36 = vsel %vm678_vm4, 0.0, %v1674_v41  ;;  %v2533_v41 = vsel %vm678_vm4, %v2532_v52, %v6772_v24  ;;  %v1877_v24 = vrot.slane %v6859_v54, 4 }
 0x2c1   : > { %2609 = vrot.lane.b32.xlu0 %v2561_v4, %s5445_s15 }
 0x2c2   : > { %v6921_v32 = vpop.permute.xlu2 %1918  ;;  %v6923_v53 = vpop.permute.xlu1 %1058  ;;  %v1649_v38 = vsel %vm678_vm4, %v1648_v6, %v1631_v43  ;;  %v1878_v26 = vsel %vm678_vm4, %v1877_v24, %v6852_v5  ;;  %v9143_v24 = vld [vmem:[#allocation21_spill] sm:$0xff] }
 0x2c3   : > { %v6925_v22 = vpop.permute.xlu0 %1922  ;;  %v6978_v30 = vperm.slane %v1878_v26, %v5797_v51 }
 0x2c8   : > { %1962 = vrot.lane.b32.xlu2 %v1908_v57, %s5446_s16  ;;  %2372 = vrot.lane.b32.xlu1 %v2330_v19, %s5444_s12  ;;  %v1677_v57 = vsel %vm678_vm4, 0.0, %v1676_v27  ;;  %v6948_v19 = vperm.slane %v1649_v38, %v5797_v51  ;;  %v2304_v27 = vsel %vm678_vm4, %v2303_v9, %v6817_v44  ;;  %v9142_v44 = vld [vmem:[#allocation22_spill] sm:$0xff] }
 0x2c9   : > { %1717 = vrot.lane.b32.xlu0 %v1675_v36, %s5444_s12  ;;  %v6951_v36 = vperm.slane %v2533_v41, %v5797_v51  ;;  %v6972_v41 = vperm.slane %v2304_v27, %v5797_v51 }
 0x2ca   : > { %v6934_v4 = vpop.permute.xlu2 %1299  ;;  %v6936_v21 = vpop.permute.xlu1 %1066  ;;  %v1672_v6 = vrot.slane %v6948_v19, 4 }
 0x2cb   : > { %9139 = vst [vmem:[#allocation24_spill] sm:$0xff] %v6934_v4  ;;  %v6938_v50 = vpop.permute.xlu0 %1307  ;;  %v2556_v39 = vrot.slane %v6951_v36, 4 }
 0x2cc   : > { %9140 = vst [vmem:[#allocation9_spill] sm:$0xff] %v6938_v50  ;;  %v1673_v54 = vsel %vm678_vm4, 0.0, %v1672_v6  ;;  %v9145_v50 = vld [vmem:[#allocation35_spill] sm:$0xff] }
 0x2cd   : > { %v2557_v38 = vsel %vm678_vm4, 0.0, %v2556_v39  ;;  %v2327_v39 = vrot.slane %v6972_v41, 4  ;;  %v1622_v23 = vrot.slane %v9145_v50, 4 }
 0x2cf   : > { %v2328_v26 = vsel %vm678_vm4, 0.0, %v2327_v39  ;;  %v1851_v39 = vrot.slane %v6481_v17, 4 }
 0x2d0   : > { %1946 = vrot.lane.b32.xlu2 %v1904_v11, %s5444_s12  ;;  %1725 = vrot.lane.b32.xlu1 %v1677_v57, %s5445_s15  ;;  %v1906_v11 = vsel %vm678_vm4, 0.0, %v1905_v33  ;;  %v1180_v57 = vrot.slane %v9142_v44, 4  ;;  %v1901_v33 = vrot.slane %v6978_v30, 4 }
 0x2d1   : > { %2380 = vrot.lane.b32.xlu0 %v2332_v1, %s5445_s15 }
 0x2d2   : > { %v6959_v35 = vpop.permute.xlu2 %1697  ;;  %v6961_v43 = vpop.permute.xlu1 %2577  ;;  %v1181_v6 = vsel %vm678_vm4, %v9143_v24, %v1180_v57 }
 0x2d3   : > { %9141 = vst [vmem:[#allocation26_spill] sm:$0xff] %v6959_v35  ;;  %v1071_v52 = vpop.permute.xlu0 %1070  ;;  %v1189_v27 = vperm.slane %v1181_v6, %v5797_v51  ;;  %v9158_v35 = vld [vmem:[#allocation15_spill] sm:$0xff] }
 0x2d5   : > { %v1196_v50 = vrot.slane %v1189_v27, 4 }
 0x2d8   : > { %1709 = vrot.lane.b32.xlu2 %v1673_v54, %s5447_s17  ;;  %2593 = vrot.lane.b32.xlu1 %v2557_v38, %s5447_s17  ;;  %v9144_v54 = vld [vmem:[#allocation7_spill] sm:$0xff] }
 0x2d9   : > { %1954 = vrot.lane.b32.xlu0 %v1906_v11, %s5445_s15  ;;  %v1386_v38 = vperm.slane %v9144_v54, %v5797_v51  ;;  %v1902_v11 = vsel %vm678_vm4, 0.0, %v1901_v33  ;;  %v1852_v33 = vsel %vm678_vm4, 0.0, %v1851_v39  ;;  %v1623_v51 = vsel %vm678_vm4, 0.0, %v1622_v23 }
 0x2da   : > { %v6982_v5 = vpop.permute.xlu2 %2565  ;;  %v6984_v9 = vpop.permute.xlu1 %1914  ;;  %v1197_v23 = vsel %vm678_vm4, 0.0, %v1196_v50 }
 0x2db   : > { %v6986_v1 = vpop.permute.xlu0 %1291  ;;  %v1393_v6 = vrot.slane %v1386_v38, 4  ;;  %v2620_v31 = vsel %vm384_vm0, %v6627_v46, %v6982_v5 }
 0x2dd   : > { %v1394_v54 = vsel %vm678_vm4, 0.0, %v1393_v6 }
 0x2e0   : > { %1275 = vrot.lane.b32.xlu2 %v1189_v27, %s5442_s30  ;;  %2364 = vrot.lane.b32.xlu1 %v2328_v26, %s5447_s17  ;;  %v9146_v26 = vld [vmem:[#allocation33_spill] sm:$0xff] }
 0x2e1   : > { %1938 = vrot.lane.b32.xlu0 %v1902_v11, %s5447_s17  ;;  %v1081_v11 = vsel %vm384_vm0, %v9146_v26, %v6874_v61 }
 0x2e2   : > { %v7000_v44 = vpop.permute.xlu1 %1295  ;;  %v7004_v24 = vpop.permute.xlu2 %1681  ;;  %v1082_v6 = vsel %vm847_vm5, %v1081_v11, %v6645_v63 }
 0x2e3   : > { %v7002_v57 = vpop.permute.xlu0 %1689  ;;  %v1736_v46 = vsel %vm384_vm0, %v6659_v45, %v7004_v24 }
 0x2e8   : > { %1476 = vrot.lane.b32.xlu2 %v1394_v54, %s5446_s16  ;;  %1934 = vrot.lane.b32.xlu1 %v1852_v33, %s5446_s16  ;;  %v1083_v54 = vsel %vm849_vm6, %v1082_v6, %v6600_v7 }
 0x2e9   : > { %1705 = vrot.lane.b32.xlu0 %v1623_v51, %s5446_s16  ;;  %v1084_v61 = vsel %vm851_vm7, %v1083_v54, %v6803_v62 }
 0x2ea   : > { %v7017_v4 = vpop.permute.xlu1 %1693  ;;  %v7023_v39 = vpop.permute.xlu2 %2613  ;;  %v1085_v26 = vsel %vm853_vm8, %v1084_v61, %v6761_v40 }
 0x2eb   : > { %v7019_v17 = vpop.permute.xlu0 %2352  ;;  %v1086_v50 = vsel %vm855_vm9, %v1085_v26, %v6565_v47 }
 0x2f0   : > { %1279 = vrot.lane.b32.xlu1 %v1197_v23, %s5446_s16 }
 0x2f1   : > { %1472 = vrot.lane.b32.xlu0 %v1386_v38, %s5442_s30 }
 0x2f2   : > { %v1079_v51 = vpop.permute.xlu1 %1078  ;;  %v7040_v11 = vpop.permute.xlu2 %1729 }
 0x2f3   : > { %v1055_v33 = vpop.permute.xlu0 %1054 }
 0x2f4   : > { %v1088_v27 = vsel %vm384_vm0, %v6633_v3, %v1055_v33 }
 0x2f5   : > { %v1089_v63 = vsel %vm847_vm5, %v1088_v27, %v6923_v53 }
 0x2f6   : > { %v1090_v7 = vsel %vm849_vm6, %v1089_v63, %v6872_v13  ;;  %v1087_v13 = vsel %vm857_vm10, %v1086_v50, %v6724_v56 }
 0x2f7   : > { %v1091_v38 = vsel %vm851_vm7, %v1090_v7, %v6936_v21 }
 0x2f8   : > { %v1092_v62 = vsel %vm853_vm8, %v1091_v38, %v1071_v52 }
 0x2f9   : > { %v1093_v3 = vsel %vm855_vm9, %v1092_v62, %v6676_v55 }
 0x2fa   : > { %v1094_v53 = vsel %vm857_vm10, %v1093_v3, %v1079_v51  ;;  %v7050_v6 = vpop.permute.xlu1 %2360  ;;  %v2598_v21 = vpop.permute.xlu2 %2597 }
 0x2fb   : > { %9147 = vst [vmem:[#allocation11_spill] sm:$0xff] %v7050_v6  ;;  %v1097_v40 = vrot.slane %v1094_v53, 4  ;;  %v2337_v23 = vpop.permute.xlu0 %2336 }
 0x2fc   : > { %v2391_v5 = vsel %vm384_vm0, %v6667_v49, %v2337_v23 }
 0x2fd   : > { %v1098_v54 = vsel %vm869_vm11, %v1087_v13, %v1097_v40 }
 0x2fe   : > { %2668 = vst [vmem:[#allocation1 + $0x1] ss:$2 sm:$0xff] %v1098_v54 }
 0x302   : > { %v2582_v52 = vpop.permute.xlu1 %2581  ;;  %v7057_v47 = vpop.permute.xlu2 %2368 }
 0x303   : > { %v1284_v61 = vpop.permute.xlu0 %1283 }
 0x30a   : > { %v7055_v33 = vpop.permute.xlu1 %1926  ;;  %v7063_v63 = vpop.permute.xlu2 %1942 }
 0x30b   : > { %9148 = vst [vmem:[#allocation14_spill] sm:$0xff] %v7055_v33  ;;  %v7059_v55 = vpop.permute.xlu0 %2384 }
 0x30c   : > { %9149 = vst [vmem:[#allocation20_spill] sm:$0xff] %v7059_v55 }
 0x312   : > { %v1911_v51 = vpop.permute.xlu1 %1910  ;;  %v7067_v7 = vpop.permute.xlu2 %1950 }
 0x313   : > { %v7061_v27 = vpop.permute.xlu0 %2376  ;;  %9152 = vst [vmem:[#allocation10_spill] sm:$0xff] %v7067_v7  ;;  %v1965_v45 = vsel %vm384_vm0, %v6786_v29, %v1911_v51  ;;  %v9160_v51 = vld [vmem:[#allocation28_spill] sm:$0xff] }
 0x314   : > { %9150 = vst [vmem:[#allocation17_spill] sm:$0xff] %v7061_v27  ;;  %v1507_v27 = vsel %vm384_vm0, %v9158_v35, %v6563_v12 }
 0x31a   : > { %v7065_v26 = vpop.permute.xlu1 %1958  ;;  %v2618_v50 = vpop.permute.xlu2 %2617 }
 0x31b   : > { %9151 = vst [vmem:[#allocation19_spill] sm:$0xff] %v7065_v26  ;;  %v1722_v56 = vpop.permute.xlu0 %1721 }
 0x322   : > { %v2606_v38 = vpop.permute.xlu1 %2605  ;;  %v7073_v13 = vpop.permute.xlu2 %1962 }
 0x323   : > { %v7069_v62 = vpop.permute.xlu0 %1733  ;;  %9155 = vst [vmem:[#allocation30_spill] sm:$0xff] %v7073_v13  ;;  %v2621_v13 = vsel %vm847_vm5, %v2620_v31, %v6897_v20 }
 0x324   : > { %9153 = vst [vmem:[#allocation16_spill] sm:$0xff] %v7069_v62  ;;  %v9157_v62 = vld [vmem:[#allocation29_spill] sm:$0xff] }
 0x325   : > { %v1514_v7 = vsel %vm384_vm0, %v9157_v62, %v6759_v48  ;;  %v2622_v48 = vsel %vm849_vm6, %v2621_v13, %v6893_v15  ;;  %v9159_v62 = vld [vmem:[#allocation31_spill] sm:$0xff]  ;;  %v1737_v15 = vsel %vm847_vm5, %v1736_v46, %v6757_v28  ;;  %v1310_v28 = vsel %vm384_vm0, %v9160_v51, %v6642_v0 }
 0x326   : > { %v7105_v12 = vsel %vm847_vm5, %v1507_v27, %v9159_v62  ;;  %v2623_v24 = vsel %vm851_vm7, %v2622_v48, %v6961_v43  ;;  %v1738_v0 = vsel %vm849_vm6, %v1737_v15, %v7002_v57  ;;  %v9164_v62 = vld [vmem:[#allocation10_spill] sm:$0xff] }
 0x327   : > { %v2624_v29 = vsel %vm853_vm8, %v2623_v24, %v2582_v52  ;;  %v9168_v24 = vld [vmem:[#allocation20_spill] sm:$0xff] }
 0x32a   : > { %v1714_v3 = vpop.permute.xlu1 %1713  ;;  %v7077_v55 = vpop.permute.xlu2 %1946 }
 0x32b   : > { %v2602_v53 = vpop.permute.xlu0 %2601  ;;  %9156 = vst [vmem:[#allocation22_spill] sm:$0xff] %v7077_v55  ;;  %v1515_v55 = vsel %vm847_vm5, %v1514_v7, %v6640_v14 }
 0x32c   : > { %v1516_v14 = vsel %vm849_vm6, %v1515_v55, %v6522_v58  ;;  %v1317_v58 = vsel %vm384_vm0, %v6709_v18, %v1284_v61  ;;  %v1311_v18 = vsel %vm847_vm5, %v1310_v28, %v6678_v59  ;;  %v9172_v28 = vld [vmem:[#allocation19_spill] sm:$0xff] }
 0x32d   : > { %v1517_v52 = vsel %vm851_vm7, %v1516_v14, %v6602_v10  ;;  %v1739_v10 = vsel %vm851_vm7, %v1738_v0, %v7017_v4  ;;  %v9165_v14 = vld [vmem:[#allocation14_spill] sm:$0xff] }
 0x32e   : > { %v9175_v0 = vld [vmem:[#allocation30_spill] sm:$0xff] }
 0x332   : > { %v7071_v40 = vpop.permute.xlu1 %2388 }
 0x333   : > { %9154 = vst [vmem:[#allocation23_spill] sm:$0xff] %v7071_v40  ;;  %v2610_v54 = vpop.permute.xlu0 %2609  ;;  %v1710_v40 = vpop.permute.xlu2 %1709 }
 0x334   : > { %v1743_v31 = vsel %vm384_vm0, %v6948_v19, %v1710_v40  ;;  %v2392_v19 = vsel %vm847_vm5, %v2391_v5, %v6719_v2  ;;  %v1966_v2 = vsel %vm847_vm5, %v1965_v45, %v6984_v9  ;;  %v1318_v9 = vsel %vm847_vm5, %v1317_v58, %v6911_v16  ;;  %v9161_v5 = vld [vmem:[#allocation22_spill] sm:$0xff]  ;;  %v9166_v45 = vld [vmem:[#allocation12_spill] sm:$0xff]  ;;  %v9169_v58 = vld [vmem:[#allocation25_spill] sm:$0xff] }
 0x335   : > { %v1744_v55 = vsel %vm847_vm5, %v1743_v31, %v1714_v3  ;;  %v2393_v61 = vsel %vm849_vm6, %v2392_v19, %v6907_v37  ;;  %v1967_v37 = vsel %vm849_vm6, %v1966_v2, %v6921_v32  ;;  %v1319_v4 = vsel %vm849_vm6, %v1318_v9, %v6986_v1 }
 0x336   : > { %v2394_v57 = vsel %vm851_vm7, %v2393_v61, %v6801_v34  ;;  %v7165_v34 = vld.sshfl [vmem:[#allocation1] sm:$0xff pattern:$0x75316420]  ;;  %v9174_v61 = vld [vmem:[#allocation27_spill] sm:$0xff] }
 0x33a   : > { %v7075_v6 = vpop.permute.xlu1 %2372 }
 0x33b   : > { %v1718_v25 = vpop.permute.xlu0 %1717 }
 0x33c   : > { %v1745_v43 = vsel %vm849_vm6, %v1744_v55, %v1718_v25  ;;  %v2625_v25 = vsel %vm855_vm9, %v2624_v29, %v6895_v8  ;;  %v1312_v29 = vsel %vm849_vm6, %v1311_v18, %v9169_v58  ;;  %v9170_v55 = vld [vmem:[#allocation24_spill] sm:$0xff] }
 0x33d   : > { %v1746_v7 = vsel %vm851_vm7, %v1745_v43, %v1722_v56  ;;  %v2626_v32 = vsel %vm857_vm10, %v2625_v25, %v6838_v60  ;;  %v1968_v60 = vsel %vm851_vm7, %v1967_v37, %v6925_v22  ;;  %v1320_v22 = vsel %vm851_vm7, %v1319_v4, %v7000_v44  ;;  %v1276_v43 = vpop.permute.xlu2 %1275  ;;  %v9176_v25 = vld [vmem:[#allocation11_spill] sm:$0xff] }
 0x342   : > { %v1726_v26 = vpop.permute.xlu1 %1725 }
 0x343   : > { %v7082_v33 = vpop.permute.xlu0 %2380  ;;  %v1747_v16 = vsel %vm853_vm8, %v1746_v7, %v1726_v26  ;;  %v7167_v26 = vld.sshfl [vmem:[#allocation1 + $0x8] sm:$0xff pattern:$0x75316420] }
 0x34a   : > { %v2594_v20 = vpop.permute.xlu1 %2593 }
 0x34b   : > { %v1955_v35 = vpop.permute.xlu0 %1954  ;;  %v2627_v49 = vsel %vm384_vm0, %v6951_v36, %v2594_v20 }
 0x34c   : > { %v2628_v23 = vsel %vm847_vm5, %v2627_v49, %v2598_v21  ;;  %v9167_v49 = vld [vmem:[#allocation16_spill] sm:$0xff] }
 0x34d   : > { %v2629_v36 = vsel %vm849_vm6, %v2628_v23, %v2602_v53  ;;  %v5448_v53 = vmov 0  }
 0x34e   : > { %v2630_v21 = vsel %vm851_vm7, %v2629_v36, %v2606_v38  ;;  %5427 = vset.pattern.permute.xlu0 %v5448_v53  ;;  %5428 = vset.pattern.permute.xlu1 %v5448_v53  ;;  %v9171_v36 = vld [vmem:[#allocation23_spill] sm:$0xff] }
 0x34f   : > { %v2631_v27 = vsel %vm853_vm8, %v2630_v21, %v2610_v54  ;;  %v1748_v54 = vsel %vm855_vm9, %v1747_v16, %v7040_v11  ;;  %v9163_v11 = vld [vmem:[#allocation26_spill] sm:$0xff] }
 0x350   : > { %v2632_v59 = vsel %vm855_vm9, %v2631_v27, %v7023_v39  ;;  %v2651_v39 = vld [vmem:[%s9033_s7] sm:$0xf]  ;;  %v1740_v20 = vsel %vm853_vm8, %v1739_v10, %v9163_v11  ;;  %v1749_v15 = vsel %vm857_vm10, %v1748_v54, %v9167_v49  ;;  %v9182_v54 = vld [vmem:[#allocation32_spill] sm:$0xff] }
 0x351   : > { %v2633_v38 = vsel %vm857_vm10, %v2632_v59, %v2618_v50  ;;  %2654 = vperm.xlu0 %5427, %v2651_v39   ;;  %v1752_v10 = vrot.slane %v1749_v15, 4  ;;  %v9185_v11 = vld [vmem:[#allocation36_spill] sm:$0xff] }
 0x352   : > { %v2636_v3 = vrot.slane %v2633_v38, 4  ;;  %v2365_v8 = vpop.permute.xlu1 %2364 }
 0x353   : > { %v1939_v56 = vpop.permute.xlu0 %1938  ;;  %v2398_v50 = vsel %vm384_vm0, %v6972_v41, %v2365_v8  ;;  %v2395_v41 = vsel %vm853_vm8, %v2394_v57, %v7019_v17  ;;  %v9162_v17 = vld [vmem:[#allocation17_spill] sm:$0xff]  ;;  %v9177_v57 = vld [vmem:[#allocation39_spill] sm:$0xff] }
 0x354   : > { %v2637_v40 = vsel %vm869_vm11, %v2626_v32, %v2636_v3  ;;  %v1972_v13 = vsel %vm384_vm0, %v6978_v30, %v1939_v56  ;;  %v2399_v1 = vsel %vm847_vm5, %v2398_v50, %v7057_v47  ;;  %v1518_v47 = vsel %vm853_vm8, %v1517_v52, %v6717_v42  ;;  %v9173_v52 = vld [vmem:[#allocation18_spill] sm:$0xff]  ;;  %v9178_v32 = vld [vmem:[#allocation13_spill] sm:$0xff] }
 0x355   : > { %2689 = vst [vmem:[#allocation1] ss:$2 sm:$0xff] %v2637_v40  ;;  %v1973_v46 = vsel %vm847_vm5, %v1972_v13, %v7063_v63  ;;  %v2400_v30 = vsel %vm849_vm6, %v2399_v1, %v7075_v6  ;;  %v1969_v42 = vsel %vm853_vm8, %v1968_v60, %v9165_v14  ;;  %v2396_v44 = vsel %vm855_vm9, %v2395_v41, %v9166_v45  ;;  %v9179_v50 = vld [vmem:[#allocation34_spill] sm:$0xff]  ;;  %v9181_v60 = vld [vmem:[#allocation9_spill] sm:$0xff]  ;;  %v1477_v14 = vpop.permute.xlu2 %1476 }
 0x356   : > { %v1974_v48 = vsel %vm849_vm6, %v1973_v46, %v9161_v5  ;;  %v2401_v31 = vsel %vm851_vm7, %v2400_v30, %v9162_v17  ;;  %v1970_v27 = vsel %vm855_vm9, %v1969_v42, %v9174_v61  ;;  %v2397_v59 = vsel %vm857_vm10, %v2396_v44, %v9176_v25  ;;  %v9183_v30 = vld [vmem:[#allocation37_spill] sm:$0xff] }
 0x357   : > { %v1975_v63 = vsel %vm851_vm7, %v1974_v48, %v9164_v62  ;;  %v2402_v6 = vsel %vm853_vm8, %v2401_v31, %v7082_v33  ;;  %v1321_v33 = vsel %vm853_vm8, %v1320_v22, %v9170_v55  ;;  %v1509_v16 = vsel %vm849_vm6, %v7105_v12, %v9177_v57  ;;  %v9180_v12 = vld [vmem:[#allocation38_spill] sm:$0xff]  ;;  %v9184_v22 = vld [vmem:[#allocation40_spill] sm:$0xff]  ;;  %v2641_v55 = vld [vmem:[%s9032_s6] sm:$0xf] }
 0x358   : > { %v1976_v19 = vsel %vm853_vm8, %v1975_v63, %v1955_v35  ;;  %v2403_v23 = vsel %vm855_vm9, %v2402_v6, %v9168_v24  ;;  %v1741_v35 = vsel %vm855_vm9, %v1740_v20, %v9173_v52  ;;  %v1322_v56 = vsel %vm855_vm9, %v1321_v33, %v9178_v32  ;;  %v7279_v52 = vld [vmem:[%s9031_s5 + $0x8] sm:$0xff] }
 0x359   : > { %v2404_v51 = vsel %vm857_vm10, %v2403_v23, %v9171_v36  ;;  %v1977_v2 = vsel %vm855_vm9, %v1976_v19, %v9172_v28  ;;  %v1519_v53 = vsel %vm855_vm9, %v1518_v47, %v9179_v50  ;;  %v1313_v1 = vsel %vm851_vm7, %v1312_v29, %v9180_v12  ;;  %v9186_v57 = vld [vmem:[#allocation6_spill] sm:$0xff] }
 0x35a   : > { %v2407_v21 = vrot.slane %v2404_v51, 4  ;;  %v1978_v18 = vsel %vm857_vm10, %v1977_v2, %v9175_v0  ;;  %v1935_v9 = vpop.permute.xlu1 %1934  ;;  %v1323_v41 = vsel %vm857_vm10, %v1322_v56, %v9181_v60  ;;  %v1510_v46 = vsel %vm851_vm7, %v1509_v16, %v9182_v54  ;;  %v7286_v0 = vld [vmem:[%s9031_s5] sm:$0xff] }
 0x35b   : > { %v1706_v37 = vpop.permute.xlu0 %1705  ;;  %v1981_v7 = vrot.slane %v1978_v18, 4  ;;  %v1971_v38 = vsel %vm857_vm10, %v1970_v27, %v1935_v9  ;;  %v1520_v47 = vsel %vm857_vm10, %v1519_v53, %v9183_v30  ;;  %v1314_v5 = vsel %vm853_vm8, %v1313_v1, %v9184_v22  ;;  %v9187_v22 = vld [vmem:[#allocation8_spill] sm:$0xff] }
 0x35c   : > { %v2408_v3 = vsel %vm869_vm11, %v2397_v59, %v2407_v21  ;;  %v1742_v8 = vsel %vm857_vm10, %v1741_v35, %v1706_v37  ;;  %v2690_v39 = vld.sshfl [vmem:[#allocation1] sm:$0xff pattern:$0x75316420]  ;;  %v2691_v4 = vld.sshfl [vmem:[#allocation1 + $0x8] sm:$0xff pattern:$0x75316420]  ;;  %v1315_v48 = vsel %vm855_vm9, %v1314_v5, %v1276_v43  ;;  %v1511_v20 = vsel %vm853_vm8, %v1510_v46, %v9185_v11 }
 0x35d   : > { %2680 = vst [vmem:[#allocation1 + $0x31] ss:$2 sm:$0xff] %v2408_v3  ;;  %v1753_v40 = vsel %vm869_vm11, %v1742_v8, %v1752_v10  ;;  %v1982_v13 = vsel %vm869_vm11, %v1971_v38, %v1981_v7  ;;  %5374 = vmatpush.msk.msrb.mxu3 %vm869_vm11, %v2690_v39  ;;  %5376 = vmatpush.msk.msrb.mxu0 %vm869_vm11, %v2691_v4  ;;  %v1326_v17 = vrot.slane %v1323_v41, 4  ;;  %v1523_v63 = vrot.slane %v1520_v47, 4 }
 0x35e   : > { %2674 = vst [vmem:[#allocation1 + $0x20] ss:$2 sm:$0xff] %v1753_v40 }
 0x35f   : > { %2676 = vst [vmem:[#allocation1 + $0x21] ss:$2 sm:$0xff] %v1982_v13 }
 0x362   : > { %v1280_v31 = vpop.permute.xlu1 %1279 }
 0x363   : > { %v1473_v62 = vpop.permute.xlu0 %1472  ;;  %v1316_v6 = vsel %vm857_vm10, %v1315_v48, %v1280_v31 }
 0x364   : > { %v1512_v42 = vsel %vm855_vm9, %v1511_v20, %v1473_v62  ;;  %v1327_v45 = vsel %vm869_vm11, %v1316_v6, %v1326_v17  ;;  %v2687_v44 = vld.sshfl [vmem:[#allocation1 + $0x30] sm:$0xff pattern:$0x75316420]  ;;  %v2688_v49 = vld.sshfl [vmem:[#allocation1 + $0x38] sm:$0xff pattern:$0x75316420] }
 0x365   : > { %v1513_v15 = vsel %vm857_vm10, %v1512_v42, %v1477_v14  ;;  %2670 = vst [vmem:[#allocation1 + $0x10] ss:$2 sm:$0xff] %v1327_v45  ;;  %2720 = vmatpush.msrb.mxu3 %v2687_v44  ;;  %2740 = vmatpush.msrb.mxu0 %v2688_v49 }
 0x366   : > { %v1524_v19 = vsel %vm869_vm11, %v1513_v15, %v1523_v63  ;;  %v2685_v24 = vld.sshfl [vmem:[#allocation1 + $0x20] sm:$0xff pattern:$0x75316420]  ;;  %v2686_v23 = vld.sshfl [vmem:[#allocation1 + $0x28] sm:$0xff pattern:$0x75316420] }
 0x367   : > { %2672 = vst [vmem:[#allocation1 + $0x11] ss:$2 sm:$0xff] %v1524_v19  ;;  %2721 = vmatpush.msrb.mxu3 %v2685_v24  ;;  %2741 = vmatpush.msrb.mxu0 %v2686_v23 }
 0x36e   : > { %v2683_v58 = vld.sshfl [vmem:[#allocation1 + $0x10] sm:$0xff pattern:$0x75316420]  ;;  %v2684_v29 = vld.sshfl [vmem:[#allocation1 + $0x18] sm:$0xff pattern:$0x75316420] }
 0x36f   : > { %2722 = vmatpush.msrb.mxu3 %v2683_v58  ;;  %2742 = vmatpush.msrb.mxu0 %v2684_v29 }
 0x371   : > { %2723 = vmatpush.msrb.mxu3 %v7165_v34  ;;  %2743 = vmatpush.msrb.mxu0 %v7167_v26 }
 0x372   : > { %5375 = vmatmul.msk.f32.vlgmr.msrb.gmra.mxu3 %vm2700_vm12, %v2641_v55  ;;  %5377 = vmatmul.msk.f32.vlgmr.msrb.gmra.mxu0 %vm2700_vm12, %v2641_v55 }
 0x373   : > { %2928 = vmatpush.msra.mxu3 %v7279_v52  ;;  %3000 = vmatpush.msra.mxu0 %v7279_v52 }
 0x375   : > { %2929 = vmatpush.msra.mxu3 %v7286_v0  ;;  %3001 = vmatpush.msra.mxu0 %v7286_v0 }
 0x377   : > { %3073 = vmatpush.msrb.mxu3 %v7279_v52 }
 0x379   : > { %3074 = vmatpush.msrb.mxu3 %v7286_v0 }
 0x3c3   : > { %v2655_v33 = vpop.permute.xlu0 %2654 }
 0x3ef   : > { %v2745_v36 = vpop.f32.mrf.mxu0 }
 0x3f0   : > { %v2746_v51 = vadd.f32 %v2745_v36, %v2655_v33 }
 0x3f2   : > { %v2749_v28 = vmax.f32 %v2746_v51, 0.0 }
 0x3f4   : > { %2785 = vrot.lane.b32.xlu2 %v2749_v28, %s5444_s12  ;;  %2779 = vrot.lane.b32.xlu1 %v2749_v28, %s5445_s15 }
 0x3f5   : > { %2791 = vrot.lane.b32.xlu0 %v2749_v28, %s5447_s17  ;;  %v2725_v2 = vpop.f32.mrf.mxu3 }
 0x3f6   : > { %v2726_v43 = vadd.f32 %v2725_v2, %v2655_v33 }
 0x3f8   : > { %v2748_v21 = vmax.f32 %v2726_v43, 0.0 }
 0x3fc   : > { %2757 = vrot.lane.b32.xlu2 %v2748_v21, %s5445_s15  ;;  %2769 = vrot.lane.b32.xlu1 %v2748_v21, %s5447_s17 }
 0x3fd   : > { %2788 = vrot.lane.b32.xlu0 %v2749_v28, %s5441_s29 }
 0x404   : > { %2766 = vrot.lane.b32.xlu2 %v2748_v21, %s5441_s29  ;;  %2763 = vrot.lane.b32.xlu1 %v2748_v21, %s5444_s12 }
 0x405   : > { %2751 = vrot.lane.b32.xlu0 %v2748_v21, %s5446_s16 }
 0x40c   : > { %2760 = vrot.lane.b32.xlu2 %v2748_v21, %s5443_s11  ;;  %2754 = vrot.lane.b32.xlu1 %v2748_v21, %s5442_s30 }
 0x40d   : > { %2782 = vrot.lane.b32.xlu0 %v2749_v28, %s5443_s11 }
 0x414   : > { %2776 = vrot.lane.b32.xlu2 %v2749_v28, %s5442_s30  ;;  %2773 = vrot.lane.b32.xlu1 %v2749_v28, %s5446_s16 }
 0x44e   : > { %v2786_v34 = vpop.permute.xlu2 %2785 }
 0x456   : > { %v2758_v26 = vpop.permute.xlu2 %2757 }
 0x457   : > { %v2800_v3 = vrot.slane %v2758_v26, 4 }
 0x45e   : > { %v2767_v35 = vpop.permute.xlu2 %2766 }
 0x45f   : > { %v2806_v37 = vrot.slane %v2767_v35, 4 }
 0x466   : > { %v2780_v61 = vpop.permute.xlu1 %2779  ;;  %v2761_v25 = vpop.permute.xlu2 %2760 }
 0x467   : > { %v2792_v27 = vpop.permute.xlu0 %2791  ;;  %v2807_v39 = vsel %vm678_vm4, %v2806_v37, %v2761_v25  ;;  %v2856_v42 = vrot.slane %v2780_v61, 4 }
 0x468   : > { %v2868_v8 = vrot.slane %v2792_v27, 4  ;;  %v2811_v50 = vperm.slane %v2807_v39, %v9186_v57 }
 0x46a   : > { %v2869_v53 = vsel %vm678_vm4, %v2868_v8, %v2786_v34  ;;  %v2832_v20 = vrot.slane %v2811_v50, 4 }
 0x46b   : > { %v2873_v46 = vperm.slane %v2869_v53, %v9186_v57  ;;  %v7341_v53 = vld [vmem:[%s9030_s4] sm:$0xff] }
 0x46d   : > { %v2886_v62 = vrot.slane %v2873_v46, 4 }
 0x46e   : > { %v2770_v18 = vpop.permute.xlu1 %2769  ;;  %v2777_v4 = vpop.permute.xlu2 %2776 }
 0x46f   : > { %v2789_v9 = vpop.permute.xlu0 %2788  ;;  %v2812_v59 = vrot.slane %v2770_v18, 4  ;;  %v2850_v40 = vrot.slane %v2777_v4, 4 }
 0x470   : > { %v2862_v13 = vrot.slane %v2789_v9, 4 }
 0x471   : > { %v2851_v47 = vsel %vm678_vm4, %v2850_v40, %v2749_v28 }
 0x472   : > { %v2855_v63 = vperm.slane %v2851_v47, %v9186_v57 }
 0x474   : > { %v2876_v36 = vrot.slane %v2855_v63, 4 }
 0x476   : > { %v2764_v10 = vpop.permute.xlu1 %2763 }
 0x477   : > { %v2752_v7 = vpop.permute.xlu0 %2751  ;;  %v2813_v38 = vsel %vm678_vm4, %v2812_v59, %v2764_v10 }
 0x478   : > { %v2817_v16 = vperm.slane %v2813_v38, %v9186_v57  ;;  %v2801_v56 = vsel %vm678_vm4, %v2800_v3, %v2752_v7 }
 0x479   : > { %v2805_v12 = vperm.slane %v2801_v56, %v9186_v57 }
 0x47a   : > { %v2830_v32 = vrot.slane %v2817_v16, 4  ;;  %v2833_v49 = vsel %vm678_vm4, %v2817_v16, %v2832_v20 }
 0x47b   : > { %v2818_v17 = vrot.slane %v2805_v12, 4  ;;  %v2841_v28 = vperm.slane %v2833_v49, %v9187_v22 }
 0x47c   : > { %v2831_v1 = vsel %vm678_vm4, %v2830_v32, %v2811_v50 }
 0x47d   : > { %v2837_v5 = vperm.slane %v2831_v1, %v9187_v22  ;;  %v2846_v3 = vrot.slane %v2841_v28, 4  ;;  %v3011_v1 = vld [vmem:[%s9030_s4 + $0x10] sm:$0x3] }
 0x47e   : > { %v2755_v60 = vpop.permute.xlu1 %2754 }
 0x47f   : > { %v2783_v41 = vpop.permute.xlu0 %2782  ;;  %v2794_v54 = vrot.slane %v2755_v60, 4  ;;  %v2842_v44 = vrot.slane %v2837_v5, 4 }
 0x480   : > { %v2863_v30 = vsel %vm678_vm4, %v2862_v13, %v2783_v41  ;;  %v7350_v13 = vld [vmem:[%s9030_s4 + $0x8] sm:$0xff] }
 0x481   : > { %v2795_v48 = vsel %vm678_vm4, %v2794_v54, %v2748_v21  ;;  %v2867_v31 = vperm.slane %v2863_v30, %v9186_v57 }
 0x482   : > { %v2799_v11 = vperm.slane %v2795_v48, %v9186_v57 }
 0x483   : > { %v2887_v15 = vsel %vm678_vm4, %v2886_v62, %v2867_v31  ;;  %v2888_v19 = vrot.slane %v2867_v31, 4 }
 0x484   : > { %v2820_v6 = vrot.slane %v2799_v11, 4  ;;  %v2819_v14 = vsel %vm678_vm4, %v2818_v17, %v2799_v11  ;;  %v2893_v43 = vperm.slane %v2887_v15, %v9187_v22 }
 0x485   : > { %v2825_v45 = vperm.slane %v2819_v14, %v9187_v22  ;;  %v2889_v35 = vsel %vm678_vm4, %v2873_v46, %v2888_v19 }
 0x486   : > { %v2774_v24 = vpop.permute.xlu1 %2773  ;;  %v2821_v23 = vsel %vm678_vm4, %v2805_v12, %v2820_v6  ;;  %v2898_v25 = vrot.slane %v2893_v43, 4  ;;  %v2897_v59 = vperm.slane %v2889_v35, %v9187_v22 }
 0x487   : > { %v2857_v58 = vsel %vm678_vm4, %v2856_v42, %v2774_v24  ;;  %v2843_v29 = vsel %vm678_vm4, %v2842_v44, %v2825_v45  ;;  %v2844_v55 = vrot.slane %v2825_v45, 4  ;;  %v2829_v33 = vperm.slane %v2821_v23, %v9187_v22 }
 0x488   : > { %v2861_v51 = vperm.slane %v2857_v58, %v9186_v57  ;;  %5378 = vmatmul.msk.f32.vlgmr.msra.gmra.mxu3 %vm384_vm0, %v2843_v29  ;;  %v2902_v39 = vrot.slane %v2897_v59, 4 }
 0x489   : > { %v2845_v2 = vsel %vm678_vm4, %v2837_v5, %v2844_v55  ;;  %v2848_v21 = vrot.slane %v2829_v33, 4  ;;  %v2847_v8 = vsel %vm678_vm4, %v2846_v3, %v2829_v33 }
 0x48a   : > { %v2874_v34 = vrot.slane %v2861_v51, 4  ;;  %5383 = vmatmul.msk.f32.vlgmr.msra.gmra.mxu0 %vm384_vm0, %v2845_v2  ;;  %v2877_v26 = vsel %vm678_vm4, %v2861_v51, %v2876_v36 }
 0x48b   : > { %v2885_v61 = vperm.slane %v2877_v26, %v9187_v22  ;;  %v2849_v27 = vsel %vm678_vm4, %v2841_v28, %v2848_v21 }
 0x48c   : > { %v2875_v18 = vsel %vm678_vm4, %v2874_v34, %v2855_v63 }
 0x48d   : > { %v2881_v9 = vperm.slane %v2875_v18, %v9187_v22  ;;  %v2904_v10 = vrot.slane %v2885_v61, 4  ;;  %v2903_v4 = vsel %vm678_vm4, %v2902_v39, %v2885_v61 }
 0x48f   : > { %v2899_v37 = vsel %vm678_vm4, %v2898_v25, %v2881_v9  ;;  %v2900_v7 = vrot.slane %v2881_v9, 4  ;;  %v2905_v38 = vsel %vm678_vm4, %v2897_v59, %v2904_v10  ;;  %v3157_v59 = vld [vmem:[%s9030_s4 + $0x10] sm:$0x3] }
 0x490   : > { %5379 = vmatmul.msk.f32.gmra.mxu3 %vm384_vm0, %v2899_v37 }
 0x491   : > { %v2901_v16 = vsel %vm678_vm4, %v2893_v43, %v2900_v7 }
 0x492   : > { %5384 = vmatmul.msk.f32.gmra.mxu0 %vm384_vm0, %v2901_v16 }
 0x498   : > { %5388 = vmatmul.msk.f32.vlgmr.msrb.gmra.mxu3 %vm384_vm0, %v2847_v8 }
 0x4a0   : > { %5389 = vmatmul.msk.f32.gmra.mxu3 %vm384_vm0, %v2903_v4 }
 0x507   : > { %v3003_v32 = vpop.f32.mrf.mxu0 }
 0x50b   : > { %v2931_v56 = vpop.f32.mrf.mxu3 }
 0x50f   : > { %v3006_v50 = vpop.f32.mrf.mxu0 }
 0x510   : > { %3035 = vmatpush.msra.mxu1 %v3006_v50 }
 0x512   : > { %3036 = vmatpush.msra.mxu1 %v3003_v32 }
 0x513   : > { %v2934_v40 = vpop.f32.mrf.mxu3  ;;  %5385 = vmatmul.msk.f32.vlgmr.msra.gmra.mxu1 %vm384_vm0, %v7341_v53 }
 0x514   : > { %2963 = vmatpush.msra.mxu2 %v2934_v40 }
 0x516   : > { %2964 = vmatpush.msra.mxu2 %v2931_v56 }
 0x517   : > { %5380 = vmatmul.msk.f32.vlgmr.msra.gmra.mxu2 %vm384_vm0, %v7341_v53 }
 0x518   : > { %3146 = vmatpush.msrb.mxu2 %v7279_v52  ;;  %v2939_v52 = vld [vmem:[%s9030_s4 + $0x10] sm:$0x3] }
 0x51a   : > { %3147 = vmatpush.msrb.mxu2 %v7286_v0  ;;  %v3084_v0 = vld [vmem:[%s9030_s4 + $0x10] sm:$0x3] }
 0x51b   : > { %5386 = vmatmul.msk.f32.gmra.mxu1 %vm384_vm0, %v7350_v13  ;;  %v3076_v12 = vpop.f32.mrf.mxu3 }
 0x51f   : > { %5381 = vmatmul.msk.f32.gmra.mxu2 %vm384_vm0, %v7350_v13 }
 0x523   : > { %5387 = vmatmul.msk.f32.gmra.mxu1 %vm384_vm0, %v3011_v1  ;;  %v3079_v60 = vpop.f32.mrf.mxu3 }
 0x524   : > { %3108 = vmatpush.msrb.mxu0 %v3079_v60 }
 0x526   : > { %3109 = vmatpush.msrb.mxu0 %v3076_v12 }
 0x527   : > { %5382 = vmatmul.msk.f32.gmra.mxu2 %vm384_vm0, %v2939_v52  ;;  %5390 = vmatmul.msk.f32.vlgmr.msrb.gmra.mxu0 %vm384_vm0, %v7341_v53 }
 0x52f   : > { %5391 = vmatmul.msk.f32.gmra.mxu0 %vm384_vm0, %v7350_v13  ;;  %5393 = vmatmul.msk.f32.vlgmr.msrb.gmra.mxu2 %vm384_vm0, %v2849_v27 }
 0x537   : > { %5392 = vmatmul.msk.f32.gmra.mxu0 %vm384_vm0, %v3084_v0  ;;  %5394 = vmatmul.msk.f32.gmra.mxu2 %vm384_vm0, %v2905_v38 }
 0x590   : > { %v3038_v41 = vpop.f32.mrf.mxu1 }
 0x591   : > { %3048 = vst.msk [vmem:[#allocation4 + $0x18] sm:$0xff] %vm452_vm2, %v3038_v41 }
 0x598   : > { %v3041_v54 = vpop.f32.mrf.mxu1  ;;  %v7377_v46 = vld [vmem:[#allocation4 + $0x18] sm:$0xff] }
 0x599   : > { %3049 = vst.msk [vmem:[#allocation4 + $0x20] sm:$0xff] %vm452_vm2, %v3041_v54  ;;  %3642 = vrot.lane.b32.xlu0 %v7377_v46, %s5438_s28  ;;  %3413 = vrot.lane.b32.xlu2 %v7377_v46, %s5437_s27  ;;  %v3219_v56 = vrot.slane %v7377_v46, 4 }
 0x59a   : > { %v2966_v30 = vpop.f32.mrf.mxu2 }
 0x59b   : > { %2975 = vst.msk [vmem:[#allocation4] sm:$0xff] %vm452_vm2, %v2966_v30 }
 0x5a0   : > { %v3044_v47 = vpop.f32.mrf.mxu1  ;;  %v7385_v5 = vld [vmem:[#allocation4 + $0x20] sm:$0xff] }
 0x5a1   : > { %3050 = vst.msk [vmem:[#allocation4 + $0x28] sm:$0x3] %vm455_vm3, %v3044_v47  ;;  %3644 = vrot.lane.b32.xlu1 %v7385_v5, %s5438_s28  ;;  %3415 = vrot.lane.b32.xlu0 %v7385_v5, %s5437_s27  ;;  %v7394_v31 = vld [vmem:[#allocation4 + $0x19] sm:$0xff] }
 0x5a2   : > { %v2969_v48 = vpop.f32.mrf.mxu2  ;;  %v3622_v20 = vld [vmem:[#allocation4] sm:$0xff] }
 0x5a3   : > { %2976 = vst.msk [vmem:[#allocation4 + $0x8] sm:$0xff] %vm452_vm2, %v2969_v48  ;;  %v3207_v63 = vrot.slane %v3622_v20, 4  ;;  %v7409_v44 = vld [vmem:[#allocation4 + $0x1a] sm:$0xff] }
 0x5a4   : > { %v3111_v17 = vpop.f32.mrf.mxu0 }
 0x5a5   : > { %3121 = vst.msk [vmem:[#allocation4 + $0x30] sm:$0xff] %vm452_vm2, %v3111_v17 }
 0x5a8   : > { %v7396_v11 = vld [vmem:[#allocation4 + $0x22] sm:$0xff] }
 0x5a9   : > { %4297 = vrot.lane.b32.xlu1 %v7394_v31, %s5438_s28  ;;  %4068 = vrot.lane.b32.xlu0 %v7394_v31, %s5437_s27  ;;  %v7411_v49 = vld [vmem:[#allocation4 + $0x21] sm:$0xff] }
 0x5aa   : > { %4725 = vrot.lane.b32.xlu2 %v7396_v11, %s5437_s27  ;;  %v2972_v62 = vpop.f32.mrf.mxu2  ;;  %v3623_v19 = vld [vmem:[#allocation4 + $0x8] sm:$0xff] }
 0x5ab   : > { %2977 = vst.msk [vmem:[#allocation4 + $0x10] sm:$0x3] %vm455_vm3, %v2972_v62  ;;  %v4932_v24 = vld [vmem:[#allocation4 + $0x2] sm:$0xff]  ;;  %v3263_v58 = vrot.slane %v3623_v19, 4 }
 0x5ac   : > { %v3114_v6 = vpop.f32.mrf.mxu0  ;;  %v3626_v14 = vld [vmem:[#allocation4 + $0x30] sm:$0xff]  ;;  %v4516_v36 = vrot.slane %v4932_v24, 4  ;;  %v7460_v10 = vld [vmem:[#allocation4 + $0x1] sm:$0xff] }
 0x5ad   : > { %3122 = vst.msk [vmem:[#allocation4 + $0x38] sm:$0xff] %vm452_vm2, %v3114_v6  ;;  %v3205_v42 = vrot.slane %v3626_v14, 4  ;;  %v7407_v45 = vsel %vm678_vm4, %v3626_v14, %v3207_v63 }
 0x5ae   : > { %v3216_v32 = vperm.slane %v7407_v45, %v9186_v57 }
 0x5af   : > { %v7414_v15 = vsel %vm678_vm4, %v3205_v42, %v3622_v20 }
 0x5b0   : > { %v7512_v1 = vperm.slane %v7414_v15, %v9186_v57  ;;  %v3243_v52 = vrot.slane %v3216_v32, 4 }
 0x5b1   : > { %4952 = vrot.lane.b32.xlu0 %v7409_v44, %s5438_s28  ;;  %3638 = vrot.lane.b32.xlu1 %v3622_v20, %s5438_s28 }
 0x5b2   : > { %4299 = vrot.lane.b32.xlu2 %v7411_v49, %s5438_s28  ;;  %v3149_v23 = vpop.f32.mrf.mxu2  ;;  %v4278_v34 = vld [vmem:[#allocation4 + $0x9] sm:$0xff]  ;;  %v3231_v48 = vrot.slane %v7512_v1, 4 }
 0x5b3   : > { %v3917_v61 = vrot.slane %v4278_v34, 4  ;;  %v7469_v37 = vld [vmem:[#allocation4 + $0xa] sm:$0xff] }
 0x5b4   : > { %v3117_v29 = vpop.f32.mrf.mxu0  ;;  %v3627_v55 = vld [vmem:[#allocation4 + $0x38] sm:$0xff] }
 0x5b5   : > { %v4936_v33 = vld [vmem:[#allocation4 + $0x32] sm:$0xff]  ;;  %3123 = vst.msk [vmem:[#allocation4 + $0x40] sm:$0x3] %vm455_vm3, %v3117_v29  ;;  %v3261_v51 = vrot.slane %v3627_v55, 4  ;;  %v7423_v28 = vsel %vm678_vm4, %v3627_v55, %v3263_v58  ;;  %v3275_v58 = vrot.slane %v7385_v5, 4 }
 0x5b6   : > { %v4514_v2 = vrot.slane %v4936_v33, 4  ;;  %v7426_v43 = vsel %vm678_vm4, %v4936_v33, %v4516_v36  ;;  %v7485_v38 = vld [vmem:[#allocation4 + $0x31] sm:$0xff] }
 0x5b7   : > { %v7429_v21 = vsel %vm678_vm4, %v3261_v51, %v3623_v19 }
 0x5b8   : > { %v7432_v26 = vsel %vm678_vm4, %v4514_v2, %v4932_v24  ;;  %v7558_v2 = vperm.slane %v7429_v21, %v9186_v57  ;;  %v3873_v21 = vrot.slane %v7394_v31, 4 }
 0x5b9   : > { %4723 = vrot.lane.b32.xlu0 %v7409_v44, %s5437_s27  ;;  %4070 = vrot.lane.b32.xlu1 %v7411_v49, %s5437_s27 }
 0x5ba   : > { %3640 = vrot.lane.b32.xlu2 %v3623_v19, %s5438_s28  ;;  %v3152_v35 = vpop.f32.mrf.mxu2 }
 0x5bb   : > { %3181 = vmatpush.msra.mxu3 %v3152_v35 }
 0x5bc   : > { %v4053_v27 = vld [vmem:[#allocation4 + $0x39] sm:$0xff] }
 0x5bd   : > { %3182 = vmatpush.msra.mxu3 %v3149_v23  ;;  %v3915_v18 = vrot.slane %v4053_v27, 4  ;;  %v7440_v9 = vsel %vm678_vm4, %v4053_v27, %v3917_v61  ;;  %v7477_v7 = vld [vmem:[#allocation4 + $0x3a] sm:$0xff]  ;;  %v3859_v61 = vrot.slane %v7485_v38, 4 }
 0x5be   : > { %5395 = vmatmul.msk.f32.vlgmr.msra.gmra.mxu3 %vm384_vm0, %v7341_v53 }
 0x5bf   : > { %v7445_v25 = vsel %vm678_vm4, %v3915_v18, %v4278_v34 }
 0x5c1   : > { %4954 = vrot.lane.b32.xlu1 %v7396_v11, %s5438_s28  ;;  %3409 = vrot.lane.b32.xlu0 %v3622_v20, %s5437_s27 }
 0x5c2   : > { %4948 = vrot.lane.b32.xlu2 %v4932_v24, %s5438_s28 }
 0x5c6   : > { %5396 = vmatmul.msk.f32.gmra.mxu3 %vm384_vm0, %v7350_v13 }
 0x5c9   : > { %4719 = vrot.lane.b32.xlu0 %v4932_v24, %s5437_s27  ;;  %3411 = vrot.lane.b32.xlu1 %v3623_v19, %s5437_s27 }
 0x5ca   : > { %3646 = vrot.lane.b32.xlu2 %v3626_v14, %s5438_s28 }
 0x5ce   : > { %5397 = vmatmul.msk.f32.gmra.mxu3 %vm384_vm0, %v3157_v59 }
 0x5d1   : > { %4064 = vrot.lane.b32.xlu1 %v7460_v10, %s5437_s27  ;;  %4295 = vrot.lane.b32.xlu0 %v4278_v34, %s5438_s28 }
 0x5d2   : > { %4066 = vrot.lane.b32.xlu2 %v4278_v34, %s5437_s27 }
 0x5d9   : > { %4293 = vrot.lane.b32.xlu1 %v7460_v10, %s5438_s28  ;;  %3648 = vrot.lane.b32.xlu0 %v3627_v55, %s5438_s28 }
 0x5da   : > { %4950 = vrot.lane.b32.xlu2 %v7469_v37, %s5438_s28 }
 0x5e1   : > { %3417 = vrot.lane.b32.xlu1 %v3626_v14, %s5437_s27  ;;  %4074 = vrot.lane.b32.xlu0 %v4053_v27, %s5437_s27 }
 0x5e2   : > { %4721 = vrot.lane.b32.xlu2 %v7469_v37, %s5437_s27 }
 0x5e9   : > { %4956 = vrot.lane.b32.xlu1 %v4936_v33, %s5438_s28  ;;  %4729 = vrot.lane.b32.xlu0 %v7477_v7, %s5437_s27 }
 0x5ea   : > { %3419 = vrot.lane.b32.xlu2 %v3627_v55, %s5437_s27 }
 0x5f1   : > { %4727 = vrot.lane.b32.xlu1 %v4936_v33, %s5437_s27  ;;  %4303 = vrot.lane.b32.xlu0 %v4053_v27, %s5438_s28 }
 0x5f2   : > { %4072 = vrot.lane.b32.xlu2 %v7485_v38, %s5437_s27 }
 0x5f3   : > { %v7493_v16 = vpop.permute.xlu2 %3413 }
 0x5fa   : > { %4301 = vrot.lane.b32.xlu2 %v7485_v38, %s5438_s28 }
 0x602   : > { %4958 = vrot.lane.b32.xlu2 %v7477_v7, %s5438_s28 }
 0x604   : > { %v7495_v3 = vpop.permute.xlu2 %4725 }
 0x60b   : > { %v7500_v4 = vpop.permute.xlu0 %3642 }
 0x60c   : > { %v7497_v39 = vpop.permute.xlu2 %4299 }
 0x60d   : > { %9188 = vst [vmem:[#allocation21_spill] sm:$0xff] %v7497_v39 }
 0x613   : > { %v7524_v17 = vpop.permute.xlu1 %3644  ;;  %v7526_v20 = vpop.permute.xlu0 %3415 }
 0x614   : > { %v7514_v60 = vpop.permute.xlu2 %3640 }
 0x61b   : > { %v7544_v19 = vpop.permute.xlu1 %4297  ;;  %v7546_v24 = vpop.permute.xlu0 %4068 }
 0x61c   : > { %v7540_v42 = vpop.permute.xlu2 %4948 }
 0x624   : > { %v7563_v35 = vpop.permute.xlu2 %3646 }
 0x641   : > { %v3184_v8 = vpop.f32.mrf.mxu3 }
 0x642   : > { %3194 = vst.msk [vmem:[#allocation4 + $0x48] sm:$0xff] %vm452_vm2, %v3184_v8  ;;  %v3287_v8 = vrot.slane %v7558_v2, 4 }
 0x649   : > { %v3187_v50 = vpop.f32.mrf.mxu3  ;;  %v3628_v53 = vld [vmem:[#allocation4 + $0x48] sm:$0xff] }
 0x64a   : > { %3195 = vst.msk [vmem:[#allocation4 + $0x50] sm:$0xff] %vm452_vm2, %v3187_v50  ;;  %3650 = vrot.lane.b32.xlu1 %v3628_v53, %s5438_s28  ;;  %3421 = vrot.lane.b32.xlu0 %v3628_v53, %s5437_s27  ;;  %v3220_v40 = vsel %vm678_vm4, %v3628_v53, %v3219_v56  ;;  %v3217_v13 = vrot.slane %v3628_v53, 4  ;;  %v7576_v56 = vpop.permute.xlu0 %4952  ;;  %v7578_v50 = vpop.permute.xlu1 %3638  ;;  %v3860_v53 = vsel %vm678_vm4, %v3859_v61, %v7460_v10 }
 0x64b   : > { %v3228_v12 = vperm.slane %v3220_v40, %v9186_v57 }
 0x64c   : > { %v3218_v0 = vsel %vm678_vm4, %v3217_v13, %v7377_v46 }
 0x64d   : > { %v3241_v41 = vrot.slane %v3228_v12, 4  ;;  %v3244_v54 = vsel %vm678_vm4, %v3228_v12, %v3243_v52  ;;  %v7520_v30 = vperm.slane %v3218_v0, %v9186_v57  ;;  %v7588_v12 = vperm.slane %v7423_v28, %v9186_v57 }
 0x64e   : > { %v7530_v63 = vperm.slane %v3244_v54, %v9187_v22 }
 0x64f   : > { %v3242_v47 = vsel %vm678_vm4, %v3241_v41, %v3216_v32  ;;  %v3232_v6 = vsel %vm678_vm4, %v7520_v30, %v3231_v48  ;;  %v7595_v41 = vperm.slane %v3860_v53, %v9186_v57  ;;  %v3861_v48 = vrot.slane %v7460_v10, 4 }
 0x650   : > { %v3248_v62 = vperm.slane %v3242_v47, %v9187_v22  ;;  %v3240_v14 = vperm.slane %v3232_v6, %v9187_v22  ;;  %v3229_v61 = vrot.slane %v7520_v30, 4 }
 0x651   : > { %v3190_v46 = vpop.f32.mrf.mxu3  ;;  %v3400_v45 = vld [vmem:[#allocation4 + $0x50] sm:$0xff]  ;;  %v3885_v6 = vrot.slane %v7595_v41, 4 }
 0x652   : > { %3196 = vst.msk [vmem:[#allocation4 + $0x58] sm:$0x3] %vm455_vm3, %v3190_v46  ;;  %3330 = vrot.lane.b32.xlu1 %v3248_v62, %s5443_s11  ;;  %3338 = vrot.lane.b32.xlu0 %v7530_v63, %s5442_s30  ;;  %v7542_v15 = vld [vmem:[#allocation4 + $0x4a] sm:$0xff]  ;;  %v3273_v23 = vrot.slane %v3400_v45, 4  ;;  %v3276_v29 = vsel %vm678_vm4, %v3400_v45, %v3275_v58  ;;  %v3255_v55 = vrot.slane %v3240_v14, 4  ;;  %v3257_v51 = vrot.slane %v3248_v62, 4  ;;  %v7607_v62 = vpop.permute.xlu2 %4066  ;;  %v7629_v58 = vpop.permute.xlu1 %4070 }
 0x653   : > { %3322 = vrot.lane.b32.xlu2 %v3240_v14, %s5441_s29  ;;  %v4054_v36 = vld [vmem:[#allocation4 + $0x49] sm:$0xff]  ;;  %v7561_v34 = vperm.slane %v3276_v29, %v9186_v57  ;;  %9189 = vst [vmem:[#allocation7_spill] sm:$0xff] %v7607_v62  ;;  %v3862_v46 = vsel %vm678_vm4, %v7485_v38, %v3861_v48  ;;  %v4570_v29 = vrot.slane %v7477_v7, 4  ;;  %v3230_v30 = vsel %vm678_vm4, %v3229_v61, %v7512_v1 }
 0x654   : > { %v3274_v33 = vsel %vm678_vm4, %v3273_v23, %v7385_v5  ;;  %v3256_v27 = vsel %vm678_vm4, 0.0, %v3255_v55  ;;  %v3871_v5 = vrot.slane %v4054_v36, 4  ;;  %v3258_v59 = vsel %vm678_vm4, 0.0, %v3257_v51  ;;  %v7627_v23 = vpop.permute.xlu0 %4723  ;;  %9190 = vst [vmem:[#allocation35_spill] sm:$0xff] %v7629_v58 }
 0x655   : > { %v7568_v18 = vperm.slane %v3274_v33, %v9186_v57  ;;  %v3297_v32 = vrot.slane %v7561_v34, 4  ;;  %v3874_v40 = vsel %vm678_vm4, %v4054_v36, %v3873_v21  ;;  %v4528_v33 = vrot.slane %v7409_v44, 4 }
 0x656   : > { %v3872_v52 = vsel %vm678_vm4, %v3871_v5, %v7394_v31  ;;  %v7598_v54 = vperm.slane %v3874_v40, %v9186_v57  ;;  %v4571_v5 = vsel %vm678_vm4, %v4570_v29, %v7469_v37 }
 0x657   : > { %v3288_v13 = vsel %vm678_vm4, %v7568_v18, %v3287_v8  ;;  %v3298_v0 = vsel %vm678_vm4, %v3297_v32, %v7588_v12  ;;  %v7605_v28 = vperm.slane %v3872_v52, %v9186_v57  ;;  %v4577_v32 = vperm.slane %v4571_v5, %v9186_v57 }
 0x658   : > { %v7601_v47 = vperm.slane %v3288_v13, %v9187_v22  ;;  %v7614_v31 = vperm.slane %v3298_v0, %v9187_v22  ;;  %v3895_v10 = vrot.slane %v7598_v54, 4  ;;  %v7669_v0 = vperm.slane %v3230_v30, %v9187_v22 }
 0x659   : > { %v3886_v14 = vsel %vm678_vm4, %v7605_v28, %v3885_v6  ;;  %v7678_v6 = vld [vmem:[#allocation4 + $0x51] sm:$0xff]  ;;  %v7703_v30 = vperm.slane %v7432_v26, %v9186_v57 }
 0x65a   : > { %3423 = vrot.lane.b32.xlu1 %v3400_v45, %s5437_s27  ;;  %4960 = vrot.lane.b32.xlu0 %v7542_v15, %s5438_s28  ;;  %v7635_v55 = vperm.slane %v3886_v14, %v9187_v22  ;;  %v7649_v21 = vpop.permute.xlu2 %4950  ;;  %v7663_v40 = vpop.permute.xlu1 %4954  ;;  %v4526_v14 = vrot.slane %v7542_v15, 4  ;;  %v3313_v26 = vrot.slane %v7614_v31, 4 }
 0x65b   : > { %3652 = vrot.lane.b32.xlu2 %v3400_v45, %s5438_s28  ;;  %v7625_v45 = vperm.slane %v3862_v46, %v9186_v57  ;;  %9191 = vst [vmem:[#allocation33_spill] sm:$0xff] %v7649_v21  ;;  %v4596_v46 = vrot.slane %v4577_v32, 4 }
 0x65c   : > { %9192 = vst [vmem:[#allocation29_spill] sm:$0xff] %v7663_v40  ;;  %v7665_v13 = vpop.permute.xlu0 %3409 }
 0x65d   : > { %v3896_v38 = vsel %vm678_vm4, %v3895_v10, %v7625_v45  ;;  %v4525_v10 = vperm.slane %v7426_v43, %v9186_v57 }
 0x65e   : > { %v7642_v51 = vperm.slane %v3896_v38, %v9187_v22 }
 0x662   : > { %4076 = vrot.lane.b32.xlu1 %v4054_v36, %s5437_s27  ;;  %3326 = vrot.lane.b32.xlu0 %v3256_v27, %s5444_s12  ;;  %v4529_v27 = vsel %vm678_vm4, %v7542_v15, %v4528_v33  ;;  %v3253_v33 = vrot.slane %v7669_v0, 4 }
 0x663   : > { %3334 = vrot.lane.b32.xlu2 %v3258_v59, %s5445_s15  ;;  %v3259_v59 = vrot.slane %v7530_v63, 4  ;;  %v7657_v8 = vperm.slane %v4529_v27, %v9186_v57  ;;  %v7690_v27 = vpop.permute.xlu2 %4721 }
 0x665   : > { %v3260_v52 = vsel %vm678_vm4, 0.0, %v3259_v59  ;;  %v4550_v63 = vrot.slane %v7657_v8, 4  ;;  %v4527_v59 = vsel %vm678_vm4, %v4526_v14, %v7409_v44  ;;  %v3929_v14 = vrot.slane %v7411_v49, 4 }
 0x667   : > { %v4551_v61 = vsel %vm678_vm4, %v4550_v63, %v4525_v10  ;;  %v7714_v63 = vperm.slane %v4527_v59, %v9186_v57 }
 0x668   : > { %v7696_v43 = vperm.slane %v4551_v61, %v9187_v22 }
 0x66a   : > { %4731 = vrot.lane.b32.xlu1 %v7542_v15, %s5437_s27  ;;  %3350 = vrot.lane.b32.xlu0 %v7601_v47, %s5441_s29  ;;  %v3254_v15 = vsel %vm678_vm4, 0.0, %v3253_v33  ;;  %v3897_v33 = vrot.slane %v7625_v45, 4 }
 0x66b   : > { %3358 = vrot.lane.b32.xlu2 %v7614_v31, %s5443_s11  ;;  %v3930_v31 = vsel %vm678_vm4, %v7678_v6, %v3929_v14 }
 0x672   : > { %4305 = vrot.lane.b32.xlu1 %v4054_v36, %s5438_s28  ;;  %3976 = vrot.lane.b32.xlu0 %v7635_v55, %s5441_s29  ;;  %v7653_v36 = vld [vmem:[#allocation4 + $0x52] sm:$0xff] }
 0x673   : > { %3984 = vrot.lane.b32.xlu2 %v7642_v51, %s5443_s11  ;;  %v4582_v53 = vrot.slane %v7653_v36, 4 }
 0x675   : > { %v4583_v48 = vsel %vm678_vm4, %v4582_v53, %v7396_v11  ;;  %v7705_v53 = vpop.permute.xlu0 %4719 }
 0x676   : > { %v4589_v1 = vperm.slane %v4583_v48, %v9186_v57  ;;  %v4540_v48 = vrot.slane %v7703_v30, 4 }
 0x678   : > { %v7686_v38 = vsel %vm678_vm4, %v4589_v1, %v4596_v46  ;;  %v4594_v29 = vrot.slane %v4589_v1, 4  ;;  %v4541_v1 = vsel %vm678_vm4, %v7714_v63, %v4540_v48  ;;  %v7724_v46 = vpop.permute.xlu2 %3419 }
 0x67a   : > { %3342 = vrot.lane.b32.xlu1 %v3260_v52, %s5446_s16  ;;  %4733 = vrot.lane.b32.xlu0 %v7653_v36, %s5437_s27  ;;  %v7693_v5 = vsel %vm678_vm4, %v4594_v29, %v4577_v32  ;;  %v7707_v52 = vpop.permute.xlu1 %3411  ;;  %v3299_v32 = vrot.slane %v7588_v12, 4  ;;  %v3314_v29 = vsel %vm678_vm4, 0.0, %v3313_v26 }
 0x67b   : > { %4078 = vrot.lane.b32.xlu2 %v7678_v6, %s5437_s27 }
 0x67c   : > { %v3300_v44 = vsel %vm678_vm4, %v7561_v34, %v3299_v32  ;;  %v7732_v34 = vperm.slane %v4541_v1, %v9187_v22  ;;  %v3911_v32 = vrot.slane %v7642_v51, 4  ;;  %v4584_v1 = vrot.slane %v7396_v11, 4 }
 0x67d   : > { %v3308_v12 = vperm.slane %v3300_v44, %v9187_v22  ;;  %v7739_v59 = vpop.permute.xlu0 %4295  ;;  %v3938_v44 = vperm.slane %v3930_v31, %v9186_v57  ;;  %v4552_v31 = vrot.slane %v4525_v10, 4 }
 0x67e   : > { %9193 = vst [vmem:[#allocation15_spill] sm:$0xff] %v7739_v59  ;;  %v3912_v45 = vsel %vm678_vm4, 0.0, %v3911_v32  ;;  %v3435_v59 = vrot.slane %v7665_v13, 4 }
 0x67f   : > { %v3315_v26 = vrot.slane %v3308_v12, 4  ;;  %v3951_v14 = vrot.slane %v3938_v44, 4  ;;  %v4553_v11 = vsel %vm678_vm4, %v7657_v8, %v4552_v31 }
 0x680   : > { %v7770_v10 = vperm.slane %v4553_v11, %v9187_v22  ;;  %v3927_v11 = vrot.slane %v7678_v6, 4 }
 0x681   : > { %v3316_v51 = vsel %vm678_vm4, 0.0, %v3315_v26 }
 0x682   : > { %3318 = vrot.lane.b32.xlu1 %v3254_v15, %s5447_s17  ;;  %4639 = vrot.lane.b32.xlu0 %v7696_v43, %s5443_s11  ;;  %v7737_v61 = vpop.permute.xlu1 %4064  ;;  %v3898_v15 = vsel %vm678_vm4, %v7598_v54, %v3897_v33  ;;  %v4585_v54 = vsel %vm678_vm4, %v7653_v36, %v4584_v1  ;;  %9195 = vst [vmem:[#allocation28_spill] sm:$0xff] %v7770_v10 }
 0x683   : > { %4962 = vrot.lane.b32.xlu2 %v7653_v36, %s5438_s28  ;;  %v3906_v48 = vperm.slane %v3898_v15, %v9187_v22  ;;  %v4593_v15 = vperm.slane %v4585_v54, %v9186_v57  ;;  %v4572_v36 = vrot.slane %v7469_v37, 4  ;;  %v3285_v54 = vrot.slane %v7568_v18, 4 }
 0x685   : > { %v3913_v26 = vrot.slane %v3906_v48, 4  ;;  %v4573_v8 = vsel %vm678_vm4, %v7477_v7, %v4572_v36  ;;  %v4606_v1 = vrot.slane %v4593_v15, 4 }
 0x686   : > { %v4581_v37 = vperm.slane %v4573_v8, %v9186_v57 }
 0x688   : > { %v4607_v7 = vsel %vm678_vm4, %v4606_v1, %v4581_v37  ;;  %v4608_v1 = vrot.slane %v4581_v37, 4 }
 0x689   : > { %v7796_v8 = vperm.slane %v4607_v7, %v9187_v22 }
 0x68a   : > { %3366 = vrot.lane.b32.xlu1 %v3308_v12, %s5442_s30  ;;  %3362 = vrot.lane.b32.xlu0 %v3314_v29, %s5445_s15  ;;  %v7750_v29 = vpop.permute.xlu2 %4072  ;;  %v3926_v12 = vperm.slane %v7440_v9, %v9186_v57  ;;  %v7764_v32 = vpop.permute.xlu1 %4293  ;;  %v4609_v7 = vsel %vm678_vm4, %v4593_v15, %v4608_v1 }
 0x68b   : > { %4631 = vrot.lane.b32.xlu2 %v7732_v34, %s5441_s29  ;;  %9194 = vst [vmem:[#allocation31_spill] sm:$0xff] %v7764_v32 }
 0x68c   : > { %v3952_v33 = vsel %vm678_vm4, %v3951_v14, %v3926_v12  ;;  %v3914_v14 = vsel %vm678_vm4, 0.0, %v3913_v26 }
 0x68d   : > { %v7773_v9 = vperm.slane %v3952_v33, %v9187_v22  ;;  %v4566_v33 = vrot.slane %v7696_v43, 4 }
 0x68f   : > { %v4567_v43 = vsel %vm678_vm4, 0.0, %v4566_v33 }
 0x692   : > { %3992 = vrot.lane.b32.xlu1 %v3906_v48, %s5442_s30  ;;  %3988 = vrot.lane.b32.xlu0 %v3912_v45, %s5445_s15  ;;  %v7766_v45 = vpop.permute.xlu0 %3648  ;;  %v7783_v48 = vpop.permute.xlu2 %4301 }
 0x693   : > { %3370 = vrot.lane.b32.xlu2 %v3316_v51, %s5446_s16  ;;  %9196 = vst [vmem:[#allocation22_spill] sm:$0xff] %v7783_v48  ;;  %v3953_v51 = vrot.slane %v3926_v12, 4  ;;  %v7791_v36 = vpop.permute.xlu1 %3417  ;;  %v3928_v12 = vsel %vm678_vm4, %v3927_v11, %v7411_v49 }
 0x695   : > { %v3954_v31 = vsel %vm678_vm4, %v3938_v44, %v3953_v51 }
 0x696   : > { %v3962_v18 = vperm.slane %v3954_v31, %v9187_v22  ;;  %v3934_v31 = vperm.slane %v3928_v12, %v9186_v57  ;;  %v3922_v12 = vperm.slane %v7445_v25, %v9186_v57  ;;  %v4538_v25 = vrot.slane %v7714_v63, 4 }
 0x698   : > { %v3969_v51 = vrot.slane %v3962_v18, 4  ;;  %v3939_v15 = vrot.slane %v3934_v31, 4 }
 0x69a   : > { %4647 = vrot.lane.b32.xlu1 %v7770_v10, %s5442_s30  ;;  %4012 = vrot.lane.b32.xlu0 %v7773_v9, %s5443_s11  ;;  %v7793_v26 = vpop.permute.xlu0 %4074  ;;  %v3970_v11 = vsel %vm678_vm4, 0.0, %v3969_v51  ;;  %v3940_v51 = vsel %vm678_vm4, %v3939_v15, %v3922_v12  ;;  %v3664_v10 = vrot.slane %v7578_v50, 4 }
 0x69b   : > { %3996 = vrot.lane.b32.xlu2 %v3914_v14, %s5446_s16  ;;  %9197 = vst [vmem:[#allocation17_spill] sm:$0xff] %v7793_v26  ;;  %v3286_v14 = vsel %vm678_vm4, %v3285_v54, %v7558_v2  ;;  %v3883_v2 = vrot.slane %v7605_v28, 4  ;;  %v3311_v54 = vrot.slane %v7601_v47, 4  ;;  %v7824_v28 = vperm.slane %v4609_v7, %v9187_v22  ;;  %v7826_v47 = vpop.permute.xlu1 %4956 }
 0x69c   : > { %v7807_v44 = vperm.slane %v3286_v14, %v9187_v22 }
 0x69d   : > { %v3884_v14 = vsel %vm678_vm4, %v3883_v2, %v7595_v41  ;;  %v3312_v49 = vsel %vm678_vm4, 0.0, %v3311_v54  ;;  %v3909_v2 = vrot.slane %v7635_v55, 4  ;;  %v4624_v1 = vrot.slane %v7824_v28, 4 }
 0x69e   : > { %v3309_v33 = vrot.slane %v7807_v44, 4  ;;  %v7834_v41 = vperm.slane %v3884_v14, %v9187_v22 }
 0x69f   : > { %v4625_v14 = vsel %vm678_vm4, 0.0, %v4624_v1 }
 0x6a0   : > { %9199 = vst [vmem:[#allocation10_spill] sm:$0xff] %v7834_v41  ;;  %v3907_v7 = vrot.slane %v7834_v41, 4 }
 0x6a2   : > { %4307 = vrot.lane.b32.xlu1 %v7678_v6, %s5438_s28  ;;  %4667 = vrot.lane.b32.xlu0 %v7796_v8, %s5443_s11  ;;  %v7814_v6 = vpop.permute.xlu2 %4958  ;;  %v7828_v37 = vpop.permute.xlu0 %4729  ;;  %v3908_v55 = vsel %vm678_vm4, 0.0, %v3907_v7 }
 0x6a3   : > { %4643 = vrot.lane.b32.xlu2 %v4567_v43, %s5445_s15  ;;  %9198 = vst [vmem:[#allocation26_spill] sm:$0xff] %v7814_v6  ;;  %v3310_v43 = vsel %vm678_vm4, 0.0, %v3309_v33  ;;  %v3910_v33 = vsel %vm678_vm4, 0.0, %v3909_v2  ;;  %v4564_v2 = vrot.slane %v7732_v34, 4  ;;  %v3676_v34 = vrot.slane %v7500_v4, 4 }
 0x6a5   : > { %v4565_v7 = vsel %vm678_vm4, 0.0, %v4564_v2 }
 0x6aa   : > { %3354 = vrot.lane.b32.xlu1 %v3312_v49, %s5444_s12  ;;  %4024 = vrot.lane.b32.xlu0 %v3970_v11, %s5446_s16  ;;  %v7848_v49 = vperm.slane %v3940_v51, %v9187_v22  ;;  %v7854_v11 = vpop.permute.xlu1 %4727  ;;  %v7856_v15 = vpop.permute.xlu0 %4303 }
 0x6ab   : > { %3346 = vrot.lane.b32.xlu2 %v3310_v43, %s5447_s17  ;;  %9201 = vst [vmem:[#allocation12_spill] sm:$0xff] %v7856_v15  ;;  %v3433_v43 = vrot.slane %v7791_v36, 4 }
 0x6ac   : > { %9200 = vst [vmem:[#allocation14_spill] sm:$0xff] %v7848_v49  ;;  %v3963_v1 = vrot.slane %v7848_v49, 4 }
 0x6ad   : > { %v7841_v54 = vpop.permute.xlu2 %3322  ;;  %v3434_v63 = vsel %vm678_vm4, %v3433_v43, %v7665_v13 }
 0x6b2   : > { %3980 = vrot.lane.b32.xlu1 %v3910_v33, %s5444_s12  ;;  %4679 = vrot.lane.b32.xlu0 %v4625_v14, %s5446_s16  ;;  %v4539_v33 = vsel %vm678_vm4, %v4538_v25, %v7703_v30  ;;  %v3964_v14 = vsel %vm678_vm4, 0.0, %v3963_v1  ;;  %v7878_v30 = vperm.slane %v3434_v63, %v9186_v57 }
 0x6b3   : > { %3972 = vrot.lane.b32.xlu2 %v3908_v55, %s5447_s17  ;;  %v7871_v55 = vperm.slane %v4539_v33, %v9187_v22 }
 0x6b4   : > { %v3459_v63 = vrot.slane %v7878_v30, 4 }
 0x6b5   : > { %v7862_v51 = vpop.permute.xlu2 %3652  ;;  %9202 = vst [vmem:[#allocation16_spill] sm:$0xff] %v7871_v55  ;;  %v4562_v33 = vrot.slane %v7871_v55, 4 }
 0x6b7   : > { %v4563_v15 = vsel %vm678_vm4, 0.0, %v4562_v33 }
 0x6ba   : > { %4635 = vrot.lane.b32.xlu1 %v4565_v7, %s5444_s12  ;;  %4000 = vrot.lane.b32.xlu0 %v3964_v14, %s5447_s17  ;;  %v3941_v7 = vrot.slane %v3922_v12, 4  ;;  %v3665_v14 = vsel %vm678_vm4, %v7563_v35, %v3664_v10  ;;  %v4605_v12 = vperm.slane %v7686_v38, %v9187_v22 }
 0x6bb   : > { %4020 = vrot.lane.b32.xlu2 %v3962_v18, %s5442_s30 }
 0x6bc   : > { %v3651_v25 = vpop.permute.xlu1 %3650  ;;  %v3422_v43 = vpop.permute.xlu0 %3421 }
 0x6bd   : > { %v3677_v2 = vsel %vm678_vm4, %v3651_v25, %v3676_v34  ;;  %v3445_v1 = vrot.slane %v3422_v43, 4  ;;  %v7883_v40 = vpop.permute.xlu2 %3334  ;;  %v3942_v34 = vsel %vm678_vm4, %v3934_v31, %v3941_v7  ;;  %v3674_v49 = vrot.slane %v3651_v25, 4 }
 0x6be   : > { %v3685_v18 = vperm.slane %v3677_v2, %v9186_v57  ;;  %v3447_v2 = vrot.slane %v7493_v16, 4 }
 0x6bf   : > { %v3446_v21 = vsel %vm678_vm4, %v3445_v1, %v7493_v16  ;;  %v3673_v1 = vperm.slane %v3665_v14, %v9186_v57 }
 0x6c0   : > { %v7892_v6 = vperm.slane %v3446_v21, %v9186_v57  ;;  %v3950_v21 = vperm.slane %v3942_v34, %v9187_v22  ;;  %v3698_v31 = vrot.slane %v3685_v18, 4  ;;  %v3448_v38 = vsel %vm678_vm4, %v3422_v43, %v3447_v2 }
 0x6c1   : > { %v3700_v14 = vrot.slane %v3673_v1, 4  ;;  %v3436_v2 = vsel %vm678_vm4, %v7791_v36, %v3435_v59  ;;  %v3662_v36 = vrot.slane %v7563_v35, 4 }
 0x6c2   : > { %4627 = vrot.lane.b32.xlu1 %v4563_v15, %s5447_s17  ;;  %v3460_v10 = vsel %vm678_vm4, %v7892_v6, %v3459_v63  ;;  %v3965_v63 = vrot.slane %v3950_v21, 4  ;;  %v3699_v34 = vsel %vm678_vm4, %v3698_v31, %v3673_v1  ;;  %v3675_v31 = vsel %vm678_vm4, %v3674_v49, %v7500_v4 }
 0x6c3   : > { %v7903_v39 = vperm.slane %v3460_v10, %v9187_v22  ;;  %4659 = vrot.lane.b32.xlu2 %v4605_v12, %s5441_s29  ;;  %v3701_v16 = vsel %vm678_vm4, %v3685_v18, %v3700_v14  ;;  %v7920_v10 = vperm.slane %v3448_v38, %v9186_v57  ;;  %v7927_v43 = vperm.slane %v3699_v34, %v9187_v22 }
 0x6c4   : > { %v7908_v33 = vpop.permute.xlu1 %3330  ;;  %v7910_v15 = vpop.permute.xlu0 %3338  ;;  %v3966_v55 = vsel %vm678_vm4, 0.0, %v3965_v63  ;;  %v7937_v13 = vperm.slane %v3701_v16, %v9187_v22  ;;  %v7950_v38 = vperm.slane %v3436_v2, %v9186_v57  ;;  %v4620_v14 = vrot.slane %v4605_v12, 4 }
 0x6c5   : > { %3550 = vrot.lane.b32.xlu0 %v7903_v39, %s5441_s29  ;;  %v7915_v7 = vpop.permute.xlu2 %3358  ;;  %v3469_v25 = vrot.slane %v7920_v10, 4  ;;  %v7956_v16 = vperm.slane %v3675_v31, %v9186_v57  ;;  %v3663_v49 = vsel %vm678_vm4, %v3662_v36, %v7578_v50  ;;  %v4158_v2 = vrot.slane %v7629_v58, 4 }
 0x6c6   : > { %v3716_v63 = vrot.slane %v7937_v13, 4  ;;  %v4621_v12 = vsel %vm678_vm4, 0.0, %v4620_v14  ;;  %v7987_v58 = vperm.slane %v3663_v49, %v9186_v57 }
 0x6c7   : > { %v3470_v4 = vsel %vm678_vm4, %v3469_v25, %v7950_v38  ;;  %v3686_v36 = vrot.slane %v7956_v16, 4 }
 0x6ca   : > { %4675 = vrot.lane.b32.xlu1 %v7824_v28, %s5442_s30  ;;  %v4088_v28 = vrot.slane %v7750_v29, 4 }
 0x6cb   : > { %4008 = vrot.lane.b32.xlu2 %v3966_v55, %s5444_s12  ;;  %v4146_v55 = vrot.slane %v7607_v62, 4 }
 0x6cc   : > { %v7932_v18 = vpop.permute.xlu1 %3423  ;;  %v7934_v1 = vpop.permute.xlu0 %4960  ;;  %v4089_v35 = vsel %vm678_vm4, %v4088_v28, %v7737_v61  ;;  %v3717_v28 = vsel %vm678_vm4, 0.0, %v3716_v63 }
 0x6cd   : > { %3787 = vrot.lane.b32.xlu0 %v7927_v43, %s5443_s11  ;;  %v7945_v59 = vpop.permute.xlu2 %3984  ;;  %v4147_v34 = vsel %vm678_vm4, %v7793_v26, %v4146_v55  ;;  %v4095_v50 = vperm.slane %v4089_v35, %v9186_v57  ;;  %v4622_v35 = vrot.slane %v7796_v8, 4 }
 0x6ce   : > { %9203 = vst [vmem:[#allocation20_spill] sm:$0xff] %v7945_v59  ;;  %v7968_v55 = vperm.slane %v4147_v34, %v9186_v57  ;;  %v3967_v34 = vrot.slane %v7773_v9, 4 }
 0x6cf   : > { %v4114_v59 = vrot.slane %v4095_v50, 4 }
 0x6d0   : > { %v4182_v62 = vrot.slane %v7968_v55, 4  ;;  %v3968_v49 = vsel %vm678_vm4, 0.0, %v3967_v34 }
 0x6d2   : > { %4004 = vrot.lane.b32.xlu1 %v3950_v21, %s5441_s29  ;;  %v7977_v21 = vperm.slane %v3470_v4, %v9187_v22 }
 0x6d3   : > { %4663 = vrot.lane.b32.xlu2 %v4621_v12, %s5444_s12 }
 0x6d4   : > { %v7971_v31 = vpop.permute.xlu1 %4076  ;;  %v7973_v25 = vpop.permute.xlu0 %3326  ;;  %v3485_v9 = vrot.slane %v7977_v21, 4 }
 0x6d5   : > { %v4100_v14 = vrot.slane %v7971_v31, 4  ;;  %3799 = vrot.lane.b32.xlu0 %v3717_v28, %s5446_s16  ;;  %v7984_v12 = vpop.permute.xlu2 %4078 }
 0x6d6   : > { %9204 = vst [vmem:[#allocation25_spill] sm:$0xff] %v7984_v12  ;;  %v4159_v4 = vsel %vm678_vm4, %v7984_v12, %v4158_v2  ;;  %v3687_v2 = vsel %vm678_vm4, %v3686_v36, %v7987_v58  ;;  %v3486_v36 = vsel %vm678_vm4, 0.0, %v3485_v9 }
 0x6d7   : > { %v4101_v63 = vsel %vm678_vm4, %v4100_v14, %v7546_v24  ;;  %v7997_v28 = vperm.slane %v4159_v4, %v9186_v57  ;;  %v8003_v14 = vperm.slane %v7693_v5, %v9187_v22  ;;  %v8023_v41 = vperm.slane %v3687_v2, %v9187_v22 }
 0x6d8   : > { %v4107_v26 = vperm.slane %v4101_v63, %v9186_v57  ;;  %v4623_v63 = vsel %vm678_vm4, 0.0, %v4622_v35  ;;  %v4317_v35 = vrot.slane %v7783_v48, 4 }
 0x6d9   : > { %9205 = vst [vmem:[#allocation24_spill] sm:$0xff] %v8003_v14  ;;  %v8009_v12 = vsel %vm678_vm4, %v7997_v28, %v4182_v62  ;;  %v3710_v2 = vrot.slane %v8023_v41, 4 }
 0x6da   : > { %v4112_v8 = vrot.slane %v4107_v26, 4  ;;  %9206 = vst [vmem:[#allocation23_spill] sm:$0xff] %v8009_v12  ;;  %4016 = vrot.lane.b32.xlu1 %v3968_v49, %s5445_s15  ;;  %v8014_v4 = vsel %vm678_vm4, %v4107_v26, %v4114_v59  ;;  %v3720_v49 = vrot.slane %v7514_v60, 4  ;;  %v4618_v26 = vrot.slane %v8003_v14, 4 }
 0x6db   : > { %4671 = vrot.lane.b32.xlu2 %v4623_v63, %s5445_s15  ;;  %9207 = vst [vmem:[#allocation19_spill] sm:$0xff] %v8023_v41  ;;  %v3732_v63 = vrot.slane %v7524_v17, 4 }
 0x6dc   : > { %v8017_v34 = vpop.permute.xlu1 %4731  ;;  %v8019_v5 = vpop.permute.xlu0 %3350  ;;  %v8026_v62 = vsel %vm678_vm4, %v4112_v8, %v4095_v50  ;;  %v3721_v9 = vsel %vm678_vm4, %v7766_v45, %v3720_v49  ;;  %v4318_v50 = vsel %vm678_vm4, %v4317_v35, %v7764_v32  ;;  %v4619_v12 = vsel %vm678_vm4, 0.0, %v4618_v26 }
 0x6dd   : > { %9208 = vst [vmem:[#allocation18_spill] sm:$0xff] %v8026_v62  ;;  %3562 = vrot.lane.b32.xlu0 %v3486_v36, %s5445_s15  ;;  %v8032_v59 = vpop.permute.xlu2 %4962  ;;  %v3733_v8 = vsel %vm678_vm4, %v7862_v51, %v3732_v63  ;;  %v3503_v36 = vrot.slane %v7526_v20, 4  ;;  %v8045_v14 = vperm.slane %v3721_v9, %v9186_v57  ;;  %v4799_v49 = vrot.slane %v7828_v37, 4 }
 0x6de   : > { %9209 = vst [vmem:[#allocation27_spill] sm:$0xff] %v8032_v59  ;;  %v3471_v59 = vrot.slane %v7950_v38, 4  ;;  %v4324_v41 = vperm.slane %v4318_v50, %v9186_v57  ;;  %v8052_v35 = vperm.slane %v3733_v8, %v9186_v57  ;;  %v4801_v38 = vrot.slane %v7690_v27, 4 }
 0x6df   : > { %v3504_v63 = vsel %vm678_vm4, %v7932_v18, %v3503_v36  ;;  %v3491_v36 = vrot.slane %v7707_v52, 4  ;;  %v3756_v62 = vrot.slane %v8045_v14, 4  ;;  %v4800_v48 = vsel %vm678_vm4, %v4799_v49, %v7690_v27 }
 0x6e0   : > { %v3472_v50 = vsel %vm678_vm4, %v7920_v10, %v3471_v59  ;;  %v8077_v32 = vperm.slane %v3504_v63, %v9186_v57  ;;  %v4343_v59 = vrot.slane %v4324_v41, 4 }
 0x6e1   : > { %v3492_v27 = vsel %vm678_vm4, %v7724_v46, %v3491_v36 }
 0x6e2   : > { %4655 = vrot.lane.b32.xlu1 %v4619_v12, %s5447_s17  ;;  %v3711_v12 = vsel %vm678_vm4, 0.0, %v3710_v2  ;;  %v4802_v2 = vsel %vm678_vm4, %v7828_v37, %v4801_v38  ;;  %v8089_v37 = vperm.slane %v4800_v48, %v9186_v57  ;;  %v8103_v48 = vperm.slane %v3492_v27, %v9186_v57 }
 0x6e3   : > { %3795 = vrot.lane.b32.xlu2 %v7937_v13, %s5442_s30  ;;  %v4810_v49 = vperm.slane %v4802_v2, %v9186_v57 }
 0x6e4   : > { %v8058_v26 = vpop.permute.xlu1 %4305  ;;  %v8060_v9 = vpop.permute.xlu0 %3976 }
 0x6e5   : > { %9210 = vst [vmem:[#allocation30_spill] sm:$0xff] %v8058_v26  ;;  %v4329_v8 = vrot.slane %v8058_v26, 4  ;;  %3775 = vrot.lane.b32.xlu0 %v3711_v12, %s5447_s17  ;;  %v8070_v13 = vpop.permute.xlu2 %4631  ;;  %v3757_v12 = vsel %vm678_vm4, %v8052_v35, %v3756_v62  ;;  %v3688_v26 = vrot.slane %v7987_v58, 4  ;;  %v4813_v62 = vrot.slane %v7495_v3, 4 }
 0x6e6   : > { %9211 = vst [vmem:[#allocation11_spill] sm:$0xff] %v8060_v9  ;;  %v3525_v58 = vrot.slane %v8077_v32, 4 }
 0x6e7   : > { %9212 = vst [vmem:[#allocation39_spill] sm:$0xff] %v8070_v13  ;;  %v4330_v10 = vsel %vm678_vm4, %v4329_v8, %v7544_v19  ;;  %v3480_v13 = vperm.slane %v3472_v50, %v9187_v22  ;;  %v4102_v50 = vrot.slane %v7546_v24, 4  ;;  %v8100_v8 = vperm.slane %v3757_v12, %v9187_v22 }
 0x6e8   : > { %v4336_v9 = vperm.slane %v4330_v10, %v9186_v57 }
 0x6e9   : > { %v4103_v24 = vsel %vm678_vm4, %v7971_v31, %v4102_v50 }
 0x6ea   : > { %v4341_v63 = vrot.slane %v4336_v9, 4  ;;  %3566 = vrot.lane.b32.xlu1 %v3480_v13, %s5442_s30  ;;  %v8094_v38 = vsel %vm678_vm4, %v4336_v9, %v4343_v59  ;;  %v3689_v9 = vsel %vm678_vm4, %v7956_v16, %v3688_v26  ;;  %v4180_v59 = vrot.slane %v7997_v28, 4 }
 0x6eb   : > { %9213 = vst [vmem:[#allocation13_spill] sm:$0xff] %v8094_v38  ;;  %3558 = vrot.lane.b32.xlu2 %v7977_v21, %s5443_s11  ;;  %v4825_v21 = vrot.slane %v8089_v37, 4  ;;  %v4837_v38 = vrot.slane %v4810_v49, 4  ;;  %v3697_v31 = vperm.slane %v3689_v9, %v9187_v22  ;;  %v3487_v26 = vrot.slane %v3480_v13, 4 }
 0x6ec   : > { %v8107_v36 = vpop.permute.xlu1 %3342  ;;  %v4734_v2 = vpop.permute.xlu0 %4733  ;;  %v8112_v10 = vsel %vm678_vm4, %v4341_v63, %v4324_v41  ;;  %v3526_v28 = vsel %vm678_vm4, %v3525_v58, %v8103_v48  ;;  %v8130_v63 = vperm.slane %v4103_v24, %v9186_v57  ;;  %v4986_v9 = vrot.slane %v7576_v56, 4 }
 0x6ed   : > { %9214 = vst [vmem:[#allocation34_spill] sm:$0xff] %v8107_v36  ;;  %v4811_v12 = vrot.slane %v4734_v2, 4  ;;  %v4814_v27 = vsel %vm678_vm4, %v4734_v2, %v4813_v62  ;;  %3823 = vrot.lane.b32.xlu0 %v8100_v8, %s5442_s30  ;;  %v8122_v16 = vpop.permute.xlu2 %3370 }
 0x6ee   : > { %v4822_v36 = vperm.slane %v4814_v27, %v9186_v57  ;;  %v4090_v27 = vrot.slane %v7737_v61, 4  ;;  %v8153_v61 = vperm.slane %v3526_v28, %v9187_v22  ;;  %v4124_v24 = vrot.slane %v8130_v63, 4 }
 0x6ef   : > { %v4812_v41 = vsel %vm678_vm4, %v4811_v12, %v7495_v3  ;;  %v8139_v3 = vsel %vm678_vm4, %v4180_v59, %v7968_v55  ;;  %v3457_v55 = vrot.slane %v7892_v6, 4 }
 0x6f0   : > { %v4818_v62 = vperm.slane %v4812_v41, %v9186_v57  ;;  %v4835_v50 = vrot.slane %v4822_v36, 4  ;;  %v8134_v2 = vsel %vm678_vm4, %v4822_v36, %v4837_v38  ;;  %v4091_v38 = vsel %vm678_vm4, %v7750_v29, %v4090_v27 }
 0x6f1   : > { %v3488_v36 = vsel %vm678_vm4, 0.0, %v3487_v26  ;;  %v3483_v41 = vrot.slane %v7903_v39, 4  ;;  %v4099_v6 = vperm.slane %v4091_v38, %v9186_v57  ;;  %v3712_v27 = vrot.slane %v3697_v31, 4 }
 0x6f2   : > { %3779 = vrot.lane.b32.xlu1 %v3697_v31, %s5441_s29  ;;  %v8143_v13 = vsel %vm678_vm4, %v4818_v62, %v4825_v21  ;;  %v8146_v58 = vsel %vm678_vm4, %v4835_v50, %v4810_v49  ;;  %v4987_v49 = vsel %vm678_vm4, %v7934_v1, %v4986_v9  ;;  %v4823_v21 = vrot.slane %v4818_v62, 4 }
 0x6f3   : > { %3570 = vrot.lane.b32.xlu2 %v3488_v36, %s5446_s16  ;;  %v4995_v62 = vperm.slane %v4987_v49, %v9186_v57  ;;  %v4125_v9 = vsel %vm678_vm4, %v4124_v24, %v4099_v6  ;;  %v3458_v39 = vsel %vm678_vm4, %v3457_v55, %v7878_v30  ;;  %v4974_v38 = vrot.slane %v7540_v42, 4 }
 0x6f4   : > { %v3319_v59 = vpop.permute.xlu1 %3318  ;;  %v8158_v12 = vpop.permute.xlu0 %4639  ;;  %v3484_v36 = vsel %vm678_vm4, 0.0, %v3483_v41  ;;  %v8197_v55 = vperm.slane %v4125_v9, %v9187_v22  ;;  %v3501_v9 = vrot.slane %v7932_v18, 4 }
 0x6f5   : > { %v3373_v29 = vsel %vm384_vm0, %v7669_v0, %v3319_v59  ;;  %3586 = vrot.lane.b32.xlu0 %v8153_v61, %s5443_s11  ;;  %v8170_v28 = vpop.permute.xlu2 %3996  ;;  %v4975_v30 = vsel %vm678_vm4, %v7826_v47, %v4974_v38  ;;  %v5008_v24 = vrot.slane %v4995_v62, 4  ;;  %v3714_v59 = vrot.slane %v7927_v43, 4 }
 0x6f6   : > { %v3374_v26 = vsel %vm847_vm5, %v3373_v29, %v7841_v54  ;;  %v4983_v49 = vperm.slane %v4975_v30, %v9186_v57  ;;  %v3527_v29 = vrot.slane %v8103_v48, 4 }
 0x6f7   : > { %v3375_v50 = vsel %vm849_vm6, %v3374_v26, %v7973_v25  ;;  %v8186_v25 = vsel %vm678_vm4, %v4823_v21, %v8089_v37  ;;  %v3489_v26 = vrot.slane %v7724_v46, 4 }
 0x6f8   : > { %v3376_v0 = vsel %vm851_vm7, %v3375_v50, %v7908_v33  ;;  %v3713_v33 = vsel %vm678_vm4, 0.0, %v3712_v27  ;;  %v5009_v50 = vsel %vm678_vm4, %v5008_v24, %v4983_v49  ;;  %v3528_v27 = vsel %vm678_vm4, %v8077_v32, %v3527_v29 }
 0x6f9   : > { %v3377_v54 = vsel %vm853_vm8, %v3376_v0, %v7883_v40  ;;  %v8200_v40 = vperm.slane %v3458_v39, %v9187_v22  ;;  %v3715_v0 = vsel %vm678_vm4, 0.0, %v3714_v59  ;;  %v5010_v43 = vrot.slane %v4983_v49, 4 }
 0x6fa   : > { %v8190_v31 = vsel %vm855_vm9, %v3377_v54, %v7910_v15  ;;  %3554 = vrot.lane.b32.xlu1 %v3484_v36, %s5444_s12  ;;  %v8224_v48 = vperm.slane %v5009_v50, %v9187_v22  ;;  %v3490_v46 = vsel %vm678_vm4, %v3489_v26, %v7707_v52  ;;  %v3536_v54 = vperm.slane %v3528_v27, %v9187_v22 }
 0x6fb   : > { %3783 = vrot.lane.b32.xlu2 %v3713_v33, %s5444_s12  ;;  %v3481_v41 = vrot.slane %v8200_v40, 4  ;;  %v5011_v18 = vsel %vm678_vm4, %v4995_v62, %v5010_v43  ;;  %v3502_v36 = vsel %vm678_vm4, %v3501_v9, %v7526_v20  ;;  %v8240_v33 = vperm.slane %v3490_v46, %v9186_v57 }
 0x6fc   : > { %v8203_v37 = vpop.permute.xlu1 %3366  ;;  %v8205_v15 = vpop.permute.xlu0 %3362  ;;  %v4126_v52 = vrot.slane %v4099_v6, 4  ;;  %v5019_v24 = vperm.slane %v5011_v18, %v9187_v22  ;;  %v3543_v59 = vrot.slane %v3536_v54, 4  ;;  %v8244_v49 = vperm.slane %v3502_v36, %v9186_v57 }
 0x6fd   : > { %4213 = vrot.lane.b32.xlu0 %v8197_v55, %s5443_s11  ;;  %v8211_v21 = vpop.permute.xlu2 %4643  ;;  %v3482_v39 = vsel %vm678_vm4, 0.0, %v3481_v41  ;;  %v3515_v29 = vrot.slane %v8240_v33, 4  ;;  %v3718_v20 = vrot.slane %v7766_v45, 4  ;;  %v4745_v41 = vrot.slane %v7705_v53, 4 }
 0x6fe   : > { %v4127_v62 = vsel %vm678_vm4, %v8130_v63, %v4126_v52  ;;  %v3544_v50 = vsel %vm678_vm4, 0.0, %v3543_v59  ;;  %v3730_v63 = vrot.slane %v7862_v51, 4  ;;  %v4757_v45 = vrot.slane %v7627_v23, 4 }
 0x6ff   : > { %v4135_v27 = vperm.slane %v4127_v62, %v9187_v22  ;;  %v4746_v9 = vsel %vm678_vm4, %v7854_v11, %v4745_v41  ;;  %v3754_v52 = vrot.slane %v8052_v35, 4  ;;  %v4743_v62 = vrot.slane %v7854_v11, 4 }
 0x700   : > { %v4758_v46 = vsel %vm678_vm4, %v8017_v34, %v4757_v45  ;;  %v8274_v18 = vperm.slane %v4746_v9, %v9186_v57  ;;  %v3731_v36 = vsel %vm678_vm4, %v3730_v63, %v7524_v17  ;;  %v4755_v63 = vrot.slane %v8017_v34, 4 }
 0x701   : > { %v4142_v51 = vrot.slane %v4135_v27, 4  ;;  %v4744_v9 = vsel %vm678_vm4, %v4743_v62, %v7705_v53 }
 0x702   : > { %3791 = vrot.lane.b32.xlu1 %v3715_v0, %s5445_s15  ;;  %v3516_v0 = vsel %vm678_vm4, %v8244_v49, %v3515_v29  ;;  %v8289_v29 = vperm.slane %v3731_v36, %v9186_v57  ;;  %v4781_v41 = vrot.slane %v8274_v18, 4  ;;  %v8326_v36 = vperm.slane %v4744_v9, %v9186_v57  ;;  %v9215_v9 = vld [vmem:[#allocation10_spill] sm:$0xff] }
 0x703   : > { %3546 = vrot.lane.b32.xlu2 %v3482_v39, %s5447_s17  ;;  %v3719_v39 = vsel %vm678_vm4, %v3718_v20, %v7514_v60  ;;  %v8285_v60 = vperm.slane %v4758_v46, %v9186_v57  ;;  %v4143_v35 = vsel %vm678_vm4, 0.0, %v4142_v51  ;;  %v5026_v46 = vrot.slane %v5019_v24, 4 }
 0x704   : > { %v8229_v38 = vpop.permute.xlu1 %3992  ;;  %v8231_v32 = vpop.permute.xlu0 %3988  ;;  %v8280_v59 = vperm.slane %v3719_v39, %v9186_v57  ;;  %v4984_v51 = vrot.slane %v7934_v1, 4 }
 0x705   : > { %5097 = vrot.lane.b32.xlu0 %v8224_v48, %s5443_s11  ;;  %v3347_v30 = vpop.permute.xlu2 %3346  ;;  %v4782_v45 = vsel %vm678_vm4, %v8285_v60, %v4781_v41 }
 0x706   : > { %v3744_v11 = vrot.slane %v8280_v59, 4  ;;  %v3380_v34 = vsel %vm384_vm0, %v7807_v44, %v3347_v30  ;;  %v8323_v53 = vperm.slane %v4782_v45, %v9187_v22  ;;  %v5027_v30 = vsel %vm678_vm4, 0.0, %v5026_v46 }
 0x70a   : > { %5105 = vrot.lane.b32.xlu1 %v5019_v24, %s5442_s30 }
 0x70b   : > { %3594 = vrot.lane.b32.xlu2 %v3536_v54, %s5442_s30  ;;  %v8271_v54 = vperm.slane %v3516_v0, %v9187_v22 }
 0x70c   : > { %v8253_v6 = vpop.permute.xlu1 %4647  ;;  %v8255_v26 = vpop.permute.xlu0 %4012 }
 0x70d   : > { %3598 = vrot.lane.b32.xlu0 %v3544_v50, %s5446_s16  ;;  %v3973_v43 = vpop.permute.xlu2 %3972  ;;  %v3755_v50 = vsel %vm678_vm4, %v3754_v52, %v8045_v14  ;;  %v3745_v14 = vsel %vm678_vm4, %v8289_v29, %v3744_v11  ;;  %v4769_v11 = vrot.slane %v8326_v36, 4 }
 0x70e   : > { %v8311_v39 = vperm.slane %v3755_v50, %v9187_v22  ;;  %v3753_v24 = vperm.slane %v3745_v14, %v9187_v22  ;;  %v4027_v46 = vsel %vm384_vm0, %v9215_v9, %v3973_v43 }
 0x712   : > { %3578 = vrot.lane.b32.xlu1 %v8271_v54, %s5441_s29 }
 0x713   : > { %4221 = vrot.lane.b32.xlu2 %v4135_v27, %s5442_s30  ;;  %v4972_v27 = vrot.slane %v7826_v47, 4  ;;  %v4756_v47 = vsel %vm678_vm4, %v4755_v63, %v7627_v23  ;;  %v3381_v23 = vsel %vm847_vm5, %v3380_v34, %v8019_v5  ;;  %v4331_v34 = vrot.slane %v7544_v19, 4 }
 0x714   : > { %v8292_v20 = vpop.permute.xlu1 %4307  ;;  %v8294_v17 = vpop.permute.xlu0 %4667  ;;  %v8339_v62 = vperm.slane %v4756_v47, %v9186_v57  ;;  %v9216_v47 = vld [vmem:[#allocation34_spill] sm:$0xff] }
 0x715   : > { %4225 = vrot.lane.b32.xlu0 %v4143_v35, %s5446_s16  ;;  %v8303_v0 = vpop.permute.xlu2 %4020  ;;  %v4973_v52 = vsel %vm678_vm4, %v4972_v27, %v7540_v42  ;;  %v4985_v42 = vsel %vm678_vm4, %v4984_v51, %v7576_v56  ;;  %v3768_v27 = vrot.slane %v3753_v24, 4  ;;  %v8359_v56 = vperm.slane %v8014_v4, %v9187_v22 }
 0x716   : > { %v8350_v5 = vperm.slane %v4973_v52, %v9186_v57  ;;  %v3379_v43 = vsel %vm857_vm10, %v8190_v31, %v9216_v47  ;;  %v9221_v47 = vld [vmem:[#allocation22_spill] sm:$0xff] }
 0x717   : > { %v3769_v52 = vsel %vm678_vm4, 0.0, %v3768_v27 }
 0x718   : > { %v4998_v4 = vrot.slane %v8350_v5, 4 }
 0x71a   : > { %3815 = vrot.lane.b32.xlu1 %v8311_v39, %s5443_s11 }
 0x71b   : > { %4876 = vrot.lane.b32.xlu2 %v8323_v53, %s5442_s30 }
 0x71c   : > { %v3355_v44 = vpop.permute.xlu1 %3354  ;;  %v8335_v1 = vpop.permute.xlu0 %4024 }
 0x71d   : > { %v3382_v35 = vsel %vm849_vm6, %v3381_v23, %v3355_v44  ;;  %5109 = vrot.lane.b32.xlu0 %v5027_v30, %s5446_s16  ;;  %v8347_v50 = vpop.permute.xlu2 %4659  ;;  %v9218_v30 = vld [vmem:[#allocation11_spill] sm:$0xff] }
 0x71e   : > { %v3383_v41 = vsel %vm851_vm7, %v3382_v35, %v7915_v7  ;;  %v8362_v7 = vperm.slane %v4985_v42, %v9186_v57  ;;  %v4028_v35 = vsel %vm847_vm5, %v4027_v46, %v9218_v30  ;;  %v9220_v46 = vld [vmem:[#allocation31_spill] sm:$0xff] }
 0x71f   : > { %v3384_v63 = vsel %vm853_vm8, %v3383_v41, %v8205_v15  ;;  %v4770_v15 = vsel %vm678_vm4, %v8339_v62, %v4769_v11  ;;  %v9219_v11 = vld [vmem:[#allocation20_spill] sm:$0xff] }
 0x720   : > { %v3385_v45 = vsel %vm855_vm9, %v3384_v63, %v8203_v37  ;;  %v4779_v37 = vrot.slane %v8285_v60, 4  ;;  %v4778_v42 = vperm.slane %v4770_v15, %v9187_v22  ;;  %v4999_v31 = vsel %vm678_vm4, %v8362_v7, %v4998_v4 }
 0x721   : > { %v3386_v14 = vsel %vm857_vm10, %v3385_v45, %v8122_v16  ;;  %v9217_v16 = vld [vmem:[#allocation30_spill] sm:$0xff] }
 0x722   : > { %v3389_v51 = vrot.slane %v3386_v14, 4  ;;  %4205 = vrot.lane.b32.xlu1 %v8359_v56, %s5441_s29  ;;  %v4332_v44 = vsel %vm678_vm4, %v9217_v16, %v4331_v34  ;;  %v4780_v9 = vsel %vm678_vm4, %v4779_v37, %v8274_v18  ;;  %v4319_v14 = vrot.slane %v9220_v46, 4 }
 0x723   : > { %3807 = vrot.lane.b32.xlu2 %v3753_v24, %s5441_s29  ;;  %v8397_v27 = vperm.slane %v4332_v44, %v9186_v57  ;;  %v8407_v34 = vperm.slane %v4999_v31, %v9187_v22  ;;  %v3513_v44 = vrot.slane %v8244_v49, 4 }
 0x724   : > { %v3390_v23 = vsel %vm869_vm11, %v3379_v43, %v3389_v51  ;;  %v3981_v19 = vpop.permute.xlu1 %3980  ;;  %v8387_v41 = vpop.permute.xlu0 %4679  ;;  %v4793_v51 = vrot.slane %v4778_v42, 4  ;;  %v4320_v43 = vsel %vm678_vm4, %v9221_v47, %v4319_v14 }
 0x725   : > { %5186 = vst [vmem:[#allocation1] ss:$2 sm:$0xff] %v3390_v23  ;;  %v4029_v60 = vsel %vm849_vm6, %v4028_v35, %v3981_v19  ;;  %3811 = vrot.lane.b32.xlu0 %v3769_v52, %s5444_s12  ;;  %v8394_v24 = vpop.permute.xlu2 %4008  ;;  %v4353_v18 = vrot.slane %v8397_v27, 4  ;;  %v8427_v16 = vperm.slane %v4320_v43, %v9186_v57 }
 0x726   : > { %v4030_v63 = vsel %vm851_vm7, %v4029_v60, %v9219_v11  ;;  %v4794_v37 = vsel %vm678_vm4, 0.0, %v4793_v51  ;;  %v3514_v60 = vsel %vm678_vm4, %v3513_v44, %v8240_v33  ;;  %v9224_v33 = vld [vmem:[#allocation39_spill] sm:$0xff]  ;;  %v3539_v51 = vrot.slane %v8271_v54, 4 }
 0x727   : > { %v4031_v45 = vsel %vm853_vm8, %v4030_v63, %v8231_v32  ;;  %v8418_v32 = vperm.slane %v4780_v9, %v9187_v22  ;;  %v4354_v30 = vsel %vm678_vm4, %v4353_v18, %v8427_v16  ;;  %v8445_v63 = vperm.slane %v3514_v60, %v9187_v22 }
 0x728   : > { %v4032_v15 = vsel %vm855_vm9, %v4031_v45, %v8229_v38  ;;  %v8439_v31 = vperm.slane %v4354_v30, %v9187_v22  ;;  %v9223_v45 = vld [vmem:[#allocation16_spill] sm:$0xff]  ;;  %v3540_v43 = vsel %vm678_vm4, 0.0, %v3539_v51  ;;  %v4996_v54 = vrot.slane %v8362_v7, 4 }
 0x729   : > { %v8411_v4 = vsel %vm857_vm10, %v4032_v15, %v8170_v28  ;;  %v9222_v28 = vld [vmem:[#allocation13_spill] sm:$0xff]  ;;  %v3537_v47 = vrot.slane %v8445_v63, 4 }
 0x72a   : > { %5089 = vrot.lane.b32.xlu1 %v8407_v34, %s5441_s29  ;;  %v4352_v52 = vperm.slane %v9222_v28, %v9187_v22  ;;  %v9225_v28 = vld [vmem:[#allocation18_spill] sm:$0xff] }
 0x72b   : > { %4868 = vrot.lane.b32.xlu2 %v8418_v32, %s5443_s11  ;;  %v8467_v44 = vperm.slane %v9225_v28, %v9187_v22 }
 0x72c   : > { %v4636_v38 = vpop.permute.xlu1 %4635  ;;  %v4001_v19 = vpop.permute.xlu0 %4000  ;;  %v4367_v35 = vrot.slane %v4352_v52, 4 }
 0x72d   : > { %4864 = vrot.lane.b32.xlu0 %v4794_v37, %s5444_s12  ;;  %v8431_v23 = vpop.permute.xlu2 %4663  ;;  %v3538_v37 = vsel %vm678_vm4, 0.0, %v3537_v47 }
 0x72e   : > { %v4368_v11 = vsel %vm678_vm4, 0.0, %v4367_v35 }
 0x732   : > { %4860 = vrot.lane.b32.xlu1 %v4778_v42, %s5441_s29 }
 0x733   : > { %4442 = vrot.lane.b32.xlu2 %v8439_v31, %s5443_s11 }
 0x734   : > { %v4628_v49 = vpop.permute.xlu1 %4627 }
 0x735   : > { %v4682_v9 = vsel %vm384_vm0, %v9223_v45, %v4628_v49  ;;  %4438 = vrot.lane.b32.xlu0 %v4368_v11, %s5444_s12  ;;  %v8452_v46 = vpop.permute.xlu2 %4671  ;;  %v3770_v11 = vrot.slane %v8311_v39, 4  ;;  %v4767_v39 = vrot.slane %v8339_v62, 4 }
 0x736   : > { %v4683_v42 = vsel %vm847_vm5, %v4682_v9, %v9224_v33  ;;  %v9226_v33 = vld [vmem:[#allocation14_spill] sm:$0xff] }
 0x737   : > { %v4684_v14 = vsel %vm849_vm6, %v4683_v42, %v4636_v38  ;;  %v8455_v15 = vpop.permute.xlu0 %3550  ;;  %v4034_v42 = vsel %vm384_vm0, %v9226_v33, %v4001_v19  ;;  %v4768_v19 = vsel %vm678_vm4, %v4767_v39, %v8326_v36  ;;  %v4140_v36 = vrot.slane %v8197_v55, 4  ;;  %v9227_v39 = vld [vmem:[#allocation15_spill] sm:$0xff]  ;;  %v9228_v33 = vld [vmem:[#allocation24_spill] sm:$0xff] }
 0x738   : > { %v4685_v38 = vsel %vm851_vm7, %v4684_v14, %v8158_v12  ;;  %v4136_v12 = vrot.slane %v8467_v44, 4 }
 0x739   : > { %v4686_v30 = vsel %vm853_vm8, %v4685_v38, %v8211_v21  ;;  %v3771_v21 = vsel %vm678_vm4, 0.0, %v3770_v11 }
 0x73a   : > { %4434 = vrot.lane.b32.xlu1 %v4352_v52, %s5441_s29  ;;  %v3772_v52 = vrot.slane %v8100_v8, 4  ;;  %v8480_v60 = vsel %vm855_vm9, %v4686_v30, %v8253_v6  ;;  %v4997_v8 = vsel %vm678_vm4, %v4996_v54, %v8350_v5  ;;  %v4137_v6 = vsel %vm678_vm4, 0.0, %v4136_v12 }
 0x73b   : > { %3582 = vrot.lane.b32.xlu2 %v3540_v43, %s5444_s12  ;;  %v8494_v9 = vperm.slane %v4997_v8, %v9187_v22  ;;  %v3541_v5 = vrot.slane %v8153_v61, 4  ;;  %v4138_v43 = vrot.slane %v8359_v56, 4 }
 0x73c   : > { %v8462_v18 = vpop.permute.xlu1 %4675  ;;  %v3773_v7 = vsel %vm678_vm4, 0.0, %v3772_v52  ;;  %v8520_v52 = vperm.slane %v4768_v19, %v9187_v22 }
 0x73d   : > { %3574 = vrot.lane.b32.xlu0 %v3538_v37, %s5447_s17  ;;  %v8476_v35 = vpop.permute.xlu2 %3795  ;;  %v5020_v37 = vrot.slane %v8494_v9, 4  ;;  %v3542_v28 = vsel %vm678_vm4, 0.0, %v3541_v5  ;;  %v4139_v61 = vsel %vm678_vm4, 0.0, %v4138_v43  ;;  %v4795_v5 = vrot.slane %v8418_v32, 4  ;;  %v9229_v43 = vld [vmem:[#allocation21_spill] sm:$0xff] }
 0x73f   : > { %v8482_v49 = vpop.permute.xlu0 %3787  ;;  %v5021_v54 = vsel %vm678_vm4, 0.0, %v5020_v37  ;;  %v4387_v37 = vrot.slane %v9229_v43, 4 }
 0x741   : > { %v4388_v32 = vsel %vm678_vm4, %v8292_v20, %v4387_v37 }
 0x742   : > { %3827 = vrot.lane.b32.xlu1 %v3773_v7, %s5446_s16  ;;  %v5022_v7 = vrot.slane %v8407_v34, 4  ;;  %v4375_v34 = vrot.slane %v9227_v39, 4 }
 0x743   : > { %3819 = vrot.lane.b32.xlu2 %v3771_v21, %s5445_s15  ;;  %v4791_v21 = vrot.slane %v8520_v52, 4 }
 0x744   : > { %v4005_v45 = vpop.permute.xlu1 %4004 }
 0x745   : > { %4201 = vrot.lane.b32.xlu0 %v4137_v6, %s5447_s17  ;;  %v4035_v14 = vsel %vm847_vm5, %v4034_v42, %v4005_v45  ;;  %v8502_v51 = vpop.permute.xlu2 %3558  ;;  %v4141_v45 = vsel %vm678_vm4, 0.0, %v4140_v36  ;;  %v4792_v6 = vsel %vm678_vm4, 0.0, %v4791_v21 }
 0x746   : > { %v4036_v62 = vsel %vm849_vm6, %v4035_v14, %v8394_v24 }
 0x747   : > { %v8504_v47 = vpop.permute.xlu0 %3799  ;;  %v4037_v56 = vsel %vm851_vm7, %v4036_v62, %v8255_v26  ;;  %v9230_v62 = vld [vmem:[#allocation12_spill] sm:$0xff] }
 0x74a   : > { %3590 = vrot.lane.b32.xlu1 %v3542_v28, %s5445_s15  ;;  %v4376_v28 = vsel %vm678_vm4, %v9230_v62, %v4375_v34 }
 0x74b   : > { %4209 = vrot.lane.b32.xlu2 %v4139_v61, %s5444_s12 }
 0x74c   : > { %v4017_v38 = vpop.permute.xlu1 %4016 }
 0x74d   : > { %v4038_v24 = vsel %vm853_vm8, %v4037_v56, %v4017_v38  ;;  %5085 = vrot.lane.b32.xlu0 %v5021_v54, %s5447_s17  ;;  %v8527_v11 = vpop.permute.xlu2 %3570  ;;  %v5024_v38 = vrot.slane %v8224_v48, 4  ;;  %v4796_v54 = vsel %vm678_vm4, 0.0, %v4795_v5  ;;  %v9232_v48 = vld [vmem:[#allocation26_spill] sm:$0xff]  ;;  %v9236_v5 = vld [vmem:[#allocation33_spill] sm:$0xff] }
 0x74e   : > { %v4039_v30 = vsel %vm855_vm9, %v4038_v24, %v8303_v0  ;;  %v5023_v0 = vsel %vm678_vm4, 0.0, %v5022_v7  ;;  %v9231_v24 = vld [vmem:[#allocation17_spill] sm:$0xff]  ;;  %v8572_v7 = vperm.slane %v8134_v2, %v9187_v22  ;;  %v4369_v2 = vrot.slane %v8439_v31, 4 }
 0x74f   : > { %v4040_v12 = vsel %vm857_vm10, %v4039_v30, %v8335_v1  ;;  %v8531_v26 = vpop.permute.xlu0 %3562  ;;  %v4144_v36 = vrot.slane %v9231_v24, 4  ;;  %v8564_v30 = vperm.slane %v4376_v28, %v9186_v57 }
 0x750   : > { %v4043_v8 = vrot.slane %v4040_v12, 4  ;;  %v5028_v12 = vrot.slane %v9232_v48, 4 }
 0x752   : > { %v4044_v55 = vsel %vm869_vm11, %v8411_v4, %v4043_v8  ;;  %4217 = vrot.lane.b32.xlu1 %v4141_v45, %s5445_s15  ;;  %v9233_v8 = vld [vmem:[#allocation25_spill] sm:$0xff]  ;;  %v8580_v45 = vperm.slane %v4388_v32, %v9186_v57 }
 0x753   : > { %5192 = vst [vmem:[#allocation1 + $0x11] ss:$2 sm:$0xff] %v4044_v55  ;;  %5093 = vrot.lane.b32.xlu2 %v5023_v0, %s5444_s12  ;;  %v4156_v21 = vrot.slane %v9233_v8, 4  ;;  %v9234_v55 = vld [vmem:[#allocation27_spill] sm:$0xff] }
 0x754   : > { %v4656_v1 = vpop.permute.xlu1 %4655  ;;  %v5040_v0 = vrot.slane %v9234_v55, 4 }
 0x755   : > { %v4689_v42 = vsel %vm384_vm0, %v9228_v33, %v4656_v1  ;;  %4856 = vrot.lane.b32.xlu0 %v4792_v6, %s5447_s17  ;;  %v3784_v14 = vpop.permute.xlu2 %3783  ;;  %v9235_v1 = vld [vmem:[#allocation7_spill] sm:$0xff]  ;;  %v4411_v6 = vrot.slane %v8564_v30, 4 }
 0x756   : > { %v4690_v4 = vsel %vm847_vm5, %v4689_v42, %v8347_v50 }
 0x757   : > { %v4691_v19 = vsel %vm849_vm6, %v4690_v4, %v8431_v23  ;;  %v3776_v61 = vpop.permute.xlu0 %3775  ;;  %v3742_v23 = vrot.slane %v8289_v29, 4  ;;  %v5029_v4 = vsel %vm678_vm4, %v5028_v12, %v9236_v5 }
 0x758   : > { %v4692_v56 = vsel %vm851_vm7, %v4691_v19, %v8294_v17  ;;  %v5025_v17 = vsel %vm678_vm4, 0.0, %v5024_v38  ;;  %v9237_v38 = vld [vmem:[#allocation35_spill] sm:$0xff] }
 0x759   : > { %v4693_v50 = vsel %vm853_vm8, %v4692_v56, %v8452_v46  ;;  %v8576_v46 = vperm.slane %v8112_v10, %v9187_v22  ;;  %v4145_v10 = vsel %vm678_vm4, %v4144_v36, %v9235_v1  ;;  %v3743_v33 = vsel %vm678_vm4, %v3742_v23, %v8280_v59 }
 0x75a   : > { %4872 = vrot.lane.b32.xlu1 %v4796_v54, %s5445_s15  ;;  %v4694_v42 = vsel %vm855_vm9, %v4693_v50, %v8462_v18  ;;  %v4157_v59 = vsel %vm678_vm4, %v4156_v21, %v9237_v38  ;;  %v4412_v18 = vsel %vm678_vm4, %v8580_v45, %v4411_v6  ;;  %v8614_v32 = vperm.slane %v4145_v10, %v9186_v57 }
 0x75b   : > { %5101 = vrot.lane.b32.xlu2 %v5025_v17, %s5445_s15  ;;  %v4365_v31 = vrot.slane %v8576_v46, 4  ;;  %v8605_v19 = vsel %vm857_vm10, %v4694_v42, %v8387_v41  ;;  %v4370_v54 = vsel %vm678_vm4, 0.0, %v4369_v2  ;;  %v8620_v41 = vperm.slane %v3743_v33, %v9187_v22  ;;  %v9239_v2 = vld [vmem:[#allocation19_spill] sm:$0xff] }
 0x75c   : > { %v8583_v29 = vpop.permute.xlu1 %3566  ;;  %v5030_v36 = vrot.slane %v9236_v5, 4  ;;  %v8625_v23 = vperm.slane %v5029_v4, %v9186_v57  ;;  %v8633_v17 = vperm.slane %v4412_v18, %v9187_v22  ;;  %v3830_v1 = vsel %vm384_vm0, %v9239_v2, %v3776_v61 }
 0x75d   : > { %4904 = vrot.lane.b32.xlu0 %v8572_v7, %s5442_s30  ;;  %v3547_v34 = vpop.permute.xlu2 %3546  ;;  %v4366_v12 = vsel %vm678_vm4, 0.0, %v4365_v31  ;;  %v4170_v6 = vrot.slane %v8614_v32, 4 }
 0x75e   : > { %v3601_v37 = vsel %vm384_vm0, %v8200_v40, %v3547_v34  ;;  %v9238_v40 = vld [vmem:[#allocation29_spill] sm:$0xff]  ;;  %v5031_v8 = vsel %vm678_vm4, %v9232_v48, %v5030_v36  ;;  %v3766_v48 = vrot.slane %v8620_v41, 4 }
 0x75f   : > { %v8600_v28 = vpop.permute.xlu0 %3823  ;;  %v3602_v56 = vsel %vm847_vm5, %v3601_v37, %v8455_v15  ;;  %v5041_v50 = vsel %vm678_vm4, %v5040_v0, %v9238_v40  ;;  %v5042_v24 = vrot.slane %v9238_v40, 4  ;;  %v8629_v15 = vperm.slane %v4157_v59, %v9186_v57 }
 0x760   : > { %v8640_v0 = vperm.slane %v5041_v50, %v9186_v57  ;;  %v5039_v61 = vperm.slane %v5031_v8, %v9186_v57  ;;  %v3767_v59 = vsel %vm678_vm4, 0.0, %v3766_v48 }
 0x761   : > { %v5043_v21 = vsel %vm678_vm4, %v9234_v55, %v5042_v24  ;;  %v5054_v55 = vrot.slane %v8625_v23, 4  ;;  %v4171_v37 = vsel %vm678_vm4, %v8629_v15, %v4170_v6 }
 0x762   : > { %4446 = vrot.lane.b32.xlu1 %v4370_v54, %s5445_s15  ;;  %v5051_v5 = vperm.slane %v5043_v21, %v9186_v57  ;;  %v5066_v18 = vrot.slane %v5039_v61, 4 }
 0x763   : > { %4430 = vrot.lane.b32.xlu2 %v4366_v12, %s5447_s17  ;;  %v5055_v38 = vsel %vm678_vm4, %v8640_v0, %v5054_v55  ;;  %v4373_v55 = vrot.slane %v9230_v62, 4 }
 0x764   : > { %v3780_v10 = vpop.permute.xlu1 %3779  ;;  %v5064_v40 = vrot.slane %v5051_v5, 4  ;;  %v8670_v50 = vperm.slane %v5055_v38, %v9187_v22 }
 0x765   : > { %v3831_v34 = vsel %vm847_vm5, %v3830_v1, %v3780_v10  ;;  %4478 = vrot.lane.b32.xlu0 %v8633_v17, %s5442_s30  ;;  %v8652_v42 = vpop.permute.xlu2 %3594 }
 0x766   : > { %v3832_v33 = vsel %vm849_vm6, %v3831_v34, %v3784_v14  ;;  %v8667_v14 = vperm.slane %v4171_v37, %v9187_v22  ;;  %v5065_v2 = vsel %vm678_vm4, %v5064_v40, %v5039_v61  ;;  %v4385_v37 = vrot.slane %v8292_v20, 4 }
 0x767   : > { %v8656_v4 = vpop.permute.xlu0 %3586  ;;  %v3833_v31 = vsel %vm851_vm7, %v3832_v33, %v8482_v49  ;;  %v5067_v49 = vsel %vm678_vm4, %v5051_v5, %v5066_v18  ;;  %v9240_v33 = vld [vmem:[#allocation23_spill] sm:$0xff]  ;;  %v4187_v18 = vperm.slane %v8139_v3, %v9187_v22 }
 0x768   : > { %v4191_v61 = vperm.slane %v9240_v33, %v9187_v22  ;;  %v4386_v20 = vsel %vm678_vm4, %v4385_v37, %v9229_v43 }
 0x76a   : > { %3803 = vrot.lane.b32.xlu1 %v3767_v59, %s5447_s17  ;;  %v4198_v40 = vrot.slane %v4191_v61, 4 }
 0x76b   : > { %4233 = vrot.lane.b32.xlu2 %v8667_v14, %s5441_s29 }
 0x76c   : > { %v3555_v54 = vpop.permute.xlu1 %3554 }
 0x76d   : > { %v3603_v24 = vsel %vm849_vm6, %v3602_v56, %v3555_v54  ;;  %5117 = vrot.lane.b32.xlu0 %v8670_v50, %s5441_s29  ;;  %v8680_v12 = vpop.permute.xlu2 %4221  ;;  %v5075_v56 = vperm.slane %v5067_v49, %v9187_v22  ;;  %v4392_v54 = vperm.slane %v4386_v20, %v9186_v57 }
 0x76e   : > { %v3604_v36 = vsel %vm851_vm7, %v3603_v24, %v8502_v51  ;;  %v8696_v51 = vperm.slane %v5065_v2, %v9187_v22 }
 0x76f   : > { %v3605_v8 = vsel %vm853_vm8, %v3604_v36, %v8531_v26  ;;  %v8684_v21 = vpop.permute.xlu0 %4213  ;;  %v8700_v26 = vperm.slane %v8143_v13, %v9187_v22  ;;  %v5082_v5 = vrot.slane %v5075_v56, 4  ;;  %v4199_v36 = vsel %vm678_vm4, 0.0, %v4198_v40 }
 0x770   : > { %v3606_v1 = vsel %vm855_vm9, %v3605_v8, %v8583_v29  ;;  %v4853_v8 = vrot.slane %v8572_v7, 4  ;;  %v5078_v7 = vrot.slane %v8670_v50, 4 }
 0x771   : > { %v8692_v10 = vsel %vm857_vm10, %v3606_v1, %v8527_v11  ;;  %v5083_v38 = vsel %vm678_vm4, 0.0, %v5082_v5  ;;  %v4194_v1 = vrot.slane %v8667_v14, 4  ;;  %v4196_v14 = vrot.slane %v4187_v18, 4 }
 0x772   : > { %5133 = vrot.lane.b32.xlu1 %v5075_v56, %s5442_s30  ;;  %v4854_v56 = vsel %vm678_vm4, 0.0, %v4853_v8  ;;  %v5079_v5 = vsel %vm678_vm4, 0.0, %v5078_v7 }
 0x773   : > { %5125 = vrot.lane.b32.xlu2 %v8696_v51, %s5443_s11  ;;  %v4197_v37 = vsel %vm678_vm4, 0.0, %v4196_v14  ;;  %v4168_v14 = vrot.slane %v8629_v15, 4 }
 0x774   : > { %v3792_v6 = vpop.permute.xlu1 %3791 }
 0x775   : > { %v3834_v29 = vsel %vm853_vm8, %v3833_v31, %v3792_v6  ;;  %4888 = vrot.lane.b32.xlu0 %v8700_v26, %s5441_s29  ;;  %v8709_v34 = vpop.permute.xlu2 %4876  ;;  %v4409_v31 = vrot.slane %v8580_v45, 4  ;;  %v5052_v6 = vrot.slane %v8640_v0, 4  ;;  %v4169_v15 = vsel %vm678_vm4, %v4168_v14, %v8614_v32 }
 0x776   : > { %v3835_v11 = vsel %vm855_vm9, %v3834_v29, %v8476_v35  ;;  %v8724_v35 = vperm.slane %v8146_v58, %v9187_v22 }
 0x777   : > { %v8713_v48 = vsel %vm857_vm10, %v3835_v11, %v8504_v47  ;;  %v8715_v13 = vpop.permute.xlu0 %5097  ;;  %v4374_v47 = vsel %vm678_vm4, %v4373_v55, %v9227_v39  ;;  %v4410_v39 = vsel %vm678_vm4, %v4409_v31, %v8564_v30  ;;  %v4195_v11 = vsel %vm678_vm4, 0.0, %v4194_v1 }
 0x778   : > { %v4380_v58 = vperm.slane %v4374_v47, %v9186_v57  ;;  %v8749_v49 = vperm.slane %v4410_v39, %v9187_v22  ;;  %v5053_v0 = vsel %vm678_vm4, %v5052_v6, %v8625_v23  ;;  %v4851_v8 = vrot.slane %v8724_v35, 4  ;;  %v9241_v6 = vld [vmem:[#allocation28_spill] sm:$0xff] }
 0x779   : > { %v8785_v31 = vperm.slane %v5053_v0, %v9187_v22 }
 0x77a   : > { %4249 = vrot.lane.b32.xlu1 %v4191_v61, %s5442_s30  ;;  %v4399_v43 = vrot.slane %v4380_v58, 4  ;;  %v5080_v61 = vrot.slane %v8696_v51, 4  ;;  %v4849_v51 = vrot.slane %v8700_v26, 4 }
 0x77b   : > { %4896 = vrot.lane.b32.xlu2 %v8724_v35, %s5443_s11  ;;  %v5076_v20 = vrot.slane %v8785_v31, 4 }
 0x77c   : > { %v8731_v62 = vpop.permute.xlu1 %5105  ;;  %v4400_v3 = vsel %vm678_vm4, %v4392_v54, %v4399_v43  ;;  %v5081_v47 = vsel %vm678_vm4, 0.0, %v5080_v61  ;;  %v8803_v43 = vperm.slane %v8186_v25, %v9187_v22  ;;  %v4568_v25 = vrot.slane %v9241_v6, 4 }
 0x77d   : > { %5137 = vrot.lane.b32.xlu0 %v5083_v38, %s5446_s16  ;;  %v8737_v59 = vpop.permute.xlu2 %3807  ;;  %v4408_v2 = vperm.slane %v4400_v3, %v9187_v22  ;;  %v5077_v40 = vsel %vm678_vm4, 0.0, %v5076_v20  ;;  %v4397_v3 = vrot.slane %v4392_v54, 4 }
 0x77e   : > { %v4569_v61 = vsel %vm678_vm4, 0.0, %v4568_v25 }
 0x77f   : > { %v8740_v45 = vpop.permute.xlu0 %3598  ;;  %v4423_v39 = vrot.slane %v4408_v2, 4  ;;  %v4398_v7 = vsel %vm678_vm4, %v4397_v3, %v4380_v58 }
 0x780   : > { %v8827_v0 = vperm.slane %v4398_v7, %v9187_v22 }
 0x782   : > { %4241 = vrot.lane.b32.xlu1 %v4187_v18, %s5443_s11  ;;  %v4850_v18 = vsel %vm678_vm4, 0.0, %v4849_v51  ;;  %v4427_v51 = vrot.slane %v8633_v17, 4  ;;  %v4421_v20 = vrot.slane %v8827_v0, 4 }
 0x783   : > { %4470 = vrot.lane.b32.xlu2 %v8749_v49, %s5443_s11  ;;  %s5406_s11 = sshll.u32 %s9243_s14, 3 }
 0x784   : > { %v8753_v24 = vpop.permute.xlu1 %3578  ;;  %v4422_v32 = vsel %vm678_vm4, 0.0, %v4421_v20 }
 0x785   : > { %4253 = vrot.lane.b32.xlu0 %v4199_v36, %s5446_s16  ;;  %v8758_v30 = vpop.permute.xlu2 %4868  ;;  %v4424_v36 = vsel %vm678_vm4, 0.0, %v4423_v39 }
 0x787   : > { %v8760_v57 = vpop.permute.xlu0 %4225 }
 0x78a   : > { %4462 = vrot.lane.b32.xlu1 %v4408_v2, %s5441_s29 }
 0x78b   : > { %4908 = vrot.lane.b32.xlu2 %v4854_v56, %s5446_s16  ;;  %v4847_v56 = vrot.slane %v8803_v43, 4 }
 0x78c   : > { %v8769_v29 = vpop.permute.xlu1 %3815 }
 0x78d   : > { %4237 = vrot.lane.b32.xlu0 %v4195_v11, %s5444_s12  ;;  %v8774_v55 = vpop.permute.xlu2 %4442  ;;  %v4852_v11 = vsel %vm678_vm4, 0.0, %v4851_v8  ;;  %v4848_v54 = vsel %vm678_vm4, 0.0, %v4847_v56 }
 0x78f   : > { %v8776_v33 = vpop.permute.xlu0 %5109 }
 0x792   : > { %5121 = vrot.lane.b32.xlu1 %v5079_v5, %s5444_s12  ;;  %v4425_v5 = vrot.slane %v8749_v49, 4  ;;  %v4428_v49 = vsel %vm678_vm4, 0.0, %v4427_v51 }
 0x793   : > { %4245 = vrot.lane.b32.xlu2 %v4197_v37, %s5445_s15  ;;  %v4355_v37 = vrot.slane %v8427_v16, 4 }
 0x794   : > { %v8788_v50 = vpop.permute.xlu1 %4205 }
 0x795   : > { %5129 = vrot.lane.b32.xlu0 %v5081_v47, %s5445_s15  ;;  %v8793_v23 = vpop.permute.xlu2 %3582  ;;  %v4356_v39 = vsel %vm678_vm4, %v8397_v27, %v4355_v37 }
 0x796   : > { %v4364_v17 = vperm.slane %v4356_v39, %v9187_v22 }
 0x797   : > { %v8795_v38 = vpop.permute.xlu0 %3811 }
 0x798   : > { %v4371_v8 = vrot.slane %v4364_v17, 4 }
 0x79a   : > { %4892 = vrot.lane.b32.xlu1 %v4850_v18, %s5444_s12  ;;  %v4426_v18 = vsel %vm678_vm4, 0.0, %v4425_v5 }
 0x79b   : > { %5113 = vrot.lane.b32.xlu2 %v5077_v40, %s5447_s17  ;;  %v8840_v40 = vperm.slane %v4169_v15, %v9187_v22  ;;  %v4372_v22 = vsel %vm678_vm4, 0.0, %v4371_v8 }
 0x79c   : > { %v8806_v26 = vpop.permute.xlu1 %5089 }
 0x79d   : > { %4466 = vrot.lane.b32.xlu0 %v4424_v36, %s5444_s12  ;;  %v8811_v2 = vpop.permute.xlu2 %3819  ;;  %v4192_v27 = vrot.slane %v8840_v40, 4 }
 0x79f   : > { %v8813_v1 = vpop.permute.xlu0 %4864  ;;  %v4193_v56 = vsel %vm678_vm4, 0.0, %v4192_v27 }
 0x7a2   : > { %4900 = vrot.lane.b32.xlu1 %v4852_v11, %s5445_s15  ;;  %v4797_v11 = vrot.slane %v8323_v53, 4 }
 0x7a3   : > { %4884 = vrot.lane.b32.xlu2 %v4848_v54, %s5447_s17 }
 0x7a4   : > { %v8823_v35 = vpop.permute.xlu1 %4860  ;;  %v4798_v5 = vsel %vm678_vm4, 0.0, %v4797_v11 }
 0x7a5   : > { %4651 = vrot.lane.b32.xlu0 %v4569_v61, %s5446_s16  ;;  %v4210_v58 = vpop.permute.xlu2 %4209 }
 0x7a7   : > { %v4439_v47 = vpop.permute.xlu0 %4438 }
 0x7aa   : > { %4474 = vrot.lane.b32.xlu1 %v4426_v18, %s5445_s15 }
 0x7ab   : > { %4482 = vrot.lane.b32.xlu2 %v4428_v49, %s5446_s16 }
 0x7ac   : > { %v4435_v16 = vpop.permute.xlu1 %4434 }
 0x7ad   : > { %4458 = vrot.lane.b32.xlu0 %v4422_v32, %s5447_s17  ;;  %v5094_v36 = vpop.permute.xlu2 %5093 }
 0x7af   : > { %v3575_v3 = vpop.permute.xlu0 %3574 }
 0x7b0   : > { %v3608_v6 = vsel %vm384_vm0, %v8445_v63, %v3575_v3 }
 0x7b1   : > { %v3609_v7 = vsel %vm847_vm5, %v3608_v6, %v8753_v24 }
 0x7b2   : > { %4229 = vrot.lane.b32.xlu1 %v4193_v56, %s5447_s17  ;;  %v3610_v15 = vsel %vm849_vm6, %v3609_v7, %v8793_v23 }
 0x7b3   : > { %4450 = vrot.lane.b32.xlu2 %v4364_v17, %s5442_s30  ;;  %v3611_v24 = vsel %vm851_vm7, %v3610_v15, %v8656_v4 }
 0x7b4   : > { %v8854_v25 = vpop.permute.xlu1 %3827 }
 0x7b5   : > { %4454 = vrot.lane.b32.xlu0 %v4372_v22, %s5446_s16  ;;  %v5102_v14 = vpop.permute.xlu2 %5101 }
 0x7b7   : > { %v4202_v54 = vpop.permute.xlu0 %4201 }
 0x7b8   : > { %v4256_v61 = vsel %vm384_vm0, %v8467_v44, %v4202_v54 }
 0x7b9   : > { %v4257_v63 = vsel %vm847_vm5, %v4256_v61, %v8788_v50 }
 0x7ba   : > { %4880 = vrot.lane.b32.xlu1 %v4798_v5, %s5446_s16  ;;  %v4258_v53 = vsel %vm849_vm6, %v4257_v63, %v4210_v58  ;;  %s379_s16 = scalar_lea.vmem %s9036_s10, %s5406_s11 }
 0x7bc   : > { %v3591_v37 = vpop.permute.xlu1 %3590 }
 0x7bd   : > { %v3612_v51 = vsel %vm853_vm8, %v3611_v24, %v3591_v37  ;;  %v4431_v20 = vpop.permute.xlu2 %4430 }
 0x7be   : > { %v3613_v44 = vsel %vm855_vm9, %v3612_v51, %v8652_v42  ;;  %v4485_v23 = vsel %vm384_vm0, %v8576_v46, %v4431_v20 }
 0x7bf   : > { %v3614_v50 = vsel %vm857_vm10, %v3613_v44, %v8740_v45  ;;  %v5086_v39 = vpop.permute.xlu0 %5085  ;;  %v4486_v58 = vsel %vm847_vm5, %v4485_v23, %v4435_v16 }
 0x7c0   : > { %v3617_v18 = vrot.slane %v3614_v50, 4  ;;  %v5140_v49 = vsel %vm384_vm0, %v8494_v9, %v5086_v39  ;;  %v4487_v32 = vsel %vm849_vm6, %v4486_v58, %v4439_v47 }
 0x7c1   : > { %v5141_v4 = vsel %vm847_vm5, %v5140_v49, %v8806_v26  ;;  %v4488_v46 = vsel %vm851_vm7, %v4487_v32, %v8774_v55  ;;  %v4259_v26 = vsel %vm851_vm7, %v4258_v53, %v8684_v21 }
 0x7c2   : > { %v3618_v42 = vsel %vm869_vm11, %v8692_v10, %v3617_v18  ;;  %v5142_v45 = vsel %vm849_vm6, %v5141_v4, %v5094_v36 }
 0x7c3   : > { %5188 = vst [vmem:[#allocation1 + $0x1] ss:$2 sm:$0xff] %v3618_v42  ;;  %v5143_v16 = vsel %vm851_vm7, %v5142_v45, %v8715_v13 }
 0x7c4   : > { %v5144_v17 = vsel %vm853_vm8, %v5143_v16, %v5102_v14  ;;  %v4218_v9 = vpop.permute.xlu1 %4217 }
 0x7c5   : > { %v4260_v47 = vsel %vm853_vm8, %v4259_v26, %v4218_v9  ;;  %v8898_v27 = vpop.permute.xlu2 %4233  ;;  %v5145_v55 = vsel %vm855_vm9, %v5144_v17, %v8731_v62 }
 0x7c6   : > { %v4261_v10 = vsel %vm855_vm9, %v4260_v47, %v8680_v12  ;;  %v5146_v12 = vsel %vm857_vm10, %v5145_v55, %v8776_v33 }
 0x7c7   : > { %v8904_v36 = vsel %vm857_vm10, %v4261_v10, %v8760_v57  ;;  %v4857_v13 = vpop.permute.xlu0 %4856 }
 0x7c8   : > { %v4911_v3 = vsel %vm384_vm0, %v8520_v52, %v4857_v13 }
 0x7c9   : > { %v4912_v21 = vsel %vm847_vm5, %v4911_v3, %v8823_v35 }
 0x7ca   : > { %v4913_v8 = vsel %vm849_vm6, %v4912_v21, %v8813_v1  ;;  %v8958_v17 = vld.sshfl [vmem:[#allocation1] sm:$0xff pattern:$0x75316420]  ;;  %v8960_v9 = vld.sshfl [vmem:[#allocation1 + $0x8] sm:$0xff pattern:$0x75316420] }
 0x7cb   : > { %v4914_v62 = vsel %vm851_vm7, %v4913_v8, %v8758_v30 }
 0x7cc   : > { %v4873_v56 = vpop.permute.xlu1 %4872 }
 0x7cd   : > { %v8917_v57 = vsel %vm853_vm8, %v4914_v62, %v4873_v56  ;;  %v5126_v6 = vpop.permute.xlu2 %5125 }
 0x7cf   : > { %v4905_v22 = vpop.permute.xlu0 %4904 }
 0x7d4   : > { %v4447_v11 = vpop.permute.xlu1 %4446 }
 0x7d5   : > { %v8920_v52 = vsel %vm853_vm8, %v4488_v46, %v4447_v11  ;;  %v4897_v35 = vpop.permute.xlu2 %4896 }
 0x7d7   : > { %v8922_v7 = vpop.permute.xlu0 %4478 }
 0x7dc   : > { %v3804_v1 = vpop.permute.xlu1 %3803 }
 0x7dd   : > { %v3837_v33 = vsel %vm384_vm0, %v8620_v41, %v3804_v1  ;;  %v4471_v63 = vpop.permute.xlu2 %4470 }
 0x7de   : > { %v3838_v30 = vsel %vm847_vm5, %v3837_v33, %v8737_v59 }
 0x7df   : > { %v3839_v14 = vsel %vm849_vm6, %v3838_v30, %v8795_v38  ;;  %v5118_v54 = vpop.permute.xlu0 %5117 }
 0x7e0   : > { %v3840_v61 = vsel %vm851_vm7, %v3839_v14, %v8769_v29 }
 0x7e1   : > { %v3841_v5 = vsel %vm853_vm8, %v3840_v61, %v8811_v2 }
 0x7e2   : > { %v3842_v15 = vsel %vm855_vm9, %v3841_v5, %v8600_v28 }
 0x7e3   : > { %v3843_v41 = vsel %vm857_vm10, %v3842_v15, %v8854_v25 }
 0x7e4   : > { %v3846_v53 = vrot.slane %v3843_v41, 4  ;;  %v5134_v37 = vpop.permute.xlu1 %5133 }
 0x7e5   : > { %v8940_v24 = vpop.permute.xlu2 %4908 }
 0x7e6   : > { %v3847_v59 = vsel %vm869_vm11, %v8713_v48, %v3846_v53 }
 0x7e7   : > { %5190 = vst [vmem:[#allocation1 + $0x10] ss:$2 sm:$0xff] %v3847_v59  ;;  %v4889_v38 = vpop.permute.xlu0 %4888 }
 0x7ec   : > { %v8942_v29 = vpop.permute.xlu1 %4249 }
 0x7ed   : > { %v8944_v44 = vpop.permute.xlu2 %4245 }
 0x7ef   : > { %v5138_v51 = vpop.permute.xlu0 %5137 }
 0x7f4   : > { %v4242_v2 = vpop.permute.xlu1 %4241 }
 0x7f5   : > { %v5114_v50 = vpop.permute.xlu2 %5113 }
 0x7f6   : > { %v5147_v23 = vsel %vm384_vm0, %v8785_v31, %v5114_v50 }
 0x7f7   : > { %v8946_v20 = vpop.permute.xlu0 %4253  ;;  %v5148_v48 = vsel %vm847_vm5, %v5147_v23, %v5118_v54 }
 0x7fc   : > { %v4463_v28 = vpop.permute.xlu1 %4462 }
 0x7fd   : > { %v4885_v42 = vpop.permute.xlu2 %4884 }
 0x7fe   : > { %v4918_v31 = vsel %vm384_vm0, %v8803_v43, %v4885_v42 }
 0x7ff   : > { %v4238_v25 = vpop.permute.xlu0 %4237  ;;  %v4919_v10 = vsel %vm847_vm5, %v4918_v31, %v4889_v38 }
 0x804   : > { %v5122_v39 = vpop.permute.xlu1 %5121 }
 0x805   : > { %v5149_v18 = vsel %vm849_vm6, %v5148_v48, %v5122_v39  ;;  %v4483_v1 = vpop.permute.xlu2 %4482  ;;  %v4916_v39 = vsel %vm855_vm9, %v8917_v57, %v8709_v34  ;;  %v5204_v34 = vld.sshfl [vmem:[#allocation1 + $0x18] sm:$0xff pattern:$0x75316420] }
 0x806   : > { %v5150_v58 = vsel %vm851_vm7, %v5149_v18, %v5126_v6 }
 0x807   : > { %v5130_v49 = vpop.permute.xlu0 %5129 }
 0x808   : > { %v5151_v4 = vsel %vm853_vm8, %v5150_v58, %v5130_v49  ;;  %v5203_v49 = vld.sshfl [vmem:[#allocation1 + $0x10] sm:$0xff pattern:$0x75316420] }
 0x809   : > { %v5152_v32 = vsel %vm855_vm9, %v5151_v4, %v5134_v37 }
 0x80a   : > { %v5153_v45 = vsel %vm857_vm10, %v5152_v32, %v5138_v51 }
 0x80b   : > { %v5156_v46 = vrot.slane %v5153_v45, 4 }
 0x80c   : > { %v4893_v16 = vpop.permute.xlu1 %4892 }
 0x80d   : > { %v5157_v26 = vsel %vm869_vm11, %v5146_v12, %v5156_v46  ;;  %v4920_v55 = vsel %vm849_vm6, %v4919_v10, %v4893_v16  ;;  %v4698_v12 = vrot.slane %v8605_v19, 4  ;;  %v4451_v54 = vpop.permute.xlu2 %4450 }
 0x80e   : > { %5209 = vst [vmem:[#allocation1] ss:$2 sm:$0xff] %v5157_v26  ;;  %v4921_v3 = vsel %vm851_vm7, %v4920_v55, %v4897_v35  ;;  %v4490_v37 = vsel %vm855_vm9, %v8920_v52, %v4451_v54 }
 0x80f   : > { %v4467_v47 = vpop.permute.xlu0 %4466 }
 0x814   : > { %v4901_v13 = vpop.permute.xlu1 %4900 }
 0x815   : > { %v4922_v21 = vsel %vm853_vm8, %v4921_v3, %v4901_v13  ;;  %v5210_v8 = vld.sshfl [vmem:[#allocation1] sm:$0xff pattern:$0x75316420]  ;;  %v5211_v62 = vld.sshfl [vmem:[#allocation1 + $0x8] sm:$0xff pattern:$0x75316420] }
 0x816   : > { %v4923_v43 = vsel %vm855_vm9, %v4922_v21, %v4905_v22  ;;  %5398 = vmatpush.msk.msrb.mxu1 %vm869_vm11, %v5210_v8  ;;  %5400 = vmatpush.msk.msra.mxu2 %vm869_vm11, %v5211_v62  ;;  %v5171_v22 = vld [vmem:[%s9035_s9] sm:$0xf] }
 0x817   : > { %v4652_v56 = vpop.permute.xlu0 %4651  ;;  %5174 = vperm.xlu1 %5428, %v5171_v22  }
 0x818   : > { %v4688_v6 = vsel %vm857_vm10, %v8480_v60, %v4652_v56 }
 0x819   : > { %v4699_v11 = vsel %vm869_vm11, %v4688_v6, %v4698_v12 }
 0x81a   : > { %5198 = vst [vmem:[#allocation1 + $0x30] ss:$2 sm:$0xff] %v4699_v11 }
 0x81c   : > { %v4475_v35 = vpop.permute.xlu1 %4474 }
 0x81f   : > { %v4459_v33 = vpop.permute.xlu0 %4458 }
 0x820   : > { %v4492_v30 = vsel %vm384_vm0, %v8827_v0, %v4459_v33 }
 0x821   : > { %v4493_v19 = vsel %vm847_vm5, %v4492_v30, %v4463_v28 }
 0x822   : > { %v4494_v14 = vsel %vm849_vm6, %v4493_v19, %v4467_v47 }
 0x823   : > { %v4495_v60 = vsel %vm851_vm7, %v4494_v14, %v4471_v63 }
 0x824   : > { %v4496_v61 = vsel %vm853_vm8, %v4495_v60, %v4475_v35  ;;  %v4230_v5 = vpop.permute.xlu1 %4229 }
 0x825   : > { %v4263_v15 = vsel %vm384_vm0, %v8840_v40, %v4230_v5  ;;  %v4497_v41 = vsel %vm855_vm9, %v4496_v61, %v8922_v7  ;;  %v4924_v40 = vsel %vm857_vm10, %v4923_v43, %v8940_v24 }
 0x826   : > { %v4264_v0 = vsel %vm847_vm5, %v4263_v15, %v8898_v27  ;;  %v4498_v53 = vsel %vm857_vm10, %v4497_v41, %v4483_v1 }
 0x827   : > { %v4265_v63 = vsel %vm849_vm6, %v4264_v0, %v4238_v25  ;;  %v4501_v59 = vrot.slane %v4498_v53, 4  ;;  %v4455_v38 = vpop.permute.xlu0 %4454  ;;  %v4927_v25 = vrot.slane %v4924_v40, 4 }
 0x828   : > { %v4266_v51 = vsel %vm851_vm7, %v4265_v63, %v4242_v2  ;;  %v4491_v28 = vsel %vm857_vm10, %v4490_v37, %v4455_v38 }
 0x829   : > { %v4267_v7 = vsel %vm853_vm8, %v4266_v51, %v8944_v44  ;;  %v4502_v27 = vsel %vm869_vm11, %v4491_v28, %v4501_v59 }
 0x82a   : > { %v4268_v50 = vsel %vm855_vm9, %v4267_v7, %v8942_v29  ;;  %5196 = vst [vmem:[#allocation1 + $0x21] ss:$2 sm:$0xff] %v4502_v27 }
 0x82b   : > { %v4269_v52 = vsel %vm857_vm10, %v4268_v50, %v8946_v20 }
 0x82c   : > { %v4272_v23 = vrot.slane %v4269_v52, 4  ;;  %v4881_v2 = vpop.permute.xlu1 %4880 }
 0x82d   : > { %v4917_v24 = vsel %vm857_vm10, %v4916_v39, %v4881_v2 }
 0x82e   : > { %v4273_v44 = vsel %vm869_vm11, %v8904_v36, %v4272_v23  ;;  %v4928_v48 = vsel %vm869_vm11, %v4917_v24, %v4927_v25  ;;  %v5161_v36 = vld [vmem:[%s9034_s8] sm:$0xf] }
 0x82f   : > { %5194 = vst [vmem:[#allocation1 + $0x20] ss:$2 sm:$0xff] %v4273_v44 }
 0x830   : > { %5200 = vst [vmem:[#allocation1 + $0x31] ss:$2 sm:$0xff] %v4928_v48 }
 0x836   : > { %v5205_v20 = vld.sshfl [vmem:[#allocation1 + $0x20] sm:$0xff pattern:$0x75316420]  ;;  %v5206_v58 = vld.sshfl [vmem:[#allocation1 + $0x28] sm:$0xff pattern:$0x75316420] }
 0x837   : > { %v5207_v29 = vld.sshfl [vmem:[#allocation1 + $0x30] sm:$0xff pattern:$0x75316420]  ;;  %v5208_v18 = vld.sshfl [vmem:[#allocation1 + $0x38] sm:$0xff pattern:$0x75316420] }
 0x838   : > { %5239 = vmatpush.msrb.mxu1 %v5207_v29  ;;  %5259 = vmatpush.msra.mxu2 %v5208_v18 }
 0x83a   : > { %5240 = vmatpush.msrb.mxu1 %v5205_v20  ;;  %5260 = vmatpush.msra.mxu2 %v5206_v58 }
 0x83c   : > { %5241 = vmatpush.msrb.mxu1 %v5203_v49  ;;  %5261 = vmatpush.msra.mxu2 %v5204_v34 }
 0x83e   : > { %5242 = vmatpush.msrb.mxu1 %v8958_v17  ;;  %5262 = vmatpush.msra.mxu2 %v8960_v9 }
 0x83f   : > { %5401 = vmatmul.msk.f32.vlgmr.msra.gmra.mxu2 %vm2700_vm12, %v5161_v36  ;;  %5399 = vmatmul.msk.f32.vlgmr.msrb.gmra.mxu1 %vm2700_vm12, %v5161_v36 }
 0x889   : > { %v5175_v57 = vpop.permute.xlu1 %5174 }
 0x8bc   : > { %v5244_v4 = vpop.f32.mrf.mxu1 }
 0x8bd   : > { %v5245_v45 = vadd.f32 %v5244_v4, %v5175_v57 }
 0x8bf   : > { %v5267_v31 = vmax.f32 %v5245_v45, 0.0 }
 0x8c2   : > { %v5264_v32 = vpop.f32.mrf.mxu2 }
 0x8c3   : > { %v5265_v42 = vadd.f32 %v5264_v32, %v5175_v57 }
 0x8c5   : > { %v5268_v46 = vmax.f32 %v5265_v42, 0.0 }
 0x8c7   : > { %v5271_v16 = vrot.slane %v5268_v46, 4 }
 0x8c9   : > { %v5272_v17 = vsel %vm869_vm11, %v5267_v31, %v5271_v16 }
 0x8ca   : > { %5274 = vst [vmem:[%s379_s16] sm:$0xff] %v5272_v17 }
 0x8cb PF: > { %s20_s13 = sadd.s32 1, %s5435_s13  }
 0x8cc   : > { %p17_p4 = scmp.ge.s32.totalorder %s20_s13, 4  }
 0x8ce   :  { %19 = sbr.rel (!%p17_p4) target bundleno = 1 (0x1), region = 131 }

</bundles_post_ra>
